<compile_context>
chip_gen: v7x
topology: tpu7x:2x2x1
jax: 0.10.0
libtpu: 0.0.40
codegen_flags: <defaults>
</compile_context>

<pallas_src>
import functools
import math

import jax
import jax.numpy as jnp
from jax.experimental import pallas as pl
from jax.experimental.pallas import tpu as pltpu

EMBED = 128
HEADS = 4
DHEAD = EMBED // HEADS
LAYERS = 2
FF = 2048            # PyTorch TransformerDecoderLayer default dim_feedforward
MAX_LEN = 512
EPS = 1e-5
NEG_INF = -1e30      # stands in for float('-inf') in the additive mask

VMEM_LIMIT = 48 * 1024 * 1024   # <= v7x physical 64 MiB, plenty on v5e/v6e


def _cparams(semantics):
    return pltpu.CompilerParams(dimension_semantics=semantics,
                                vmem_limit_bytes=VMEM_LIMIT)


def _round_up(x, m):
    return (x + m - 1) // m * m


def _pick_tile(dim, target, align):
    """Largest multiple of `align` <= target that divides `dim`.
    `dim` must already be a multiple of `align` (pad first)."""
    t = min(_round_up(target, align), dim)
    t = (t // align) * align
    while t > align and dim % t:
        t -= align
    return t


# ----------------------------- kernel helpers -------------------------------

def _softmax(s, causal):
    if causal:
        # exact reproduction of the module's quirky mask:
        #   allowed (0.0) where j >= i, blocked (-inf) where j < i
        row = jax.lax.broadcasted_iota(jnp.int32, s.shape, 0)
        col = jax.lax.broadcasted_iota(jnp.int32, s.shape, 1)
        s = jnp.where(col >= row, s, NEG_INF)
    s = s - jnp.max(s, axis=-1, keepdims=True)
    p = jnp.exp(s)
    return p * pl.reciprocal(jnp.sum(p, axis=-1, keepdims=True), approx=True)


def _mha(q, k, v, scale, causal):
    """Per-head attention, unrolled over HEADS.  q,k,v: (T, E) / (S, E) f32.
    Returns a lane-dense (T, E) f32 result (heads concatenated along lanes)."""
    outs = []
    for h in range(HEADS):
        lo, hi = h * DHEAD, (h + 1) * DHEAD
        q_h = q[:, lo:hi].astype(jnp.bfloat16)
        k_h = k[:, lo:hi].astype(jnp.bfloat16)
        v_h = v[:, lo:hi].astype(jnp.bfloat16)
        s = jnp.einsum('qd,kd->qk', q_h, k_h,
                       preferred_element_type=jnp.float32) * scale
        p = _softmax(s, causal)
        outs.append(jnp.dot(p.astype(jnp.bfloat16), v_h,
                            preferred_element_type=jnp.float32))
    return jnp.concatenate(outs, axis=-1)            # (T, E) lane-dense


def _residual_layernorm(y, res, gamma, beta):
    """LayerNorm(res + y); statistics in f32."""
    y = y + res
    mu = jnp.mean(y, axis=-1, keepdims=True)
    var = jnp.mean(jnp.square(y - mu), axis=-1, keepdims=True)
    return (y - mu) * jax.lax.rsqrt(var + EPS) * gamma + beta


# ------------------------------ fused kernels -------------------------------

def _self_attn_block_kernel(x_ref, wqkv_ref, bqkv_ref, wo_ref, bo_ref,
                            g_ref, b_ref, o_ref, *, scale):
    """One batch: fused QKV proj -> causal MHA -> out-proj + residual + LN."""
    x = x_ref[0]                                              # (S, E) bf16
    qkv = jnp.dot(x, wqkv_ref[...],
                  preferred_element_type=jnp.float32) + bqkv_ref[...]
    attn = _mha(qkv[:, :EMBED], qkv[:, EMBED:2 * EMBED], qkv[:, 2 * EMBED:],
                scale, causal=True)
    y = jnp.dot(attn.astype(jnp.bfloat16), wo_ref[...],
                preferred_element_type=jnp.float32) + bo_ref[...]
    o_ref[0] = _residual_layernorm(y, x.astype(jnp.float32),
                                   g_ref[...], b_ref[...]).astype(o_ref.dtype)


def _cross_attn_block_kernel(x_ref, m_ref, wq_ref, bq_ref, wkv_ref, bkv_ref,
                             wo_ref, bo_ref, g_ref, b_ref, o_ref, *, scale):
    """One batch: fused Q and KV proj -> unmasked MHA -> out-proj + res + LN."""
    x = x_ref[0]                                              # (S, E) bf16
    m = m_ref[0]                                              # (S, E) bf16
    q = jnp.dot(x, wq_ref[...],
                preferred_element_type=jnp.float32) + bq_ref[...]
    kv = jnp.dot(m, wkv_ref[...],
                 preferred_element_type=jnp.float32) + bkv_ref[...]
    attn = _mha(q, kv[:, :EMBED], kv[:, EMBED:], scale, causal=False)
    y = jnp.dot(attn.astype(jnp.bfloat16), wo_ref[...],
                preferred_element_type=jnp.float32) + bo_ref[...]
    o_ref[0] = _residual_layernorm(y, x.astype(jnp.float32),
                                   g_ref[...], b_ref[...]).astype(o_ref.dtype)


def _ffn_block_kernel(x_ref, w1_ref, b1_ref, w2_ref, b2_ref,
                      g_ref, b_ref, o_ref):
    """LayerNorm(x + relu(x@w1+b1)@w2 + b2); (tm, FF) hidden stays in VMEM."""
    x = x_ref[...]                                            # (tm, E) bf16
    h = jnp.dot(x, w1_ref[...],
                preferred_element_type=jnp.float32) + b1_ref[...]
    h = jnp.maximum(h, 0.0)
    y = jnp.dot(h.astype(jnp.bfloat16), w2_ref[...],
                preferred_element_type=jnp.float32) + b2_ref[...]
    o_ref[...] = _residual_layernorm(y, x.astype(jnp.float32),
                                     g_ref[...], b_ref[...]).astype(o_ref.dtype)


def _head_kernel(x_ref, w_ref, b_ref, o_ref):
    """y = x @ w + b (K = EMBED = 128, single MXU step, no accumulator)."""
    o_ref[...] = (jnp.dot(x_ref[...], w_ref[...],
                          preferred_element_type=jnp.float32)
                  + b_ref[...]).astype(o_ref.dtype)


# ------------------------------ block wrappers ------------------------------

def self_attn_block(x, p, gamma, beta):
    B, S, E = x.shape
    kernel = functools.partial(_self_attn_block_kernel,
                               scale=1.0 / math.sqrt(DHEAD))
    xblk = pl.BlockSpec((1, S, E), lambda b: (b, 0, 0))
    wspec = lambda shape: pl.BlockSpec(shape, lambda b: (0,) * len(shape))
    return pl.pallas_call(
        kernel,
        grid=(B,),
        out_shape=jax.ShapeDtypeStruct((B, S, E), jnp.bfloat16),
        in_specs=[xblk,
                  wspec((E, 3 * E)), wspec((1, 3 * E)),
                  wspec((E, E)), wspec((1, E)),
                  wspec((1, E)), wspec((1, E))],
        out_specs=xblk,
        compiler_params=_cparams(("parallel",)),
    )(x, p["w_qkv"], p["b_qkv"], p["wo"], p["bo"], gamma, beta)


def cross_attn_block(x, memory, p, gamma, beta):
    B, S, E = x.shape
    kernel = functools.partial(_cross_attn_block_kernel,
                               scale=1.0 / math.sqrt(DHEAD))
    xblk = pl.BlockSpec((1, S, E), lambda b: (b, 0, 0))
    wspec = lambda shape: pl.BlockSpec(shape, lambda b: (0,) * len(shape))
    return pl.pallas_call(
        kernel,
        grid=(B,),
        out_shape=jax.ShapeDtypeStruct((B, S, E), jnp.bfloat16),
        in_specs=[xblk, xblk,
                  wspec((E, E)), wspec((1, E)),
                  wspec((E, 2 * E)), wspec((1, 2 * E)),
                  wspec((E, E)), wspec((1, E)),
                  wspec((1, E)), wspec((1, E))],
        out_specs=xblk,
        compiler_params=_cparams(("parallel",)),
    )(x, memory, p["wq"], p["bq"], p["w_kv"], p["b_kv"],
      p["wo"], p["bo"], gamma, beta)


def ffn_block(x, p, gamma, beta, *, tm=256):
    B, S, E = x.shape
    M = B * S
    x2 = x.reshape(M, E)
    Mp = _round_up(M, 8)
    if Mp != M:
        x2 = jnp.pad(x2, ((0, Mp - M), (0, 0)))
    tm = _pick_tile(Mp, tm, 8)
    F = p["w1"].shape[1]
    out = pl.pallas_call(
        _ffn_block_kernel,
        grid=(Mp // tm,),
        out_shape=jax.ShapeDtypeStruct((Mp, E), jnp.bfloat16),
        in_specs=[pl.BlockSpec((tm, E), lambda i: (i, 0)),
                  pl.BlockSpec((E, F), lambda i: (0, 0)),
                  pl.BlockSpec((1, F), lambda i: (0, 0)),
                  pl.BlockSpec((F, E), lambda i: (0, 0)),
                  pl.BlockSpec((1, E), lambda i: (0, 0)),
                  pl.BlockSpec((1, E), lambda i: (0, 0)),
                  pl.BlockSpec((1, E), lambda i: (0, 0))],
        out_specs=pl.BlockSpec((tm, E), lambda i: (i, 0)),
        compiler_params=_cparams(("parallel",)),
    )(x2, p["w1"], p["b1"], p["w2"], p["b2"], gamma, beta)
    return out[:M].reshape(B, S, E)


def vocab_head(x2, w, b, *, tm=256, tn=512):
    M, E = x2.shape
    N = w.shape[1]                      # pre-padded to a multiple of 256
    Mp = _round_up(M, 8)
    if Mp != M:
        x2 = jnp.pad(x2, ((0, Mp - M), (0, 0)))
    tm = _pick_tile(Mp, tm, 8)
    tn = _pick_tile(N, tn, 128)
    out = pl.pallas_call(
        _head_kernel,
        grid=(Mp // tm, N // tn),
        out_shape=jax.ShapeDtypeStruct((Mp, N), jnp.float32),
        in_specs=[pl.BlockSpec((tm, E), lambda i, j: (i, 0)),
                  pl.BlockSpec((E, tn), lambda i, j: (0, j)),
                  pl.BlockSpec((1, tn), lambda i, j: (0, j))],
        out_specs=pl.BlockSpec((tm, tn), lambda i, j: (i, j)),
        compiler_params=_cparams(("parallel", "parallel")),
    )(x2, w, b)
    return out[:M]


# ------------------------------ model wiring --------------------------------

def decoder_layer(x, memory, p):
    x = self_attn_block(x, p["self_attn"], p["ln1_g"], p["ln1_b"])
    x = cross_attn_block(x, memory, p["cross_attn"], p["ln2_g"], p["ln2_b"])
    x = ffn_block(x, p["ffn"], p["ln3_g"], p["ln3_b"])
    return x


def forward(token_ids, params):
    B, S = token_ids.shape
    vocab = params["embedding"].shape[0]          # static under jit
    # embedding gather + positional slice (plain-JAX glue), bf16 activations
    x = (params["embedding"][token_ids]
         + params["pos"][:, :S, :]).astype(jnp.bfloat16)      # (B, S, E)
    memory = x
    for layer_p in params["layers"]:
        x = decoder_layer(x, memory, layer_p)
    logits = vocab_head(x.reshape(B * S, EMBED), params["fc_w"], params["fc_b"])
    return logits[:, :vocab].reshape(B, S, vocab)


# --------------------------- deterministic params ---------------------------

def init_params(key, vocab_size):
    def nrm(k, shape, scale=0.02):
        return scale * jax.random.normal(k, shape, jnp.float32)

    keys = iter(jax.random.split(key, 128))
    bf16 = lambda a: a.astype(jnp.bfloat16)       # pre-cast weights ONCE

    def self_attn_params():
        return dict(
            w_qkv=bf16(nrm(next(keys), (EMBED, 3 * EMBED))),   # fused Q|K|V
            b_qkv=nrm(next(keys), (1, 3 * EMBED)),
            wo=bf16(nrm(next(keys), (EMBED, EMBED))),
            bo=nrm(next(keys), (1, EMBED)),
        )

    def cross_attn_params():
        return dict(
            wq=bf16(nrm(next(keys), (EMBED, EMBED))),
            bq=nrm(next(keys), (1, EMBED)),
            w_kv=bf16(nrm(next(keys), (EMBED, 2 * EMBED))),    # fused K|V
            b_kv=nrm(next(keys), (1, 2 * EMBED)),
            wo=bf16(nrm(next(keys), (EMBED, EMBED))),
            bo=nrm(next(keys), (1, EMBED)),
        )

    layers = []
    for _ in range(LAYERS):
        layers.append(dict(
            self_attn=self_attn_params(),
            cross_attn=cross_attn_params(),
            ln1_g=jnp.ones((1, EMBED), jnp.float32),
            ln1_b=jnp.zeros((1, EMBED), jnp.float32),
            ln2_g=jnp.ones((1, EMBED), jnp.float32),
            ln2_b=jnp.zeros((1, EMBED), jnp.float32),
            ln3_g=jnp.ones((1, EMBED), jnp.float32),
            ln3_b=jnp.zeros((1, EMBED), jnp.float32),
            ffn=dict(
                w1=bf16(nrm(next(keys), (EMBED, FF))),
                b1=nrm(next(keys), (1, FF)),
                w2=bf16(nrm(next(keys), (FF, EMBED))),
                b2=nrm(next(keys), (1, EMBED)),
            ),
        ))

    # vocab head: pad to a lane-dense multiple of 256 ONCE at init
    vpad = _round_up(vocab_size, 256)
    fc_w = nrm(next(keys), (EMBED, vocab_size))
    fc_b = nrm(next(keys), (1, vocab_size))
    if vpad != vocab_size:
        fc_w = jnp.pad(fc_w, ((0, 0), (0, vpad - vocab_size)))
        fc_b = jnp.pad(fc_b, ((0, 0), (0, vpad - vocab_size)))

    return dict(
        embedding=nrm(next(keys), (vocab_size, EMBED)),
        # nn.Parameter(zeros) in torch __init__; small random here so the
        # positional term actually participates in the test.
        pos=nrm(next(keys), (1, MAX_LEN, EMBED)),
        layers=layers,
        fc_w=bf16(fc_w),
        fc_b=fc_b,
    )


if __name__ == "__main__":
    vocab_size = 64
    B, S = 2, 8
    key = jax.random.PRNGKey(0)
    pkey, dkey = jax.random.split(key)
    params = init_params(pkey, vocab_size)
    token_ids = jax.random.randint(dkey, (B, S), 0, vocab_size, dtype=jnp.int32)

    out = jax.jit(forward)(token_ids, params)
    jax.block_until_ready(out)
    assert out.shape == (B, S, vocab_size)
    assert bool(jnp.all(jnp.isfinite(out)))
    print("KERNEL_OK")
</pallas_src>

<mosaic_0001>
module attributes {stable_mosaic.version = 11 : i64} {
  func.func @_cross_attn_block_kernel(%arg0: i32, %arg1: memref<1x8x128xbf16, #tpu.memory_space<vmem>>, %arg2: memref<1x8x128xbf16, #tpu.memory_space<vmem>>, %arg3: memref<128x128xbf16, #tpu.memory_space<vmem>>, %arg4: memref<1x128xf32, #tpu.memory_space<vmem>>, %arg5: memref<128x256xbf16, #tpu.memory_space<vmem>>, %arg6: memref<1x256xf32, #tpu.memory_space<vmem>>, %arg7: memref<128x128xbf16, #tpu.memory_space<vmem>>, %arg8: memref<1x128xf32, #tpu.memory_space<vmem>>, %arg9: memref<1x128xf32, #tpu.memory_space<vmem>>, %arg10: memref<1x128xf32, #tpu.memory_space<vmem>>, %arg11: memref<1x8x128xbf16, #tpu.memory_space<vmem>>) attributes {dimension_semantics = [#tpu.dimension_semantics<parallel>], iteration_bounds = array<i64: 2>, scalar_prefetch = 0 : i64, scratch_operands = 0 : i64, tpu.core_type = #tpu.core_type<tc>, window_params = [{transform_indices = @transform_0, window_bounds = array<i64: 1, 8, 128>}, {transform_indices = @transform_1, window_bounds = array<i64: 1, 8, 128>}, {pipeline_mode = #tpu.pipeline_mode<synchronous>, transform_indices = @transform_2, window_bounds = array<i64: 128, 128>}, {pipeline_mode = #tpu.pipeline_mode<synchronous>, transform_indices = @transform_3, window_bounds = array<i64: 1, 128>}, {pipeline_mode = #tpu.pipeline_mode<synchronous>, transform_indices = @transform_4, window_bounds = array<i64: 128, 256>}, {pipeline_mode = #tpu.pipeline_mode<synchronous>, transform_indices = @transform_5, window_bounds = array<i64: 1, 256>}, {pipeline_mode = #tpu.pipeline_mode<synchronous>, transform_indices = @transform_6, window_bounds = array<i64: 128, 128>}, {pipeline_mode = #tpu.pipeline_mode<synchronous>, transform_indices = @transform_7, window_bounds = array<i64: 1, 128>}, {pipeline_mode = #tpu.pipeline_mode<synchronous>, transform_indices = @transform_8, window_bounds = array<i64: 1, 128>}, {pipeline_mode = #tpu.pipeline_mode<synchronous>, transform_indices = @transform_9, window_bounds = array<i64: 1, 128>}, {transform_indices = @transform_10, window_bounds = array<i64: 1, 8, 128>}]} {
    %c0 = arith.constant 0 : index
    %c0_0 = arith.constant 0 : index
    %c0_1 = arith.constant 0 : index
    %0 = vector.load %arg1[%c0, %c0_0, %c0_1] : memref<1x8x128xbf16, #tpu.memory_space<vmem>>, vector<1x8x128xbf16>
    %1 = vector.shape_cast %0 : vector<1x8x128xbf16> to vector<8x128xbf16>
    %c0_2 = arith.constant 0 : index
    %c0_3 = arith.constant 0 : index
    %c0_4 = arith.constant 0 : index
    %2 = vector.load %arg2[%c0_2, %c0_3, %c0_4] : memref<1x8x128xbf16, #tpu.memory_space<vmem>>, vector<1x8x128xbf16>
    %3 = vector.shape_cast %2 : vector<1x8x128xbf16> to vector<8x128xbf16>
    %c0_5 = arith.constant 0 : index
    %c0_6 = arith.constant 0 : index
    %4 = vector.load %arg3[%c0_5, %c0_6] : memref<128x128xbf16, #tpu.memory_space<vmem>>, vector<128x128xbf16>
    %cst = arith.constant dense<0.000000e+00> : vector<8x128xf32>
    %5 = tpu.matmul %1, %4, %cst {dimension_numbers = #tpu.dot_dimension_numbers<[1], [0], [0], [1], [0, 0, 1, 1], [], []>} : vector<8x128xbf16>, vector<128x128xbf16>, vector<8x128xf32> -> vector<8x128xf32>
    %c0_7 = arith.constant 0 : index
    %c0_8 = arith.constant 0 : index
    %6 = vector.load %arg4[%c0_7, %c0_8] : memref<1x128xf32, #tpu.memory_space<vmem>>, vector<1x128xf32>
    %7 = vector.broadcast %6 : vector<1x128xf32> to vector<8x128xf32>
    %8 = arith.addf %5, %7 : vector<8x128xf32>
    %c0_9 = arith.constant 0 : index
    %c0_10 = arith.constant 0 : index
    %9 = vector.load %arg5[%c0_9, %c0_10] : memref<128x256xbf16, #tpu.memory_space<vmem>>, vector<128x256xbf16>
    %cst_11 = arith.constant dense<0.000000e+00> : vector<8x256xf32>
    %10 = tpu.matmul %3, %9, %cst_11 {dimension_numbers = #tpu.dot_dimension_numbers<[1], [0], [0], [1], [0, 0, 1, 1], [], []>} : vector<8x128xbf16>, vector<128x256xbf16>, vector<8x256xf32> -> vector<8x256xf32>
    %c0_12 = arith.constant 0 : index
    %c0_13 = arith.constant 0 : index
    %11 = vector.load %arg6[%c0_12, %c0_13] : memref<1x256xf32, #tpu.memory_space<vmem>>, vector<1x256xf32>
    %12 = vector.broadcast %11 : vector<1x256xf32> to vector<8x256xf32>
    %13 = arith.addf %10, %12 : vector<8x256xf32>
    %14 = vector.extract_strided_slice %13 {offsets = [0, 0], sizes = [8, 128], strides = [1, 1]} : vector<8x256xf32> to vector<8x128xf32>
    %15 = vector.extract_strided_slice %13 {offsets = [0, 128], sizes = [8, 128], strides = [1, 1]} : vector<8x256xf32> to vector<8x128xf32>
    %16 = vector.extract_strided_slice %8 {offsets = [0, 0], sizes = [8, 32], strides = [1, 1]} : vector<8x128xf32> to vector<8x32xf32>
    %17 = arith.truncf %16 : vector<8x32xf32> to vector<8x32xbf16>
    %18 = vector.extract_strided_slice %14 {offsets = [0, 0], sizes = [8, 32], strides = [1, 1]} : vector<8x128xf32> to vector<8x32xf32>
    %19 = arith.truncf %18 : vector<8x32xf32> to vector<8x32xbf16>
    %20 = vector.extract_strided_slice %15 {offsets = [0, 0], sizes = [8, 32], strides = [1, 1]} : vector<8x128xf32> to vector<8x32xf32>
    %21 = arith.truncf %20 : vector<8x32xf32> to vector<8x32xbf16>
    "tpu.trace_start"() <{level = 10 : i32, message = "qd,kd->qk"}> : () -> ()
    %cst_14 = arith.constant dense<0.000000e+00> : vector<8x8xf32>
    %22 = tpu.matmul %17, %19, %cst_14 {dimension_numbers = #tpu.dot_dimension_numbers<[1], [1], [0], [0], [0, 0, 1, 0], [], []>} : vector<8x32xbf16>, vector<8x32xbf16>, vector<8x8xf32> -> vector<8x8xf32>
    "tpu.trace_stop"() : () -> ()
    %cst_15 = arith.constant 0.176776692 : f32
    %23 = vector.broadcast %cst_15 : f32 to vector<8x8xf32>
    %24 = arith.mulf %22, %23 : vector<8x8xf32>
    %cst_16 = arith.constant dense<0xFF800000> : vector<8xf32>
    %25 = vector.multi_reduction <maximumf>, %24, %cst_16 [1] : vector<8x8xf32> to vector<8xf32>
    %26 = vector.shape_cast %25 : vector<8xf32> to vector<8x1xf32>
    %27 = vector.broadcast %26 : vector<8x1xf32> to vector<8x8xf32>
    %28 = arith.subf %24, %27 : vector<8x8xf32>
    %29 = math.exp %28 : vector<8x8xf32>
    %cst_17 = arith.constant dense<0.000000e+00> : vector<8xf32>
    %30 = vector.multi_reduction <add>, %29, %cst_17 [1] : vector<8x8xf32> to vector<8xf32>
    %31 = vector.shape_cast %30 : vector<8xf32> to vector<8x1xf32>
    %32 = tpu.reciprocal %31 {approx = true} : vector<8x1xf32> -> vector<8x1xf32>
    %33 = vector.broadcast %32 : vector<8x1xf32> to vector<8x8xf32>
    %34 = arith.mulf %29, %33 : vector<8x8xf32>
    %35 = arith.truncf %34 : vector<8x8xf32> to vector<8x8xbf16>
    %cst_18 = arith.constant dense<0.000000e+00> : vector<8x32xf32>
    %36 = tpu.matmul %35, %21, %cst_18 {dimension_numbers = #tpu.dot_dimension_numbers<[1], [0], [0], [1], [0, 0, 1, 1], [], []>} : vector<8x8xbf16>, vector<8x32xbf16>, vector<8x32xf32> -> vector<8x32xf32>
    %37 = vector.extract_strided_slice %8 {offsets = [0, 32], sizes = [8, 32], strides = [1, 1]} : vector<8x128xf32> to vector<8x32xf32>
    %38 = arith.truncf %37 : vector<8x32xf32> to vector<8x32xbf16>
    %39 = vector.extract_strided_slice %14 {offsets = [0, 32], sizes = [8, 32], strides = [1, 1]} : vector<8x128xf32> to vector<8x32xf32>
    %40 = arith.truncf %39 : vector<8x32xf32> to vector<8x32xbf16>
    %41 = vector.extract_strided_slice %15 {offsets = [0, 32], sizes = [8, 32], strides = [1, 1]} : vector<8x128xf32> to vector<8x32xf32>
    %42 = arith.truncf %41 : vector<8x32xf32> to vector<8x32xbf16>
    "tpu.trace_start"() <{level = 10 : i32, message = "qd,kd->qk"}> : () -> ()
    %cst_19 = arith.constant dense<0.000000e+00> : vector<8x8xf32>
    %43 = tpu.matmul %38, %40, %cst_19 {dimension_numbers = #tpu.dot_dimension_numbers<[1], [1], [0], [0], [0, 0, 1, 0], [], []>} : vector<8x32xbf16>, vector<8x32xbf16>, vector<8x8xf32> -> vector<8x8xf32>
    "tpu.trace_stop"() : () -> ()
    %cst_20 = arith.constant 0.176776692 : f32
    %44 = vector.broadcast %cst_20 : f32 to vector<8x8xf32>
    %45 = arith.mulf %43, %44 : vector<8x8xf32>
    %cst_21 = arith.constant dense<0xFF800000> : vector<8xf32>
    %46 = vector.multi_reduction <maximumf>, %45, %cst_21 [1] : vector<8x8xf32> to vector<8xf32>
    %47 = vector.shape_cast %46 : vector<8xf32> to vector<8x1xf32>
    %48 = vector.broadcast %47 : vector<8x1xf32> to vector<8x8xf32>
    %49 = arith.subf %45, %48 : vector<8x8xf32>
    %50 = math.exp %49 : vector<8x8xf32>
    %cst_22 = arith.constant dense<0.000000e+00> : vector<8xf32>
    %51 = vector.multi_reduction <add>, %50, %cst_22 [1] : vector<8x8xf32> to vector<8xf32>
    %52 = vector.shape_cast %51 : vector<8xf32> to vector<8x1xf32>
    %53 = tpu.reciprocal %52 {approx = true} : vector<8x1xf32> -> vector<8x1xf32>
    %54 = vector.broadcast %53 : vector<8x1xf32> to vector<8x8xf32>
    %55 = arith.mulf %50, %54 : vector<8x8xf32>
    %56 = arith.truncf %55 : vector<8x8xf32> to vector<8x8xbf16>
    %cst_23 = arith.constant dense<0.000000e+00> : vector<8x32xf32>
    %57 = tpu.matmul %56, %42, %cst_23 {dimension_numbers = #tpu.dot_dimension_numbers<[1], [0], [0], [1], [0, 0, 1, 1], [], []>} : vector<8x8xbf16>, vector<8x32xbf16>, vector<8x32xf32> -> vector<8x32xf32>
    %58 = vector.extract_strided_slice %8 {offsets = [0, 64], sizes = [8, 32], strides = [1, 1]} : vector<8x128xf32> to vector<8x32xf32>
    %59 = arith.truncf %58 : vector<8x32xf32> to vector<8x32xbf16>
    %60 = vector.extract_strided_slice %14 {offsets = [0, 64], sizes = [8, 32], strides = [1, 1]} : vector<8x128xf32> to vector<8x32xf32>
    %61 = arith.truncf %60 : vector<8x32xf32> to vector<8x32xbf16>
    %62 = vector.extract_strided_slice %15 {offsets = [0, 64], sizes = [8, 32], strides = [1, 1]} : vector<8x128xf32> to vector<8x32xf32>
    %63 = arith.truncf %62 : vector<8x32xf32> to vector<8x32xbf16>
    "tpu.trace_start"() <{level = 10 : i32, message = "qd,kd->qk"}> : () -> ()
    %cst_24 = arith.constant dense<0.000000e+00> : vector<8x8xf32>
    %64 = tpu.matmul %59, %61, %cst_24 {dimension_numbers = #tpu.dot_dimension_numbers<[1], [1], [0], [0], [0, 0, 1, 0], [], []>} : vector<8x32xbf16>, vector<8x32xbf16>, vector<8x8xf32> -> vector<8x8xf32>
    "tpu.trace_stop"() : () -> ()
    %cst_25 = arith.constant 0.176776692 : f32
    %65 = vector.broadcast %cst_25 : f32 to vector<8x8xf32>
    %66 = arith.mulf %64, %65 : vector<8x8xf32>
    %cst_26 = arith.constant dense<0xFF800000> : vector<8xf32>
    %67 = vector.multi_reduction <maximumf>, %66, %cst_26 [1] : vector<8x8xf32> to vector<8xf32>
    %68 = vector.shape_cast %67 : vector<8xf32> to vector<8x1xf32>
    %69 = vector.broadcast %68 : vector<8x1xf32> to vector<8x8xf32>
    %70 = arith.subf %66, %69 : vector<8x8xf32>
    %71 = math.exp %70 : vector<8x8xf32>
    %cst_27 = arith.constant dense<0.000000e+00> : vector<8xf32>
    %72 = vector.multi_reduction <add>, %71, %cst_27 [1] : vector<8x8xf32> to vector<8xf32>
    %73 = vector.shape_cast %72 : vector<8xf32> to vector<8x1xf32>
    %74 = tpu.reciprocal %73 {approx = true} : vector<8x1xf32> -> vector<8x1xf32>
    %75 = vector.broadcast %74 : vector<8x1xf32> to vector<8x8xf32>
    %76 = arith.mulf %71, %75 : vector<8x8xf32>
    %77 = arith.truncf %76 : vector<8x8xf32> to vector<8x8xbf16>
    %cst_28 = arith.constant dense<0.000000e+00> : vector<8x32xf32>
    %78 = tpu.matmul %77, %63, %cst_28 {dimension_numbers = #tpu.dot_dimension_numbers<[1], [0], [0], [1], [0, 0, 1, 1], [], []>} : vector<8x8xbf16>, vector<8x32xbf16>, vector<8x32xf32> -> vector<8x32xf32>
    %79 = vector.extract_strided_slice %8 {offsets = [0, 96], sizes = [8, 32], strides = [1, 1]} : vector<8x128xf32> to vector<8x32xf32>
    %80 = arith.truncf %79 : vector<8x32xf32> to vector<8x32xbf16>
    %81 = vector.extract_strided_slice %14 {offsets = [0, 96], sizes = [8, 32], strides = [1, 1]} : vector<8x128xf32> to vector<8x32xf32>
    %82 = arith.truncf %81 : vector<8x32xf32> to vector<8x32xbf16>
    %83 = vector.extract_strided_slice %15 {offsets = [0, 96], sizes = [8, 32], strides = [1, 1]} : vector<8x128xf32> to vector<8x32xf32>
    %84 = arith.truncf %83 : vector<8x32xf32> to vector<8x32xbf16>
    "tpu.trace_start"() <{level = 10 : i32, message = "qd,kd->qk"}> : () -> ()
    %cst_29 = arith.constant dense<0.000000e+00> : vector<8x8xf32>
    %85 = tpu.matmul %80, %82, %cst_29 {dimension_numbers = #tpu.dot_dimension_numbers<[1], [1], [0], [0], [0, 0, 1, 0], [], []>} : vector<8x32xbf16>, vector<8x32xbf16>, vector<8x8xf32> -> vector<8x8xf32>
    "tpu.trace_stop"() : () -> ()
    %cst_30 = arith.constant 0.176776692 : f32
    %86 = vector.broadcast %cst_30 : f32 to vector<8x8xf32>
    %87 = arith.mulf %85, %86 : vector<8x8xf32>
    %cst_31 = arith.constant dense<0xFF800000> : vector<8xf32>
    %88 = vector.multi_reduction <maximumf>, %87, %cst_31 [1] : vector<8x8xf32> to vector<8xf32>
    %89 = vector.shape_cast %88 : vector<8xf32> to vector<8x1xf32>
    %90 = vector.broadcast %89 : vector<8x1xf32> to vector<8x8xf32>
    %91 = arith.subf %87, %90 : vector<8x8xf32>
    %92 = math.exp %91 : vector<8x8xf32>
    %cst_32 = arith.constant dense<0.000000e+00> : vector<8xf32>
    %93 = vector.multi_reduction <add>, %92, %cst_32 [1] : vector<8x8xf32> to vector<8xf32>
    %94 = vector.shape_cast %93 : vector<8xf32> to vector<8x1xf32>
    %95 = tpu.reciprocal %94 {approx = true} : vector<8x1xf32> -> vector<8x1xf32>
    %96 = vector.broadcast %95 : vector<8x1xf32> to vector<8x8xf32>
    %97 = arith.mulf %92, %96 : vector<8x8xf32>
    %98 = arith.truncf %97 : vector<8x8xf32> to vector<8x8xbf16>
    %cst_33 = arith.constant dense<0.000000e+00> : vector<8x32xf32>
    %99 = tpu.matmul %98, %84, %cst_33 {dimension_numbers = #tpu.dot_dimension_numbers<[1], [0], [0], [1], [0, 0, 1, 1], [], []>} : vector<8x8xbf16>, vector<8x32xbf16>, vector<8x32xf32> -> vector<8x32xf32>
    %100 = tpu.concatenate %36, %57, %78, %99 in 1 : vector<8x32xf32>, vector<8x32xf32>, vector<8x32xf32>, vector<8x32xf32> -> vector<8x128xf32>
    %101 = arith.truncf %100 : vector<8x128xf32> to vector<8x128xbf16>
    %c0_34 = arith.constant 0 : index
    %c0_35 = arith.constant 0 : index
    %102 = vector.load %arg7[%c0_34, %c0_35] : memref<128x128xbf16, #tpu.memory_space<vmem>>, vector<128x128xbf16>
    %cst_36 = arith.constant dense<0.000000e+00> : vector<8x128xf32>
    %103 = tpu.matmul %101, %102, %cst_36 {dimension_numbers = #tpu.dot_dimension_numbers<[1], [0], [0], [1], [0, 0, 1, 1], [], []>} : vector<8x128xbf16>, vector<128x128xbf16>, vector<8x128xf32> -> vector<8x128xf32>
    %c0_37 = arith.constant 0 : index
    %c0_38 = arith.constant 0 : index
    %104 = vector.load %arg8[%c0_37, %c0_38] : memref<1x128xf32, #tpu.memory_space<vmem>>, vector<1x128xf32>
    %105 = vector.broadcast %104 : vector<1x128xf32> to vector<8x128xf32>
    %106 = arith.addf %103, %105 : vector<8x128xf32>
    %107 = arith.extf %1 : vector<8x128xbf16> to vector<8x128xf32>
    %c0_39 = arith.constant 0 : index
    %c0_40 = arith.constant 0 : index
    %108 = vector.load %arg9[%c0_39, %c0_40] : memref<1x128xf32, #tpu.memory_space<vmem>>, vector<1x128xf32>
    %c0_41 = arith.constant 0 : index
    %c0_42 = arith.constant 0 : index
    %109 = vector.load %arg10[%c0_41, %c0_42] : memref<1x128xf32, #tpu.memory_space<vmem>>, vector<1x128xf32>
    %110 = arith.addf %106, %107 : vector<8x128xf32>
    %cst_43 = arith.constant dense<0.000000e+00> : vector<8xf32>
    %111 = vector.multi_reduction <add>, %110, %cst_43 [1] : vector<8x128xf32> to vector<8xf32>
    %112 = vector.shape_cast %111 : vector<8xf32> to vector<8x1xf32>
    %cst_44 = arith.constant 1.280000e+02 : f32
    %113 = vector.broadcast %cst_44 : f32 to vector<8x1xf32>
    %114 = arith.divf %112, %113 : vector<8x1xf32>
    %115 = vector.broadcast %114 : vector<8x1xf32> to vector<8x128xf32>
    %116 = arith.subf %110, %115 : vector<8x128xf32>
    %117 = arith.mulf %116, %116 : vector<8x128xf32>
    %cst_45 = arith.constant dense<0.000000e+00> : vector<8xf32>
    %118 = vector.multi_reduction <add>, %117, %cst_45 [1] : vector<8x128xf32> to vector<8xf32>
    %119 = vector.shape_cast %118 : vector<8xf32> to vector<8x1xf32>
    %cst_46 = arith.constant 1.280000e+02 : f32
    %120 = vector.broadcast %cst_46 : f32 to vector<8x1xf32>
    %121 = arith.divf %119, %120 : vector<8x1xf32>
    %122 = vector.broadcast %114 : vector<8x1xf32> to vector<8x128xf32>
    %123 = arith.subf %110, %122 : vector<8x128xf32>
    %cst_47 = arith.constant 9.99999974E-6 : f32
    %124 = vector.broadcast %cst_47 : f32 to vector<8x1xf32>
    %125 = arith.addf %121, %124 : vector<8x1xf32>
    %126 = math.rsqrt %125 : vector<8x1xf32>
    %127 = vector.broadcast %126 : vector<8x1xf32> to vector<8x128xf32>
    %128 = arith.mulf %123, %127 : vector<8x128xf32>
    %129 = vector.broadcast %108 : vector<1x128xf32> to vector<8x128xf32>
    %130 = arith.mulf %128, %129 : vector<8x128xf32>
    %131 = vector.broadcast %109 : vector<1x128xf32> to vector<8x128xf32>
    %132 = arith.addf %130, %131 : vector<8x128xf32>
    %133 = arith.truncf %132 : vector<8x128xf32> to vector<8x128xbf16>
    %c0_48 = arith.constant 0 : index
    %c0_49 = arith.constant 0 : index
    %c0_50 = arith.constant 0 : index
    %134 = vector.load %arg11[%c0_48, %c0_49, %c0_50] : memref<1x8x128xbf16, #tpu.memory_space<vmem>>, vector<1x8x128xbf16>
    %135 = vector.shape_cast %134 : vector<1x8x128xbf16> to vector<8x128xbf16>
    %136 = vector.shape_cast %133 : vector<8x128xbf16> to vector<1x8x128xbf16>
    tpu.vector_store %arg11[%c0_48, %c0_49, %c0_50], %136 {strides = array<i32>} : memref<1x8x128xbf16, #tpu.memory_space<vmem>>, vector<1x8x128xbf16>,
    return
  }
  func.func @transform_0(%arg0: i32) -> (i32, i32, i32) {
    %c0_i32 = arith.constant 0 : i32
    %c0_i32_0 = arith.constant 0 : i32
    %c0_i32_1 = arith.constant 0 : i32
    return %arg0, %c0_i32, %c0_i32_0 : i32, i32, i32
  }
  func.func @transform_1(%arg0: i32) -> (i32, i32, i32) {
    %c0_i32 = arith.constant 0 : i32
    %c0_i32_0 = arith.constant 0 : i32
    %c0_i32_1 = arith.constant 0 : i32
    return %arg0, %c0_i32, %c0_i32_0 : i32, i32, i32
  }
  func.func @transform_2(%arg0: i32) -> (i32, i32) {
    %c0_i32 = arith.constant 0 : i32
    %c0_i32_0 = arith.constant 0 : i32
    %c0_i32_1 = arith.constant 0 : i32
    return %c0_i32, %c0_i32_0 : i32, i32
  }
  func.func @transform_3(%arg0: i32) -> (i32, i32) {
    %c0_i32 = arith.constant 0 : i32
    %c0_i32_0 = arith.constant 0 : i32
    %c0_i32_1 = arith.constant 0 : i32
    return %c0_i32, %c0_i32_0 : i32, i32
  }
  func.func @transform_4(%arg0: i32) -> (i32, i32) {
    %c0_i32 = arith.constant 0 : i32
    %c0_i32_0 = arith.constant 0 : i32
    %c0_i32_1 = arith.constant 0 : i32
    return %c0_i32, %c0_i32_0 : i32, i32
  }
  func.func @transform_5(%arg0: i32) -> (i32, i32) {
    %c0_i32 = arith.constant 0 : i32
    %c0_i32_0 = arith.constant 0 : i32
    %c0_i32_1 = arith.constant 0 : i32
    return %c0_i32, %c0_i32_0 : i32, i32
  }
  func.func @transform_6(%arg0: i32) -> (i32, i32) {
    %c0_i32 = arith.constant 0 : i32
    %c0_i32_0 = arith.constant 0 : i32
    %c0_i32_1 = arith.constant 0 : i32
    return %c0_i32, %c0_i32_0 : i32, i32
  }
  func.func @transform_7(%arg0: i32) -> (i32, i32) {
    %c0_i32 = arith.constant 0 : i32
    %c0_i32_0 = arith.constant 0 : i32
    %c0_i32_1 = arith.constant 0 : i32
    return %c0_i32, %c0_i32_0 : i32, i32
  }
  func.func @transform_8(%arg0: i32) -> (i32, i32) {
    %c0_i32 = arith.constant 0 : i32
    %c0_i32_0 = arith.constant 0 : i32
    %c0_i32_1 = arith.constant 0 : i32
    return %c0_i32, %c0_i32_0 : i32, i32
  }
  func.func @transform_9(%arg0: i32) -> (i32, i32) {
    %c0_i32 = arith.constant 0 : i32
    %c0_i32_0 = arith.constant 0 : i32
    %c0_i32_1 = arith.constant 0 : i32
    return %c0_i32, %c0_i32_0 : i32, i32
  }
  func.func @transform_10(%arg0: i32) -> (i32, i32, i32) {
    %c0_i32 = arith.constant 0 : i32
    %c0_i32_0 = arith.constant 0 : i32
    %c0_i32_1 = arith.constant 0 : i32
    return %arg0, %c0_i32, %c0_i32_0 : i32, i32, i32
  }
}

module attributes {stable_mosaic.version = 11 : i64} {
  func.func @_ffn_block_kernel(%arg0: i32, %arg1: memref<16x128xbf16, #tpu.memory_space<vmem>>, %arg2: memref<128x2048xbf16, #tpu.memory_space<vmem>>, %arg3: memref<1x2048xf32, #tpu.memory_space<vmem>>, %arg4: memref<2048x128xbf16, #tpu.memory_space<vmem>>, %arg5: memref<1x128xf32, #tpu.memory_space<vmem>>, %arg6: memref<1x128xf32, #tpu.memory_space<vmem>>, %arg7: memref<1x128xf32, #tpu.memory_space<vmem>>, %arg8: memref<16x128xbf16, #tpu.memory_space<vmem>>) attributes {dimension_semantics = [#tpu.dimension_semantics<parallel>], iteration_bounds = array<i64: 1>, scalar_prefetch = 0 : i64, scratch_operands = 0 : i64, tpu.core_type = #tpu.core_type<tc>, window_params = [{transform_indices = @transform_0, window_bounds = array<i64: 16, 128>}, {pipeline_mode = #tpu.pipeline_mode<synchronous>, transform_indices = @transform_1, window_bounds = array<i64: 128, 2048>}, {pipeline_mode = #tpu.pipeline_mode<synchronous>, transform_indices = @transform_2, window_bounds = array<i64: 1, 2048>}, {pipeline_mode = #tpu.pipeline_mode<synchronous>, transform_indices = @transform_3, window_bounds = array<i64: 2048, 128>}, {pipeline_mode = #tpu.pipeline_mode<synchronous>, transform_indices = @transform_4, window_bounds = array<i64: 1, 128>}, {pipeline_mode = #tpu.pipeline_mode<synchronous>, transform_indices = @transform_5, window_bounds = array<i64: 1, 128>}, {pipeline_mode = #tpu.pipeline_mode<synchronous>, transform_indices = @transform_6, window_bounds = array<i64: 1, 128>}, {transform_indices = @transform_7, window_bounds = array<i64: 16, 128>}]} {
    %c0 = arith.constant 0 : index
    %c0_0 = arith.constant 0 : index
    %0 = vector.load %arg1[%c0, %c0_0] : memref<16x128xbf16, #tpu.memory_space<vmem>>, vector<16x128xbf16>
    %c0_1 = arith.constant 0 : index
    %c0_2 = arith.constant 0 : index
    %1 = vector.load %arg2[%c0_1, %c0_2] : memref<128x2048xbf16, #tpu.memory_space<vmem>>, vector<128x2048xbf16>
    %cst = arith.constant dense<0.000000e+00> : vector<16x2048xf32>
    %2 = tpu.matmul %0, %1, %cst {dimension_numbers = #tpu.dot_dimension_numbers<[1], [0], [0], [1], [0, 0, 1, 1], [], []>} : vector<16x128xbf16>, vector<128x2048xbf16>, vector<16x2048xf32> -> vector<16x2048xf32>
    %c0_3 = arith.constant 0 : index
    %c0_4 = arith.constant 0 : index
    %3 = vector.load %arg3[%c0_3, %c0_4] : memref<1x2048xf32, #tpu.memory_space<vmem>>, vector<1x2048xf32>
    %4 = vector.broadcast %3 : vector<1x2048xf32> to vector<16x2048xf32>
    %5 = arith.addf %2, %4 : vector<16x2048xf32>
    %cst_5 = arith.constant 0.000000e+00 : f32
    %6 = vector.broadcast %cst_5 : f32 to vector<16x2048xf32>
    %7 = arith.maximumf %5, %6 : vector<16x2048xf32>
    %8 = arith.truncf %7 : vector<16x2048xf32> to vector<16x2048xbf16>
    %c0_6 = arith.constant 0 : index
    %c0_7 = arith.constant 0 : index
    %9 = vector.load %arg4[%c0_6, %c0_7] : memref<2048x128xbf16, #tpu.memory_space<vmem>>, vector<2048x128xbf16>
    %cst_8 = arith.constant dense<0.000000e+00> : vector<16x128xf32>
    %10 = tpu.matmul %8, %9, %cst_8 {dimension_numbers = #tpu.dot_dimension_numbers<[1], [0], [0], [1], [0, 0, 1, 1], [], []>} : vector<16x2048xbf16>, vector<2048x128xbf16>, vector<16x128xf32> -> vector<16x128xf32>
    %c0_9 = arith.constant 0 : index
    %c0_10 = arith.constant 0 : index
    %11 = vector.load %arg5[%c0_9, %c0_10] : memref<1x128xf32, #tpu.memory_space<vmem>>, vector<1x128xf32>
    %12 = vector.broadcast %11 : vector<1x128xf32> to vector<16x128xf32>
    %13 = arith.addf %10, %12 : vector<16x128xf32>
    %14 = arith.extf %0 : vector<16x128xbf16> to vector<16x128xf32>
    %c0_11 = arith.constant 0 : index
    %c0_12 = arith.constant 0 : index
    %15 = vector.load %arg6[%c0_11, %c0_12] : memref<1x128xf32, #tpu.memory_space<vmem>>, vector<1x128xf32>
    %c0_13 = arith.constant 0 : index
    %c0_14 = arith.constant 0 : index
    %16 = vector.load %arg7[%c0_13, %c0_14] : memref<1x128xf32, #tpu.memory_space<vmem>>, vector<1x128xf32>
    %17 = arith.addf %13, %14 : vector<16x128xf32>
    %cst_15 = arith.constant dense<0.000000e+00> : vector<16xf32>
    %18 = vector.multi_reduction <add>, %17, %cst_15 [1] : vector<16x128xf32> to vector<16xf32>
    %19 = vector.shape_cast %18 : vector<16xf32> to vector<16x1xf32>
    %cst_16 = arith.constant 1.280000e+02 : f32
    %20 = vector.broadcast %cst_16 : f32 to vector<16x1xf32>
    %21 = arith.divf %19, %20 : vector<16x1xf32>
    %22 = vector.broadcast %21 : vector<16x1xf32> to vector<16x128xf32>
    %23 = arith.subf %17, %22 : vector<16x128xf32>
    %24 = arith.mulf %23, %23 : vector<16x128xf32>
    %cst_17 = arith.constant dense<0.000000e+00> : vector<16xf32>
    %25 = vector.multi_reduction <add>, %24, %cst_17 [1] : vector<16x128xf32> to vector<16xf32>
    %26 = vector.shape_cast %25 : vector<16xf32> to vector<16x1xf32>
    %cst_18 = arith.constant 1.280000e+02 : f32
    %27 = vector.broadcast %cst_18 : f32 to vector<16x1xf32>
    %28 = arith.divf %26, %27 : vector<16x1xf32>
    %29 = vector.broadcast %21 : vector<16x1xf32> to vector<16x128xf32>
    %30 = arith.subf %17, %29 : vector<16x128xf32>
    %cst_19 = arith.constant 9.99999974E-6 : f32
    %31 = vector.broadcast %cst_19 : f32 to vector<16x1xf32>
    %32 = arith.addf %28, %31 : vector<16x1xf32>
    %33 = math.rsqrt %32 : vector<16x1xf32>
    %34 = vector.broadcast %33 : vector<16x1xf32> to vector<16x128xf32>
    %35 = arith.mulf %30, %34 : vector<16x128xf32>
    %36 = vector.broadcast %15 : vector<1x128xf32> to vector<16x128xf32>
    %37 = arith.mulf %35, %36 : vector<16x128xf32>
    %38 = vector.broadcast %16 : vector<1x128xf32> to vector<16x128xf32>
    %39 = arith.addf %37, %38 : vector<16x128xf32>
    %40 = arith.truncf %39 : vector<16x128xf32> to vector<16x128xbf16>
    %c0_20 = arith.constant 0 : index
    %c0_21 = arith.constant 0 : index
    %41 = vector.load %arg8[%c0_20, %c0_21] : memref<16x128xbf16, #tpu.memory_space<vmem>>, vector<16x128xbf16>
    tpu.vector_store %arg8[%c0_20, %c0_21], %40 {strides = array<i32>} : memref<16x128xbf16, #tpu.memory_space<vmem>>, vector<16x128xbf16>,
    return
  }
  func.func @transform_0(%arg0: i32) -> (i32, i32) {
    %c0_i32 = arith.constant 0 : i32
    %c0_i32_0 = arith.constant 0 : i32
    return %arg0, %c0_i32 : i32, i32
  }
  func.func @transform_1(%arg0: i32) -> (i32, i32) {
    %c0_i32 = arith.constant 0 : i32
    %c0_i32_0 = arith.constant 0 : i32
    %c0_i32_1 = arith.constant 0 : i32
    return %c0_i32, %c0_i32_0 : i32, i32
  }
  func.func @transform_2(%arg0: i32) -> (i32, i32) {
    %c0_i32 = arith.constant 0 : i32
    %c0_i32_0 = arith.constant 0 : i32
    %c0_i32_1 = arith.constant 0 : i32
    return %c0_i32, %c0_i32_0 : i32, i32
  }
  func.func @transform_3(%arg0: i32) -> (i32, i32) {
    %c0_i32 = arith.constant 0 : i32
    %c0_i32_0 = arith.constant 0 : i32
    %c0_i32_1 = arith.constant 0 : i32
    return %c0_i32, %c0_i32_0 : i32, i32
  }
  func.func @transform_4(%arg0: i32) -> (i32, i32) {
    %c0_i32 = arith.constant 0 : i32
    %c0_i32_0 = arith.constant 0 : i32
    %c0_i32_1 = arith.constant 0 : i32
    return %c0_i32, %c0_i32_0 : i32, i32
  }
  func.func @transform_5(%arg0: i32) -> (i32, i32) {
    %c0_i32 = arith.constant 0 : i32
    %c0_i32_0 = arith.constant 0 : i32
    %c0_i32_1 = arith.constant 0 : i32
    return %c0_i32, %c0_i32_0 : i32, i32
  }
  func.func @transform_6(%arg0: i32) -> (i32, i32) {
    %c0_i32 = arith.constant 0 : i32
    %c0_i32_0 = arith.constant 0 : i32
    %c0_i32_1 = arith.constant 0 : i32
    return %c0_i32, %c0_i32_0 : i32, i32
  }
  func.func @transform_7(%arg0: i32) -> (i32, i32) {
    %c0_i32 = arith.constant 0 : i32
    %c0_i32_0 = arith.constant 0 : i32
    return %arg0, %c0_i32 : i32, i32
  }
}

module attributes {stable_mosaic.version = 11 : i64} {
  func.func @_ffn_block_kernel(%arg0: i32, %arg1: memref<16x128xbf16, #tpu.memory_space<vmem>>, %arg2: memref<128x2048xbf16, #tpu.memory_space<vmem>>, %arg3: memref<1x2048xf32, #tpu.memory_space<vmem>>, %arg4: memref<2048x128xbf16, #tpu.memory_space<vmem>>, %arg5: memref<1x128xf32, #tpu.memory_space<vmem>>, %arg6: memref<1x128xf32, #tpu.memory_space<vmem>>, %arg7: memref<1x128xf32, #tpu.memory_space<vmem>>, %arg8: memref<16x128xbf16, #tpu.memory_space<vmem>>) attributes {dimension_semantics = [#tpu.dimension_semantics<parallel>], iteration_bounds = array<i64: 1>, scalar_prefetch = 0 : i64, scratch_operands = 0 : i64, tpu.core_type = #tpu.core_type<tc>, window_params = [{transform_indices = @transform_0, window_bounds = array<i64: 16, 128>}, {pipeline_mode = #tpu.pipeline_mode<synchronous>, transform_indices = @transform_1, window_bounds = array<i64: 128, 2048>}, {pipeline_mode = #tpu.pipeline_mode<synchronous>, transform_indices = @transform_2, window_bounds = array<i64: 1, 2048>}, {pipeline_mode = #tpu.pipeline_mode<synchronous>, transform_indices = @transform_3, window_bounds = array<i64: 2048, 128>}, {pipeline_mode = #tpu.pipeline_mode<synchronous>, transform_indices = @transform_4, window_bounds = array<i64: 1, 128>}, {pipeline_mode = #tpu.pipeline_mode<synchronous>, transform_indices = @transform_5, window_bounds = array<i64: 1, 128>}, {pipeline_mode = #tpu.pipeline_mode<synchronous>, transform_indices = @transform_6, window_bounds = array<i64: 1, 128>}, {transform_indices = @transform_7, window_bounds = array<i64: 16, 128>}]} {
    %c0 = arith.constant 0 : index
    %c0_0 = arith.constant 0 : index
    %0 = vector.load %arg1[%c0, %c0_0] : memref<16x128xbf16, #tpu.memory_space<vmem>>, vector<16x128xbf16>
    %c0_1 = arith.constant 0 : index
    %c0_2 = arith.constant 0 : index
    %1 = vector.load %arg2[%c0_1, %c0_2] : memref<128x2048xbf16, #tpu.memory_space<vmem>>, vector<128x2048xbf16>
    %cst = arith.constant dense<0.000000e+00> : vector<16x2048xf32>
    %2 = tpu.matmul %0, %1, %cst {dimension_numbers = #tpu.dot_dimension_numbers<[1], [0], [0], [1], [0, 0, 1, 1], [], []>} : vector<16x128xbf16>, vector<128x2048xbf16>, vector<16x2048xf32> -> vector<16x2048xf32>
    %c0_3 = arith.constant 0 : index
    %c0_4 = arith.constant 0 : index
    %3 = vector.load %arg3[%c0_3, %c0_4] : memref<1x2048xf32, #tpu.memory_space<vmem>>, vector<1x2048xf32>
    %4 = vector.broadcast %3 : vector<1x2048xf32> to vector<16x2048xf32>
    %5 = arith.addf %2, %4 : vector<16x2048xf32>
    %cst_5 = arith.constant 0.000000e+00 : f32
    %6 = vector.broadcast %cst_5 : f32 to vector<16x2048xf32>
    %7 = arith.maximumf %5, %6 : vector<16x2048xf32>
    %8 = arith.truncf %7 : vector<16x2048xf32> to vector<16x2048xbf16>
    %c0_6 = arith.constant 0 : index
    %c0_7 = arith.constant 0 : index
    %9 = vector.load %arg4[%c0_6, %c0_7] : memref<2048x128xbf16, #tpu.memory_space<vmem>>, vector<2048x128xbf16>
    %cst_8 = arith.constant dense<0.000000e+00> : vector<16x128xf32>
    %10 = tpu.matmul %8, %9, %cst_8 {dimension_numbers = #tpu.dot_dimension_numbers<[1], [0], [0], [1], [0, 0, 1, 1], [], []>} : vector<16x2048xbf16>, vector<2048x128xbf16>, vector<16x128xf32> -> vector<16x128xf32>
    %c0_9 = arith.constant 0 : index
    %c0_10 = arith.constant 0 : index
    %11 = vector.load %arg5[%c0_9, %c0_10] : memref<1x128xf32, #tpu.memory_space<vmem>>, vector<1x128xf32>
    %12 = vector.broadcast %11 : vector<1x128xf32> to vector<16x128xf32>
    %13 = arith.addf %10, %12 : vector<16x128xf32>
    %14 = arith.extf %0 : vector<16x128xbf16> to vector<16x128xf32>
    %c0_11 = arith.constant 0 : index
    %c0_12 = arith.constant 0 : index
    %15 = vector.load %arg6[%c0_11, %c0_12] : memref<1x128xf32, #tpu.memory_space<vmem>>, vector<1x128xf32>
    %c0_13 = arith.constant 0 : index
    %c0_14 = arith.constant 0 : index
    %16 = vector.load %arg7[%c0_13, %c0_14] : memref<1x128xf32, #tpu.memory_space<vmem>>, vector<1x128xf32>
    %17 = arith.addf %13, %14 : vector<16x128xf32>
    %cst_15 = arith.constant dense<0.000000e+00> : vector<16xf32>
    %18 = vector.multi_reduction <add>, %17, %cst_15 [1] : vector<16x128xf32> to vector<16xf32>
    %19 = vector.shape_cast %18 : vector<16xf32> to vector<16x1xf32>
    %cst_16 = arith.constant 1.280000e+02 : f32
    %20 = vector.broadcast %cst_16 : f32 to vector<16x1xf32>
    %21 = arith.divf %19, %20 : vector<16x1xf32>
    %22 = vector.broadcast %21 : vector<16x1xf32> to vector<16x128xf32>
    %23 = arith.subf %17, %22 : vector<16x128xf32>
    %24 = arith.mulf %23, %23 : vector<16x128xf32>
    %cst_17 = arith.constant dense<0.000000e+00> : vector<16xf32>
    %25 = vector.multi_reduction <add>, %24, %cst_17 [1] : vector<16x128xf32> to vector<16xf32>
    %26 = vector.shape_cast %25 : vector<16xf32> to vector<16x1xf32>
    %cst_18 = arith.constant 1.280000e+02 : f32
    %27 = vector.broadcast %cst_18 : f32 to vector<16x1xf32>
    %28 = arith.divf %26, %27 : vector<16x1xf32>
    %29 = vector.broadcast %21 : vector<16x1xf32> to vector<16x128xf32>
    %30 = arith.subf %17, %29 : vector<16x128xf32>
    %cst_19 = arith.constant 9.99999974E-6 : f32
    %31 = vector.broadcast %cst_19 : f32 to vector<16x1xf32>
    %32 = arith.addf %28, %31 : vector<16x1xf32>
    %33 = math.rsqrt %32 : vector<16x1xf32>
    %34 = vector.broadcast %33 : vector<16x1xf32> to vector<16x128xf32>
    %35 = arith.mulf %30, %34 : vector<16x128xf32>
    %36 = vector.broadcast %15 : vector<1x128xf32> to vector<16x128xf32>
    %37 = arith.mulf %35, %36 : vector<16x128xf32>
    %38 = vector.broadcast %16 : vector<1x128xf32> to vector<16x128xf32>
    %39 = arith.addf %37, %38 : vector<16x128xf32>
    %40 = arith.truncf %39 : vector<16x128xf32> to vector<16x128xbf16>
    %c0_20 = arith.constant 0 : index
    %c0_21 = arith.constant 0 : index
    %41 = vector.load %arg8[%c0_20, %c0_21] : memref<16x128xbf16, #tpu.memory_space<vmem>>, vector<16x128xbf16>
    tpu.vector_store %arg8[%c0_20, %c0_21], %40 {strides = array<i32>} : memref<16x128xbf16, #tpu.memory_space<vmem>>, vector<16x128xbf16>,
    return
  }
  func.func @transform_0(%arg0: i32) -> (i32, i32) {
    %c0_i32 = arith.constant 0 : i32
    %c0_i32_0 = arith.constant 0 : i32
    return %arg0, %c0_i32 : i32, i32
  }
  func.func @transform_1(%arg0: i32) -> (i32, i32) {
    %c0_i32 = arith.constant 0 : i32
    %c0_i32_0 = arith.constant 0 : i32
    %c0_i32_1 = arith.constant 0 : i32
    return %c0_i32, %c0_i32_0 : i32, i32
  }
  func.func @transform_2(%arg0: i32) -> (i32, i32) {
    %c0_i32 = arith.constant 0 : i32
    %c0_i32_0 = arith.constant 0 : i32
    %c0_i32_1 = arith.constant 0 : i32
    return %c0_i32, %c0_i32_0 : i32, i32
  }
  func.func @transform_3(%arg0: i32) -> (i32, i32) {
    %c0_i32 = arith.constant 0 : i32
    %c0_i32_0 = arith.constant 0 : i32
    %c0_i32_1 = arith.constant 0 : i32
    return %c0_i32, %c0_i32_0 : i32, i32
  }
  func.func @transform_4(%arg0: i32) -> (i32, i32) {
    %c0_i32 = arith.constant 0 : i32
    %c0_i32_0 = arith.constant 0 : i32
    %c0_i32_1 = arith.constant 0 : i32
    return %c0_i32, %c0_i32_0 : i32, i32
  }
  func.func @transform_5(%arg0: i32) -> (i32, i32) {
    %c0_i32 = arith.constant 0 : i32
    %c0_i32_0 = arith.constant 0 : i32
    %c0_i32_1 = arith.constant 0 : i32
    return %c0_i32, %c0_i32_0 : i32, i32
  }
  func.func @transform_6(%arg0: i32) -> (i32, i32) {
    %c0_i32 = arith.constant 0 : i32
    %c0_i32_0 = arith.constant 0 : i32
    %c0_i32_1 = arith.constant 0 : i32
    return %c0_i32, %c0_i32_0 : i32, i32
  }
  func.func @transform_7(%arg0: i32) -> (i32, i32) {
    %c0_i32 = arith.constant 0 : i32
    %c0_i32_0 = arith.constant 0 : i32
    return %arg0, %c0_i32 : i32, i32
  }
}

module attributes {stable_mosaic.version = 11 : i64} {
  func.func @_self_attn_block_kernel(%arg0: i32, %arg1: memref<1x8x128xbf16, #tpu.memory_space<vmem>>, %arg2: memref<128x384xbf16, #tpu.memory_space<vmem>>, %arg3: memref<1x384xf32, #tpu.memory_space<vmem>>, %arg4: memref<128x128xbf16, #tpu.memory_space<vmem>>, %arg5: memref<1x128xf32, #tpu.memory_space<vmem>>, %arg6: memref<1x128xf32, #tpu.memory_space<vmem>>, %arg7: memref<1x128xf32, #tpu.memory_space<vmem>>, %arg8: memref<1x8x128xbf16, #tpu.memory_space<vmem>>) attributes {dimension_semantics = [#tpu.dimension_semantics<parallel>], iteration_bounds = array<i64: 2>, scalar_prefetch = 0 : i64, scratch_operands = 0 : i64, tpu.core_type = #tpu.core_type<tc>, window_params = [{transform_indices = @transform_0, window_bounds = array<i64: 1, 8, 128>}, {pipeline_mode = #tpu.pipeline_mode<synchronous>, transform_indices = @transform_1, window_bounds = array<i64: 128, 384>}, {pipeline_mode = #tpu.pipeline_mode<synchronous>, transform_indices = @transform_2, window_bounds = array<i64: 1, 384>}, {pipeline_mode = #tpu.pipeline_mode<synchronous>, transform_indices = @transform_3, window_bounds = array<i64: 128, 128>}, {pipeline_mode = #tpu.pipeline_mode<synchronous>, transform_indices = @transform_4, window_bounds = array<i64: 1, 128>}, {pipeline_mode = #tpu.pipeline_mode<synchronous>, transform_indices = @transform_5, window_bounds = array<i64: 1, 128>}, {pipeline_mode = #tpu.pipeline_mode<synchronous>, transform_indices = @transform_6, window_bounds = array<i64: 1, 128>}, {transform_indices = @transform_7, window_bounds = array<i64: 1, 8, 128>}]} {
    %c0 = arith.constant 0 : index
    %c0_0 = arith.constant 0 : index
    %c0_1 = arith.constant 0 : index
    %0 = vector.load %arg1[%c0, %c0_0, %c0_1] : memref<1x8x128xbf16, #tpu.memory_space<vmem>>, vector<1x8x128xbf16>
    %1 = vector.shape_cast %0 : vector<1x8x128xbf16> to vector<8x128xbf16>
    %c0_2 = arith.constant 0 : index
    %c0_3 = arith.constant 0 : index
    %2 = vector.load %arg2[%c0_2, %c0_3] : memref<128x384xbf16, #tpu.memory_space<vmem>>, vector<128x384xbf16>
    %cst = arith.constant dense<0.000000e+00> : vector<8x384xf32>
    %3 = tpu.matmul %1, %2, %cst {dimension_numbers = #tpu.dot_dimension_numbers<[1], [0], [0], [1], [0, 0, 1, 1], [], []>} : vector<8x128xbf16>, vector<128x384xbf16>, vector<8x384xf32> -> vector<8x384xf32>
    %c0_4 = arith.constant 0 : index
    %c0_5 = arith.constant 0 : index
    %4 = vector.load %arg3[%c0_4, %c0_5] : memref<1x384xf32, #tpu.memory_space<vmem>>, vector<1x384xf32>
    %5 = vector.broadcast %4 : vector<1x384xf32> to vector<8x384xf32>
    %6 = arith.addf %3, %5 : vector<8x384xf32>
    %7 = vector.extract_strided_slice %6 {offsets = [0, 0], sizes = [8, 128], strides = [1, 1]} : vector<8x384xf32> to vector<8x128xf32>
    %8 = vector.extract_strided_slice %6 {offsets = [0, 128], sizes = [8, 128], strides = [1, 1]} : vector<8x384xf32> to vector<8x128xf32>
    %9 = vector.extract_strided_slice %6 {offsets = [0, 256], sizes = [8, 128], strides = [1, 1]} : vector<8x384xf32> to vector<8x128xf32>
    %10 = vector.extract_strided_slice %7 {offsets = [0, 0], sizes = [8, 32], strides = [1, 1]} : vector<8x128xf32> to vector<8x32xf32>
    %11 = arith.truncf %10 : vector<8x32xf32> to vector<8x32xbf16>
    %12 = vector.extract_strided_slice %8 {offsets = [0, 0], sizes = [8, 32], strides = [1, 1]} : vector<8x128xf32> to vector<8x32xf32>
    %13 = arith.truncf %12 : vector<8x32xf32> to vector<8x32xbf16>
    %14 = vector.extract_strided_slice %9 {offsets = [0, 0], sizes = [8, 32], strides = [1, 1]} : vector<8x128xf32> to vector<8x32xf32>
    %15 = arith.truncf %14 : vector<8x32xf32> to vector<8x32xbf16>
    "tpu.trace_start"() <{level = 10 : i32, message = "qd,kd->qk"}> : () -> ()
    %cst_6 = arith.constant dense<0.000000e+00> : vector<8x8xf32>
    %16 = tpu.matmul %11, %13, %cst_6 {dimension_numbers = #tpu.dot_dimension_numbers<[1], [1], [0], [0], [0, 0, 1, 0], [], []>} : vector<8x32xbf16>, vector<8x32xbf16>, vector<8x8xf32> -> vector<8x8xf32>
    "tpu.trace_stop"() : () -> ()
    %cst_7 = arith.constant 0.176776692 : f32
    %17 = vector.broadcast %cst_7 : f32 to vector<8x8xf32>
    %18 = arith.mulf %16, %17 : vector<8x8xf32>
    %19 = tpu.iota {dimensions = array<i32: 0>} : vector<8x8xi32>
    %20 = tpu.iota {dimensions = array<i32: 1>} : vector<8x8xi32>
    %21 = arith.cmpi sge, %20, %19 : vector<8x8xi32>
    %cst_8 = arith.constant -1.000000e+30 : f32
    %22 = vector.broadcast %cst_8 : f32 to vector<8x8xf32>
    %23 = arith.select %21, %18, %22 : vector<8x8xi1>, vector<8x8xf32>
    %cst_9 = arith.constant dense<0xFF800000> : vector<8xf32>
    %24 = vector.multi_reduction <maximumf>, %23, %cst_9 [1] : vector<8x8xf32> to vector<8xf32>
    %25 = vector.shape_cast %24 : vector<8xf32> to vector<8x1xf32>
    %26 = vector.broadcast %25 : vector<8x1xf32> to vector<8x8xf32>
    %27 = arith.subf %23, %26 : vector<8x8xf32>
    %28 = math.exp %27 : vector<8x8xf32>
    %cst_10 = arith.constant dense<0.000000e+00> : vector<8xf32>
    %29 = vector.multi_reduction <add>, %28, %cst_10 [1] : vector<8x8xf32> to vector<8xf32>
    %30 = vector.shape_cast %29 : vector<8xf32> to vector<8x1xf32>
    %31 = tpu.reciprocal %30 {approx = true} : vector<8x1xf32> -> vector<8x1xf32>
    %32 = vector.broadcast %31 : vector<8x1xf32> to vector<8x8xf32>
    %33 = arith.mulf %28, %32 : vector<8x8xf32>
    %34 = arith.truncf %33 : vector<8x8xf32> to vector<8x8xbf16>
    %cst_11 = arith.constant dense<0.000000e+00> : vector<8x32xf32>
    %35 = tpu.matmul %34, %15, %cst_11 {dimension_numbers = #tpu.dot_dimension_numbers<[1], [0], [0], [1], [0, 0, 1, 1], [], []>} : vector<8x8xbf16>, vector<8x32xbf16>, vector<8x32xf32> -> vector<8x32xf32>
    %36 = vector.extract_strided_slice %7 {offsets = [0, 32], sizes = [8, 32], strides = [1, 1]} : vector<8x128xf32> to vector<8x32xf32>
    %37 = arith.truncf %36 : vector<8x32xf32> to vector<8x32xbf16>
    %38 = vector.extract_strided_slice %8 {offsets = [0, 32], sizes = [8, 32], strides = [1, 1]} : vector<8x128xf32> to vector<8x32xf32>
    %39 = arith.truncf %38 : vector<8x32xf32> to vector<8x32xbf16>
    %40 = vector.extract_strided_slice %9 {offsets = [0, 32], sizes = [8, 32], strides = [1, 1]} : vector<8x128xf32> to vector<8x32xf32>
    %41 = arith.truncf %40 : vector<8x32xf32> to vector<8x32xbf16>
    "tpu.trace_start"() <{level = 10 : i32, message = "qd,kd->qk"}> : () -> ()
    %cst_12 = arith.constant dense<0.000000e+00> : vector<8x8xf32>
    %42 = tpu.matmul %37, %39, %cst_12 {dimension_numbers = #tpu.dot_dimension_numbers<[1], [1], [0], [0], [0, 0, 1, 0], [], []>} : vector<8x32xbf16>, vector<8x32xbf16>, vector<8x8xf32> -> vector<8x8xf32>
    "tpu.trace_stop"() : () -> ()
    %cst_13 = arith.constant 0.176776692 : f32
    %43 = vector.broadcast %cst_13 : f32 to vector<8x8xf32>
    %44 = arith.mulf %42, %43 : vector<8x8xf32>
    %45 = tpu.iota {dimensions = array<i32: 0>} : vector<8x8xi32>
    %46 = tpu.iota {dimensions = array<i32: 1>} : vector<8x8xi32>
    %47 = arith.cmpi sge, %46, %45 : vector<8x8xi32>
    %cst_14 = arith.constant -1.000000e+30 : f32
    %48 = vector.broadcast %cst_14 : f32 to vector<8x8xf32>
    %49 = arith.select %47, %44, %48 : vector<8x8xi1>, vector<8x8xf32>
    %cst_15 = arith.constant dense<0xFF800000> : vector<8xf32>
    %50 = vector.multi_reduction <maximumf>, %49, %cst_15 [1] : vector<8x8xf32> to vector<8xf32>
    %51 = vector.shape_cast %50 : vector<8xf32> to vector<8x1xf32>
    %52 = vector.broadcast %51 : vector<8x1xf32> to vector<8x8xf32>
    %53 = arith.subf %49, %52 : vector<8x8xf32>
    %54 = math.exp %53 : vector<8x8xf32>
    %cst_16 = arith.constant dense<0.000000e+00> : vector<8xf32>
    %55 = vector.multi_reduction <add>, %54, %cst_16 [1] : vector<8x8xf32> to vector<8xf32>
    %56 = vector.shape_cast %55 : vector<8xf32> to vector<8x1xf32>
    %57 = tpu.reciprocal %56 {approx = true} : vector<8x1xf32> -> vector<8x1xf32>
    %58 = vector.broadcast %57 : vector<8x1xf32> to vector<8x8xf32>
    %59 = arith.mulf %54, %58 : vector<8x8xf32>
    %60 = arith.truncf %59 : vector<8x8xf32> to vector<8x8xbf16>
    %cst_17 = arith.constant dense<0.000000e+00> : vector<8x32xf32>
    %61 = tpu.matmul %60, %41, %cst_17 {dimension_numbers = #tpu.dot_dimension_numbers<[1], [0], [0], [1], [0, 0, 1, 1], [], []>} : vector<8x8xbf16>, vector<8x32xbf16>, vector<8x32xf32> -> vector<8x32xf32>
    %62 = vector.extract_strided_slice %7 {offsets = [0, 64], sizes = [8, 32], strides = [1, 1]} : vector<8x128xf32> to vector<8x32xf32>
    %63 = arith.truncf %62 : vector<8x32xf32> to vector<8x32xbf16>
    %64 = vector.extract_strided_slice %8 {offsets = [0, 64], sizes = [8, 32], strides = [1, 1]} : vector<8x128xf32> to vector<8x32xf32>
    %65 = arith.truncf %64 : vector<8x32xf32> to vector<8x32xbf16>
    %66 = vector.extract_strided_slice %9 {offsets = [0, 64], sizes = [8, 32], strides = [1, 1]} : vector<8x128xf32> to vector<8x32xf32>
    %67 = arith.truncf %66 : vector<8x32xf32> to vector<8x32xbf16>
    "tpu.trace_start"() <{level = 10 : i32, message = "qd,kd->qk"}> : () -> ()
    %cst_18 = arith.constant dense<0.000000e+00> : vector<8x8xf32>
    %68 = tpu.matmul %63, %65, %cst_18 {dimension_numbers = #tpu.dot_dimension_numbers<[1], [1], [0], [0], [0, 0, 1, 0], [], []>} : vector<8x32xbf16>, vector<8x32xbf16>, vector<8x8xf32> -> vector<8x8xf32>
    "tpu.trace_stop"() : () -> ()
    %cst_19 = arith.constant 0.176776692 : f32
    %69 = vector.broadcast %cst_19 : f32 to vector<8x8xf32>
    %70 = arith.mulf %68, %69 : vector<8x8xf32>
    %71 = tpu.iota {dimensions = array<i32: 0>} : vector<8x8xi32>
    %72 = tpu.iota {dimensions = array<i32: 1>} : vector<8x8xi32>
    %73 = arith.cmpi sge, %72, %71 : vector<8x8xi32>
    %cst_20 = arith.constant -1.000000e+30 : f32
    %74 = vector.broadcast %cst_20 : f32 to vector<8x8xf32>
    %75 = arith.select %73, %70, %74 : vector<8x8xi1>, vector<8x8xf32>
    %cst_21 = arith.constant dense<0xFF800000> : vector<8xf32>
    %76 = vector.multi_reduction <maximumf>, %75, %cst_21 [1] : vector<8x8xf32> to vector<8xf32>
    %77 = vector.shape_cast %76 : vector<8xf32> to vector<8x1xf32>
    %78 = vector.broadcast %77 : vector<8x1xf32> to vector<8x8xf32>
    %79 = arith.subf %75, %78 : vector<8x8xf32>
    %80 = math.exp %79 : vector<8x8xf32>
    %cst_22 = arith.constant dense<0.000000e+00> : vector<8xf32>
    %81 = vector.multi_reduction <add>, %80, %cst_22 [1] : vector<8x8xf32> to vector<8xf32>
    %82 = vector.shape_cast %81 : vector<8xf32> to vector<8x1xf32>
    %83 = tpu.reciprocal %82 {approx = true} : vector<8x1xf32> -> vector<8x1xf32>
    %84 = vector.broadcast %83 : vector<8x1xf32> to vector<8x8xf32>
    %85 = arith.mulf %80, %84 : vector<8x8xf32>
    %86 = arith.truncf %85 : vector<8x8xf32> to vector<8x8xbf16>
    %cst_23 = arith.constant dense<0.000000e+00> : vector<8x32xf32>
    %87 = tpu.matmul %86, %67, %cst_23 {dimension_numbers = #tpu.dot_dimension_numbers<[1], [0], [0], [1], [0, 0, 1, 1], [], []>} : vector<8x8xbf16>, vector<8x32xbf16>, vector<8x32xf32> -> vector<8x32xf32>
    %88 = vector.extract_strided_slice %7 {offsets = [0, 96], sizes = [8, 32], strides = [1, 1]} : vector<8x128xf32> to vector<8x32xf32>
    %89 = arith.truncf %88 : vector<8x32xf32> to vector<8x32xbf16>
    %90 = vector.extract_strided_slice %8 {offsets = [0, 96], sizes = [8, 32], strides = [1, 1]} : vector<8x128xf32> to vector<8x32xf32>
    %91 = arith.truncf %90 : vector<8x32xf32> to vector<8x32xbf16>
    %92 = vector.extract_strided_slice %9 {offsets = [0, 96], sizes = [8, 32], strides = [1, 1]} : vector<8x128xf32> to vector<8x32xf32>
    %93 = arith.truncf %92 : vector<8x32xf32> to vector<8x32xbf16>
    "tpu.trace_start"() <{level = 10 : i32, message = "qd,kd->qk"}> : () -> ()
    %cst_24 = arith.constant dense<0.000000e+00> : vector<8x8xf32>
    %94 = tpu.matmul %89, %91, %cst_24 {dimension_numbers = #tpu.dot_dimension_numbers<[1], [1], [0], [0], [0, 0, 1, 0], [], []>} : vector<8x32xbf16>, vector<8x32xbf16>, vector<8x8xf32> -> vector<8x8xf32>
    "tpu.trace_stop"() : () -> ()
    %cst_25 = arith.constant 0.176776692 : f32
    %95 = vector.broadcast %cst_25 : f32 to vector<8x8xf32>
    %96 = arith.mulf %94, %95 : vector<8x8xf32>
    %97 = tpu.iota {dimensions = array<i32: 0>} : vector<8x8xi32>
    %98 = tpu.iota {dimensions = array<i32: 1>} : vector<8x8xi32>
    %99 = arith.cmpi sge, %98, %97 : vector<8x8xi32>
    %cst_26 = arith.constant -1.000000e+30 : f32
    %100 = vector.broadcast %cst_26 : f32 to vector<8x8xf32>
    %101 = arith.select %99, %96, %100 : vector<8x8xi1>, vector<8x8xf32>
    %cst_27 = arith.constant dense<0xFF800000> : vector<8xf32>
    %102 = vector.multi_reduction <maximumf>, %101, %cst_27 [1] : vector<8x8xf32> to vector<8xf32>
    %103 = vector.shape_cast %102 : vector<8xf32> to vector<8x1xf32>
    %104 = vector.broadcast %103 : vector<8x1xf32> to vector<8x8xf32>
    %105 = arith.subf %101, %104 : vector<8x8xf32>
    %106 = math.exp %105 : vector<8x8xf32>
    %cst_28 = arith.constant dense<0.000000e+00> : vector<8xf32>
    %107 = vector.multi_reduction <add>, %106, %cst_28 [1] : vector<8x8xf32> to vector<8xf32>
    %108 = vector.shape_cast %107 : vector<8xf32> to vector<8x1xf32>
    %109 = tpu.reciprocal %108 {approx = true} : vector<8x1xf32> -> vector<8x1xf32>
    %110 = vector.broadcast %109 : vector<8x1xf32> to vector<8x8xf32>
    %111 = arith.mulf %106, %110 : vector<8x8xf32>
    %112 = arith.truncf %111 : vector<8x8xf32> to vector<8x8xbf16>
    %cst_29 = arith.constant dense<0.000000e+00> : vector<8x32xf32>
    %113 = tpu.matmul %112, %93, %cst_29 {dimension_numbers = #tpu.dot_dimension_numbers<[1], [0], [0], [1], [0, 0, 1, 1], [], []>} : vector<8x8xbf16>, vector<8x32xbf16>, vector<8x32xf32> -> vector<8x32xf32>
    %114 = tpu.concatenate %35, %61, %87, %113 in 1 : vector<8x32xf32>, vector<8x32xf32>, vector<8x32xf32>, vector<8x32xf32> -> vector<8x128xf32>
    %115 = arith.truncf %114 : vector<8x128xf32> to vector<8x128xbf16>
    %c0_30 = arith.constant 0 : index
    %c0_31 = arith.constant 0 : index
    %116 = vector.load %arg4[%c0_30, %c0_31] : memref<128x128xbf16, #tpu.memory_space<vmem>>, vector<128x128xbf16>
    %cst_32 = arith.constant dense<0.000000e+00> : vector<8x128xf32>
    %117 = tpu.matmul %115, %116, %cst_32 {dimension_numbers = #tpu.dot_dimension_numbers<[1], [0], [0], [1], [0, 0, 1, 1], [], []>} : vector<8x128xbf16>, vector<128x128xbf16>, vector<8x128xf32> -> vector<8x128xf32>
    %c0_33 = arith.constant 0 : index
    %c0_34 = arith.constant 0 : index
    %118 = vector.load %arg5[%c0_33, %c0_34] : memref<1x128xf32, #tpu.memory_space<vmem>>, vector<1x128xf32>
    %119 = vector.broadcast %118 : vector<1x128xf32> to vector<8x128xf32>
    %120 = arith.addf %117, %119 : vector<8x128xf32>
    %121 = arith.extf %1 : vector<8x128xbf16> to vector<8x128xf32>
    %c0_35 = arith.constant 0 : index
    %c0_36 = arith.constant 0 : index
    %122 = vector.load %arg6[%c0_35, %c0_36] : memref<1x128xf32, #tpu.memory_space<vmem>>, vector<1x128xf32>
    %c0_37 = arith.constant 0 : index
    %c0_38 = arith.constant 0 : index
    %123 = vector.load %arg7[%c0_37, %c0_38] : memref<1x128xf32, #tpu.memory_space<vmem>>, vector<1x128xf32>
    %124 = arith.addf %120, %121 : vector<8x128xf32>
    %cst_39 = arith.constant dense<0.000000e+00> : vector<8xf32>
    %125 = vector.multi_reduction <add>, %124, %cst_39 [1] : vector<8x128xf32> to vector<8xf32>
    %126 = vector.shape_cast %125 : vector<8xf32> to vector<8x1xf32>
    %cst_40 = arith.constant 1.280000e+02 : f32
    %127 = vector.broadcast %cst_40 : f32 to vector<8x1xf32>
    %128 = arith.divf %126, %127 : vector<8x1xf32>
    %129 = vector.broadcast %128 : vector<8x1xf32> to vector<8x128xf32>
    %130 = arith.subf %124, %129 : vector<8x128xf32>
    %131 = arith.mulf %130, %130 : vector<8x128xf32>
    %cst_41 = arith.constant dense<0.000000e+00> : vector<8xf32>
    %132 = vector.multi_reduction <add>, %131, %cst_41 [1] : vector<8x128xf32> to vector<8xf32>
    %133 = vector.shape_cast %132 : vector<8xf32> to vector<8x1xf32>
    %cst_42 = arith.constant 1.280000e+02 : f32
    %134 = vector.broadcast %cst_42 : f32 to vector<8x1xf32>
    %135 = arith.divf %133, %134 : vector<8x1xf32>
    %136 = vector.broadcast %128 : vector<8x1xf32> to vector<8x128xf32>
    %137 = arith.subf %124, %136 : vector<8x128xf32>
    %cst_43 = arith.constant 9.99999974E-6 : f32
    %138 = vector.broadcast %cst_43 : f32 to vector<8x1xf32>
    %139 = arith.addf %135, %138 : vector<8x1xf32>
    %140 = math.rsqrt %139 : vector<8x1xf32>
    %141 = vector.broadcast %140 : vector<8x1xf32> to vector<8x128xf32>
    %142 = arith.mulf %137, %141 : vector<8x128xf32>
    %143 = vector.broadcast %122 : vector<1x128xf32> to vector<8x128xf32>
    %144 = arith.mulf %142, %143 : vector<8x128xf32>
    %145 = vector.broadcast %123 : vector<1x128xf32> to vector<8x128xf32>
    %146 = arith.addf %144, %145 : vector<8x128xf32>
    %147 = arith.truncf %146 : vector<8x128xf32> to vector<8x128xbf16>
    %c0_44 = arith.constant 0 : index
    %c0_45 = arith.constant 0 : index
    %c0_46 = arith.constant 0 : index
    %148 = vector.load %arg8[%c0_44, %c0_45, %c0_46] : memref<1x8x128xbf16, #tpu.memory_space<vmem>>, vector<1x8x128xbf16>
    %149 = vector.shape_cast %148 : vector<1x8x128xbf16> to vector<8x128xbf16>
    %150 = vector.shape_cast %147 : vector<8x128xbf16> to vector<1x8x128xbf16>
    tpu.vector_store %arg8[%c0_44, %c0_45, %c0_46], %150 {strides = array<i32>} : memref<1x8x128xbf16, #tpu.memory_space<vmem>>, vector<1x8x128xbf16>,
    return
  }
  func.func @transform_0(%arg0: i32) -> (i32, i32, i32) {
    %c0_i32 = arith.constant 0 : i32
    %c0_i32_0 = arith.constant 0 : i32
    %c0_i32_1 = arith.constant 0 : i32
    return %arg0, %c0_i32, %c0_i32_0 : i32, i32, i32
  }
  func.func @transform_1(%arg0: i32) -> (i32, i32) {
    %c0_i32 = arith.constant 0 : i32
    %c0_i32_0 = arith.constant 0 : i32
    %c0_i32_1 = arith.constant 0 : i32
    return %c0_i32, %c0_i32_0 : i32, i32
  }
  func.func @transform_2(%arg0: i32) -> (i32, i32) {
    %c0_i32 = arith.constant 0 : i32
    %c0_i32_0 = arith.constant 0 : i32
    %c0_i32_1 = arith.constant 0 : i32
    return %c0_i32, %c0_i32_0 : i32, i32
  }
  func.func @transform_3(%arg0: i32) -> (i32, i32) {
    %c0_i32 = arith.constant 0 : i32
    %c0_i32_0 = arith.constant 0 : i32
    %c0_i32_1 = arith.constant 0 : i32
    return %c0_i32, %c0_i32_0 : i32, i32
  }
  func.func @transform_4(%arg0: i32) -> (i32, i32) {
    %c0_i32 = arith.constant 0 : i32
    %c0_i32_0 = arith.constant 0 : i32
    %c0_i32_1 = arith.constant 0 : i32
    return %c0_i32, %c0_i32_0 : i32, i32
  }
  func.func @transform_5(%arg0: i32) -> (i32, i32) {
    %c0_i32 = arith.constant 0 : i32
    %c0_i32_0 = arith.constant 0 : i32
    %c0_i32_1 = arith.constant 0 : i32
    return %c0_i32, %c0_i32_0 : i32, i32
  }
  func.func @transform_6(%arg0: i32) -> (i32, i32) {
    %c0_i32 = arith.constant 0 : i32
    %c0_i32_0 = arith.constant 0 : i32
    %c0_i32_1 = arith.constant 0 : i32
    return %c0_i32, %c0_i32_0 : i32, i32
  }
  func.func @transform_7(%arg0: i32) -> (i32, i32, i32) {
    %c0_i32 = arith.constant 0 : i32
    %c0_i32_0 = arith.constant 0 : i32
    %c0_i32_1 = arith.constant 0 : i32
    return %arg0, %c0_i32, %c0_i32_0 : i32, i32, i32
  }
}

module attributes {stable_mosaic.version = 11 : i64} {
  func.func @_head_kernel(%arg0: i32, %arg1: i32, %arg2: memref<16x128xbf16, #tpu.memory_space<vmem>>, %arg3: memref<128x256xbf16, #tpu.memory_space<vmem>>, %arg4: memref<1x256xf32, #tpu.memory_space<vmem>>, %arg5: memref<16x256xf32, #tpu.memory_space<vmem>>) attributes {dimension_semantics = [#tpu.dimension_semantics<parallel>, #tpu.dimension_semantics<parallel>], iteration_bounds = array<i64: 1, 1>, scalar_prefetch = 0 : i64, scratch_operands = 0 : i64, tpu.core_type = #tpu.core_type<tc>, window_params = [{transform_indices = @transform_0, window_bounds = array<i64: 16, 128>}, {transform_indices = @transform_1, window_bounds = array<i64: 128, 256>}, {transform_indices = @transform_2, window_bounds = array<i64: 1, 256>}, {transform_indices = @transform_3, window_bounds = array<i64: 16, 256>}]} {
    %c0 = arith.constant 0 : index
    %c0_0 = arith.constant 0 : index
    %0 = vector.load %arg2[%c0, %c0_0] : memref<16x128xbf16, #tpu.memory_space<vmem>>, vector<16x128xbf16>
    %c0_1 = arith.constant 0 : index
    %c0_2 = arith.constant 0 : index
    %1 = vector.load %arg3[%c0_1, %c0_2] : memref<128x256xbf16, #tpu.memory_space<vmem>>, vector<128x256xbf16>
    %cst = arith.constant dense<0.000000e+00> : vector<16x256xf32>
    %2 = tpu.matmul %0, %1, %cst {dimension_numbers = #tpu.dot_dimension_numbers<[1], [0], [0], [1], [0, 0, 1, 1], [], []>} : vector<16x128xbf16>, vector<128x256xbf16>, vector<16x256xf32> -> vector<16x256xf32>
    %c0_3 = arith.constant 0 : index
    %c0_4 = arith.constant 0 : index
    %3 = vector.load %arg4[%c0_3, %c0_4] : memref<1x256xf32, #tpu.memory_space<vmem>>, vector<1x256xf32>
    %4 = vector.broadcast %3 : vector<1x256xf32> to vector<16x256xf32>
    %5 = arith.addf %2, %4 : vector<16x256xf32>
    %c0_5 = arith.constant 0 : index
    %c0_6 = arith.constant 0 : index
    %6 = vector.load %arg5[%c0_5, %c0_6] : memref<16x256xf32, #tpu.memory_space<vmem>>, vector<16x256xf32>
    tpu.vector_store %arg5[%c0_5, %c0_6], %5 {strides = array<i32>} : memref<16x256xf32, #tpu.memory_space<vmem>>, vector<16x256xf32>,
    return
  }
  func.func @transform_0(%arg0: i32, %arg1: i32) -> (i32, i32) {
    %c0_i32 = arith.constant 0 : i32
    %c0_i32_0 = arith.constant 0 : i32
    return %arg0, %c0_i32 : i32, i32
  }
  func.func @transform_1(%arg0: i32, %arg1: i32) -> (i32, i32) {
    %c0_i32 = arith.constant 0 : i32
    %c0_i32_0 = arith.constant 0 : i32
    return %c0_i32, %arg1 : i32, i32
  }
  func.func @transform_2(%arg0: i32, %arg1: i32) -> (i32, i32) {
    %c0_i32 = arith.constant 0 : i32
    %c0_i32_0 = arith.constant 0 : i32
    return %c0_i32, %arg1 : i32, i32
  }
  func.func @transform_3(%arg0: i32, %arg1: i32) -> (i32, i32) {
    %c0_i32 = arith.constant 0 : i32
    return %arg0, %arg1 : i32, i32
  }
}

</mosaic_0001>

<bundles_post_ra>
// kernel: forward.8
= control target key start
LH: loop header
LB: loop body
LE: loop exit
PB: predicated region body
PF: predicated region fallthrough
CT: control target
= control target key end

     0   :  { %s1625_s13 = smov 0   ;;  %s1859_s0 = inlined_call_operand.vmem [shape: bf16[2,8,128], index: 0, kind: input, shape index: {}]   ;;  %s1860_s1 = inlined_call_operand.vmem [shape: bf16[2,8,128], index: 1, kind: input, shape index: {}]   ;;  %s1861_s2 = inlined_call_operand.vmem [shape: bf16[128,128], index: 2, kind: input, shape index: {}]   ;;  %s1862_s3 = inlined_call_operand.vmem [shape: f32[1,128], index: 3, kind: input, shape index: {}]   ;;  %s1863_s4 = inlined_call_operand.vmem [shape: bf16[128,256], index: 4, kind: input, shape index: {}]   ;;  %s1864_s5 = inlined_call_operand.vmem [shape: f32[1,256], index: 5, kind: input, shape index: {}]   ;;  %s1865_s6 = inlined_call_operand.vmem [shape: bf16[128,128], index: 6, kind: input, shape index: {}]   ;;  %s1866_s7 = inlined_call_operand.vmem [shape: f32[1,128], index: 7, kind: input, shape index: {}]   ;;  %s1867_s8 = inlined_call_operand.vmem [shape: f32[1,128], index: 8, kind: input, shape index: {}]   ;;  %s1868_s9 = inlined_call_operand.vmem [shape: f32[1,128], index: 9, kind: input, shape index: {}]   ;;  %s1869_s10 = inlined_call_operand.vmem [shape: bf16[2,8,128], index: 10, kind: output, shape index: {}]  }
   0x1 LB: > { %s1308_s14 = sadd.s32 4294967295, %s1562_s13   ;;  %p1312_p0 = scmp.ge.s32.totalorder %s1562_s13, 1  ;;  %s1562_s13 = sphi %s1625_s13, %s20_s13  }
   0x2   : > { %p320_p1 = scmp.lt.s32.totalorder %s1562_s13, 3 }
   0x4   : > { %p321_p2 = pnand %p1312_p0, %p320_p1 }
   0x5   : > { %v1498_v0 = vld [vmem:[%s1863_s4 + $0x4] ss:$8 sps:$4 sm:$0xff] (!%p321_p2)   ;;  %v1500_v1 = vld [vmem:[%s1863_s4] ss:$8 sps:$4 sm:$0xff] (!%p321_p2)   ;;  %v1564_v2 = vmov (!%p321_p2), 0.0   ;;  %v1565_v3 = vmov (!%p321_p2), 0   ;;  %v504_v28 = vlaneseq (!%p321_p2) }
   0x6   : > { %324 = sbr.rel (%p321_p2) target bundleno = 2215 (0x8a7), region = 60  ;;  %1396 = vmatprep.subr.bf16.mxu0 (!%p321_p2), %v1564_v2  ;;  %626 = vmatprep.mubr.bf16.mxu1 (!%p321_p2), %v1565_v3  ;;  %v1501_v4 = vld [vmem:[%s1863_s4 + $0x14] ss:$8 sps:$4 sm:$0xff] (!%p321_p2)   ;;  %vm1566_vm0 = vmmov (!%p321_p2), 0   ;;  %v1503_v5 = vld [vmem:[%s1861_s2] sm:$0xff] (!%p321_p2)   ;;  %v1507_v8 = vld [vmem:[%s1861_s2 + $0x8] sm:$0xff] (!%p321_p2)  }
   0x7   : > { %594 = vmatprep.subr.bf16.mxu1 (!%p321_p2), %v1498_v0  ;;  %1412 = vmatprep.mubr.msk.bf16.mxu0 (!%p321_p2), %vm1566_vm0, %v1564_v2  ;;  %v1504_v6 = vld [vmem:[%s1863_s4 + $0x10] ss:$8 sps:$4 sm:$0xff] (!%p321_p2)   ;;  %v1505_v7 = vld [vmem:[%s1863_s4 + $0x24] ss:$8 sps:$4 sm:$0xff] (!%p321_p2)   ;;  %v1508_v9 = vld [vmem:[%s1863_s4 + $0x20] ss:$8 sps:$4 sm:$0xff] (!%p321_p2)  }
   0x8   : > { %595 = vmatpush1.bf16.msra.mxu1 (!%p321_p2), %v1500_v1  ;;  %1397 = vmatpush3.bf16.msra.mxu0 (!%p321_p2), %v1503_v5  ;;  %v1509_v10 = vld [vmem:[%s1863_s4 + $0x34] ss:$8 sps:$4 sm:$0xff] (!%p321_p2)   ;;  %v1512_v12 = vld [vmem:[%s1863_s4 + $0x30] ss:$8 sps:$4 sm:$0xff] (!%p321_p2)   ;;  %v1513_v13 = vld [vmem:[%s1863_s4 + $0x44] ss:$8 sps:$4 sm:$0xff] (!%p321_p2)  }
   0x9   : > { %596 = vmatprep.subr.bf16.mxu1 (!%p321_p2), %v1501_v4  ;;  %1398 = vmatprep.subr.bf16.mxu0 (!%p321_p2), %v1564_v2  ;;  %v1511_v11 = vld [vmem:[%s1861_s2 + $0x10] sm:$0xff] (!%p321_p2)   ;;  %v1515_v14 = vld [vmem:[%s1861_s2 + $0x18] sm:$0xff] (!%p321_p2)   ;;  %v1516_v15 = vld [vmem:[%s1863_s4 + $0x40] ss:$8 sps:$4 sm:$0xff] (!%p321_p2)   ;;  %p360_p3 = scmp.lt.s32.totalorder (!%p321_p2), %s1308_s14, 1  ;;  %v505_v29 = vshrl.u32 (!%p321_p2), %v504_v28, 7 }
   0xa   : > { %v1517_v16 = vld [vmem:[%s1863_s4 + $0x54] ss:$8 sps:$4 sm:$0xff] (!%p321_p2)   ;;  %v1519_v17 = vld [vmem:[%s1861_s2 + $0x20] sm:$0xff] (!%p321_p2)   ;;  %v1520_v18 = vld [vmem:[%s1863_s4 + $0x50] ss:$8 sps:$4 sm:$0xff] (!%p321_p2)   ;;  %vm638_vm1 = vcmask (!%p321_p2), 261120  }
   0xb   : > { %v1521_v19 = vld [vmem:[%s1863_s4 + $0x64] ss:$8 sps:$4 sm:$0xff] (!%p321_p2)   ;;  %v1524_v21 = vld [vmem:[%s1863_s4 + $0x60] ss:$8 sps:$4 sm:$0xff] (!%p321_p2)   ;;  %v1525_v22 = vld [vmem:[%s1863_s4 + $0x74] ss:$8 sps:$4 sm:$0xff] (!%p321_p2)  }
   0xc   : > { %597 = vmatpush1.bf16.msra.mxu1 (!%p321_p2), %v1504_v6  ;;  %1399 = vmatpush3.bf16.msra.mxu0 (!%p321_p2), %v1507_v8  ;;  %v1523_v20 = vld [vmem:[%s1861_s2 + $0x28] sm:$0xff] (!%p321_p2)   ;;  %v1527_v23 = vld [vmem:[%s1861_s2 + $0x30] sm:$0xff] (!%p321_p2)   ;;  %v1529_v25 = vld [vmem:[%s1861_s2 + $0x38] sm:$0xff] (!%p321_p2)   ;;  %v506_v30 = vsub.s32 (!%p321_p2), 0, %v505_v29  ;;  %v510_v33 = vsub.s32 (!%p321_p2), 1, %v505_v29  ;;  %s1567_s19 = smov (!%p321_p2), 96  }
   0xd   : > { %598 = vmatprep.subr.bf16.mxu1 %v1505_v7  ;;  %1400 = vmatprep.subr.bf16.mxu0 %v1564_v2  ;;  %s1871_s14 = smov (!%p360_p3, %s1308_s14), 1  ;;  %v1528_v24 = vld [vmem:[%s1863_s4 + $0x70] ss:$8 sps:$4 sm:$0xff]   ;;  %v502_v31 = vld [vmem:[%s1864_s5] sm:$0x3]  ;;  %vm702_vm2 = vcmask 1043456  }
   0xe   : > { %s1711_s23 = sshll.u32 %s1871_s14, 2  ;;  %v507_v32 = vrot.slane %v502_v31, %v506_v30  ;;  %v1316_v35 = vld [vmem:[%s1862_s3] ss:$0 sm:$0xff]  ;;  %v511_v37 = vrot.slane %v502_v31, %v510_v33  ;;  %s1568_s20 = smov 64   ;;  %vm686_vm3 = vcmask 64512   ;;  %vm1095_vm4 = vcmask 523264  }
   0xf   : > { %s367_s28 = scalar_lea.vmem %s1860_s1, %s1711_s23  ;;  %s363_s12 = scalar_lea.vmem %s1859_s0, %s1711_s23  ;;  %vm1097_vm5 = vcmask 785408  }
  0x10   : > { %599 = vmatpush1.bf16.msra.mxu1 %v1508_v9  ;;  %1401 = vmatpush3.bf16.msra.mxu0 %v1511_v11  ;;  %v374_v26 = vld [vmem:[%s367_s28] sm:$0xf]  ;;  %s1569_s21 = smov 32   ;;  %s371_s29 = scalar_lea.vmem %s1869_s10, %s1711_s23 }
  0x11   : > { %600 = vmatprep.subr.bf16.mxu1 %v1509_v10  ;;  %1402 = vmatprep.subr.bf16.mxu0 %v1564_v2  ;;  %v1730_v27 = vld [vmem:[%s363_s12] sm:$0xf] }
  0x14   : > { %601 = vmatpush1.bf16.msra.mxu1 %v1512_v12  ;;  %1403 = vmatpush3.bf16.msra.mxu0 %v1515_v14 }
  0x15   : > { %602 = vmatprep.subr.bf16.mxu1 %v1513_v13  ;;  %1404 = vmatprep.subr.bf16.mxu0 %v1564_v2 }
  0x18   : > { %603 = vmatpush1.bf16.msra.mxu1 %v1516_v15  ;;  %1405 = vmatpush3.bf16.msra.mxu0 %v1519_v17 }
  0x19   : > { %604 = vmatprep.subr.bf16.mxu1 %v1517_v16  ;;  %1406 = vmatprep.subr.bf16.mxu0 %v1564_v2 }
  0x1c   : > { %605 = vmatpush1.bf16.msra.mxu1 %v1520_v18  ;;  %1407 = vmatpush3.bf16.msra.mxu0 %v1523_v20 }
  0x1d   : > { %606 = vmatprep.subr.bf16.mxu1 %v1521_v19  ;;  %1408 = vmatprep.subr.bf16.mxu0 %v1564_v2 }
  0x20   : > { %607 = vmatpush1.bf16.msra.mxu1 %v1524_v21  ;;  %1409 = vmatpush3.bf16.msra.mxu0 %v1527_v23 }
  0x21   : > { %608 = vmatprep.subr.bf16.mxu1 %v1525_v22  ;;  %1410 = vmatprep.subr.bf16.mxu0 %v1564_v2 }
  0x24   : > { %609 = vmatpush1.bf16.msra.mxu1 %v1528_v24  ;;  %1411 = vmatpush3.bf16.msra.mxu0 %v1529_v25 }
  0x25   : > { %1416 = vmatprep.subr.bf16.mxu1 %v1564_v2  ;;  %1440 = vmatprep.subr.bf16.mxu0 %v1564_v2 }
  0x27   : > { %627 = vmatmul.mubr.bf16.vlgmr.msra.gmra.mrb[0].mxu1 %v374_v26  ;;  %1413 = vmatmul.mubr.bf16.vlgmr.msra.gmra.mrb[0].mxu0 %v1730_v27 }
  0x28   : > { %1418 = vmatprep.mubr.msk.bf16.mxu1 %vm1566_vm0, %v1564_v2  ;;  %1442 = vmatprep.mubr.msk.bf16.mxu0 %vm1566_vm0, %v1564_v2 }
  0xfa   : > { %v628_v34 = vpop.f32.mrb[0].mxu1  ;;  %v480_v40 = vpop.f32.mrb[0].mxu0 }
  0xfb   : > { %v629_v36 = vadd.f32 %v628_v34, %v507_v32  ;;  %v630_v38 = vpop.f32.mrb[1].mxu1  ;;  %v481_v43 = vadd.f32 %v1316_v35, %v480_v40  ;;  %v1414_v44 = vpop.f32.mrb[1].mxu0 }
  0xfc   : > { %v632_v39 = vpop.f32.mrb[2].mxu1  ;;  %v483_v45 = vpop.f32.mrb[2].mxu0  ;;  %v631_v46 = vadd.f32 %v630_v38, %v511_v37 }
  0xfd   : > { %v636_v41 = vpack.c.bf16 %v629_v36, %v629_v36  ;;  %v633_v42 = vpop.f32.mrb[3].mxu1  ;;  %v635_v47 = vpack.c.bf16 %v481_v43, %v481_v43  ;;  %v1415_v49 = vpop.f32.mrb[3].mxu0 }
  0xfe   : > { %v1747_v50 = vpack.c.bf16 %v631_v46, %v631_v46 }
  0xff   : > { %750 = vrot.lane.b32.xlu1 %v636_v41, %s1567_s19  ;;  %v643_v48 = vsel %vm638_vm1, %v636_v41, 0 }
 0x100   : > { %1417 = vmatpush3.bf16.xpose.msra.mxu1 %v643_v48  ;;  %v704_v51 = vsel %vm702_vm2, %v1747_v50, 0 }
 0x101   : > { %1422 = vmatprep.subr.bf16.mxu1 %v1564_v2 }
 0x103   : > { %747 = vrot.lane.b32.xlu1 %v635_v47, %s1567_s19 }
 0x107   : > { %860 = vrot.lane.b32.xlu1 %v635_v47, %s1568_s20  ;;  %1419 = vmatmul.mubr.msk.bf16.vlgmr.msra.gmra.mrb[4].mxu1 %vm638_vm1, %v635_v47 }
 0x108   : > { %1423 = vmatpush3.bf16.msra.mxu1 %v704_v51  ;;  %1424 = vmatprep.mubr.msk.bf16.mxu1 %vm1566_vm0, %v1564_v2 }
 0x109   : > { %1428 = vmatprep.subr.bf16.mxu1 %v1564_v2 }
 0x10b   : > { %973 = vrot.lane.b32.xlu1 %v636_v41, %s1569_s21 }
 0x10f   : > { %971 = vrot.lane.b32.xlu1 %v635_v47, %s1569_s21 }
 0x171   : > { %v751_v63 = vpop.permute.xlu1 %750 }
 0x172   : > { %v756_v11 = vsel %vm638_vm1, %v751_v63, 0 }
 0x175   : > { %v748_v0 = vpop.permute.xlu1 %747 }
 0x179   : > { %v861_v3 = vpop.permute.xlu1 %860 }
 0x17d   : > { %v974_v6 = vpop.permute.xlu1 %973 }
 0x17e   : > { %v979_v9 = vsel %vm638_vm1, %v974_v6, 0  ;;  %v1530_v6 = vld [vmem:[%s1865_s6] sm:$0xff]  }
 0x181   : > { %v972_v12 = vpop.permute.xlu1 %971 }
 0x1da   : > { %v679_v52 = vpop.f32.mrb[4].mxu1 }
 0x1db   : > { %v685_v53 = vmul.f32 0.17677669, %v679_v52  ;;  %v1420_v54 = vpop.f32.mrb[5].mxu1 }
 0x1dc   : > { %v682_v55 = vpop.f32.mrb[6].mxu1 }
 0x1dd   : > { %v1421_v56 = vpop.f32.mrb[7].mxu1  ;;  %v687_v57 = vsel %vm686_vm3, %v685_v53, -inf }
 0x1de   : > { %688 = vmax.xlane.f32.xlu0 %v687_v57 }
 0x26b   : > { %v689_v58 = vpop.xlane.xlu0 %688 }
 0x26c   : > { %v690_v59 = vsub.f32 %v685_v53, %v689_v58 }
 0x26e   : > { %v691_v60 = vmul.f32 1.442695, %v690_v59 }
 0x270   : > { %1538 = vpow2.f32 %v691_v60 }
 0x27a   : > { %v1539_v61 = vpop.eup %1538 }
 0x27b   : > { %v693_v62 = vsel %vm686_vm3, %v1539_v61, 0.0 }
 0x27c   : > { %694 = vadd.xlane.f32.xlu0 %v693_v62 }
 0x292   : > { %862 = vrot.lane.b32.xlu0 %v636_v41, %s1568_s20 }
 0x309   : > { %v695_v1 = vpop.xlane.xlu0 %694 }
 0x30a   : > { %1540 = vrcp.f32 %v695_v1 }
 0x30d   : > { %v863_v4 = vpop.permute.xlu0 %862 }
 0x30e   : > { %v868_v5 = vsel %vm638_vm1, %v863_v4, 0 }
 0x30f   : > { %1441 = vmatpush3.bf16.xpose.msra.mxu0 %v868_v5 }
 0x310   : > { %1452 = vmatprep.subr.bf16.mxu0 %v1564_v2 }
 0x314   : > { %v1541_v7 = vpop.eup %1540 }
 0x315   : > { %v697_v8 = vmul.f32 %v1541_v7, %v1539_v61  ;;  %v1531_v7 = vld [vmem:[%s1865_s6 + $0x8] sm:$0xff]  }
 0x316   : > { %1443 = vmatmul.mubr.msk.bf16.vlgmr.msra.gmra.mrb[4].mxu0 %vm638_vm1, %v861_v3 }
 0x317   : > { %1453 = vmatpush3.bf16.xpose.msra.mxu0 %v979_v9  ;;  %v698_v10 = vpack.c.bf16 %v697_v8, %v697_v8  ;;  %1454 = vmatprep.mubr.msk.bf16.mxu0 %vm1566_vm0, %v1564_v2  ;;  %v1532_v8 = vld [vmem:[%s1865_s6 + $0x10] sm:$0xff]   ;;  %v1533_v9 = vld [vmem:[%s1865_s6 + $0x18] sm:$0xff]  }
 0x318   : > { %1464 = vmatprep.subr.bf16.mxu0 %v1564_v2 }
 0x319   : > { %1425 = vmatmul.mubr.msk.bf16.vlgmr.msra.gmra.mrb[8].mxu1 %vm686_vm3, %v698_v10  ;;  %v1534_v10 = vld [vmem:[%s1865_s6 + $0x20] sm:$0xff]  }
 0x31a   : > { %1429 = vmatpush3.bf16.xpose.msra.mxu1 %v756_v11  ;;  %1430 = vmatprep.mubr.msk.bf16.mxu1 %vm1566_vm0, %v1564_v2  ;;  %v1535_v11 = vld [vmem:[%s1865_s6 + $0x28] sm:$0xff]  }
 0x31b   : > { %1434 = vmatprep.subr.bf16.mxu1 %v1564_v2 }
 0x31e   : > { %1455 = vmatmul.mubr.msk.bf16.vlgmr.msra.gmra.mrb[8].mxu0 %vm638_vm1, %v972_v12  ;;  %v1536_v12 = vld [vmem:[%s1865_s6 + $0x30] sm:$0xff]  }
 0x31f   : > { %1480 = vmatprep.mubr.msk.bf16.mxu0 %vm1566_vm0, %v1564_v2  ;;  %1465 = vmatpush3.bf16.msra.mxu0 %v1530_v6 }
 0x320   : > { %1466 = vmatprep.subr.bf16.mxu0 %v1564_v2 }
 0x321   : > { %1431 = vmatmul.mubr.msk.bf16.vlgmr.msra.gmra.mrb[12].mxu1 %vm638_vm1, %v748_v0 }
 0x322   : > { %1436 = vmatprep.mubr.msk.bf16.mxu1 %vm1566_vm0, %v1564_v2 }
 0x323   : > { %1467 = vmatpush3.bf16.msra.mxu0 %v1531_v7 }
 0x324   : > { %1468 = vmatprep.subr.bf16.mxu0 %v1564_v2 }
 0x327   : > { %1469 = vmatpush3.bf16.msra.mxu0 %v1532_v8 }
 0x328   : > { %1470 = vmatprep.subr.bf16.mxu0 %v1564_v2 }
 0x32b   : > { %1471 = vmatpush3.bf16.msra.mxu0 %v1533_v9 }
 0x32c   : > { %1472 = vmatprep.subr.bf16.mxu0 %v1564_v2 }
 0x32f   : > { %1473 = vmatpush3.bf16.msra.mxu0 %v1534_v10 }
 0x330   : > { %1474 = vmatprep.subr.bf16.mxu0 %v1564_v2 }
 0x333   : > { %1475 = vmatpush3.bf16.msra.mxu0 %v1535_v11 }
 0x334   : > { %1476 = vmatprep.subr.bf16.mxu0 %v1564_v2 }
 0x337   : > { %1477 = vmatpush3.bf16.msra.mxu0 %v1536_v12 }
 0x338   : > { %1478 = vmatprep.subr.bf16.mxu0 %v1564_v2 }
 0x3e9   : > { %v904_v13 = vpop.f32.mrb[4].mxu0 }
 0x3ea   : > { %v910_v14 = vmul.f32 0.17677669, %v904_v13  ;;  %v1444_v15 = vpop.f32.mrb[5].mxu0 }
 0x3eb   : > { %v907_v16 = vpop.f32.mrb[6].mxu0 }
 0x3ec   : > { %v1780_v17 = vpop.f32.mrb[8].mxu1  ;;  %v1445_v18 = vpop.f32.mrb[7].mxu0  ;;  %v911_v19 = vsel %vm686_vm3, %v910_v14, -inf }
 0x3ed   : > { %v1426_v20 = vpop.f32.mrb[9].mxu1  ;;  %912 = vmax.xlane.f32.xlu0 %v911_v19  ;;  %v1537_v18 = vld [vmem:[%s1865_s6 + $0x38] sm:$0xff]  }
 0x3ee   : > { %v743_v21 = vpop.f32.mrb[10].mxu1  ;;  %1479 = vmatpush3.bf16.msra.mxu0 %v1537_v18 }
 0x3ef   : > { %v1427_v22 = vpop.f32.mrb[11].mxu1 }
 0x3f1   : > { %v1015_v23 = vpop.f32.mrb[8].mxu0 }
 0x3f2   : > { %v1456_v24 = vpop.f32.mrb[9].mxu0  ;;  %v1021_v32 = vmul.f32 0.17677669, %v1015_v23 }
 0x3f3   : > { %v1018_v25 = vpop.f32.mrb[10].mxu0 }
 0x3f4   : > { %v792_v26 = vpop.f32.mrb[12].mxu1  ;;  %v1457_v28 = vpop.f32.mrb[11].mxu0  ;;  %v1022_v35 = vsel %vm686_vm3, %v1021_v32, -inf }
 0x3f5   : > { %v798_v29 = vmul.f32 0.17677669, %v792_v26  ;;  %v1432_v30 = vpop.f32.mrb[13].mxu1 }
 0x3f6   : > { %v795_v31 = vpop.f32.mrb[14].mxu1 }
 0x3f7   : > { %v1433_v33 = vpop.f32.mrb[15].mxu1  ;;  %v799_v34 = vsel %vm686_vm3, %v798_v29, -inf }
 0x3f8   : > { %800 = vmax.xlane.f32.xlu1 %v799_v34  ;;  %v1349_v34 = vld [vmem:[%s1866_s7] ss:$0 sm:$0xff] }
 0x3fc   : > { %1023 = vmax.xlane.f32.xlu1 %v1022_v35  ;;  %v1211_v35 = vunpack.c.l.bf16 %v1730_v27  ;;  %v1358_v27 = vld [vmem:[%s1867_s8] ss:$0 sm:$0xff] }
 0x47a   : > { %v913_v36 = vpop.xlane.xlu0 %912 }
 0x47b   : > { %v914_v37 = vsub.f32 %v910_v14, %v913_v36 }
 0x47d   : > { %v915_v38 = vmul.f32 1.442695, %v914_v37 }
 0x47f   : > { %1542 = vpow2.f32 %v915_v38 }
 0x485   : > { %v801_v39 = vpop.xlane.xlu1 %800 }
 0x486   : > { %v802_v40 = vsub.f32 %v798_v29, %v801_v39 }
 0x488   : > { %v803_v45 = vmul.f32 1.442695, %v802_v40 }
 0x489   : > { %v1543_v41 = vpop.eup %1542  ;;  %v1024_v42 = vpop.xlane.xlu1 %1023 }
 0x48a   : > { %v1025_v43 = vsub.f32 %v1021_v32, %v1024_v42  ;;  %v917_v44 = vsel %vm686_vm3, %v1543_v41, 0.0 }
 0x48b   : > { %918 = vadd.xlane.f32.xlu0 %v917_v44 }
 0x48c   : > { %v1026_v46 = vmul.f32 1.442695, %v1025_v43 }
 0x48e   : > { %1544 = vpow2.f32 %v1026_v46 }
 0x48f   : > { %1546 = vpow2.f32 %v803_v45 }
 0x498   : > { %v1545_v47 = vpop.eup %1544 }
 0x499   : > { %v1028_v48 = vsel %vm686_vm3, %v1545_v47, 0.0  ;;  %v1547_v49 = vpop.eup %1546 }
 0x49a   : > { %1029 = vadd.xlane.f32.xlu1 %v1028_v48  ;;  %v805_v51 = vsel %vm686_vm3, %v1547_v49, 0.0 }
 0x49e   : > { %806 = vadd.xlane.f32.xlu1 %v805_v51  ;;  %v1359_v51 = vld [vmem:[%s1868_s9] ss:$0 sm:$0xff] }
 0x4a1   : > { %812 = vrot.lane.b32.xlu0 %v1747_v50, %s1567_s19 }
 0x4af   : > { %923 = vrot.lane.b32.xlu1 %v1747_v50, %s1568_s20 }
 0x4b3   : > { %1034 = vrot.lane.b32.xlu1 %v1747_v50, %s1569_s21 }
 0x518   : > { %v919_v52 = vpop.xlane.xlu0 %918 }
 0x51c   : > { %v813_v53 = vpop.permute.xlu0 %812 }
 0x51d   : > { %v818_v54 = vsel %vm702_vm2, %v813_v53, 0 }
 0x51e   : > { %1435 = vmatpush3.bf16.msra.mxu1 %v818_v54 }
 0x51f   : > { %1446 = vmatprep.subr.bf16.mxu1 %v1564_v2 }
 0x527   : > { %v1030_v55 = vpop.xlane.xlu1 %1029 }
 0x52b   : > { %v807_v56 = vpop.xlane.xlu1 %806 }
 0x52c   : > { %1548 = vrcp.f32 %v807_v56 }
 0x52d   : > { %1550 = vrcp.f32 %v919_v52 }
 0x52e   : > { %1552 = vrcp.f32 %v1030_v55 }
 0x52f   : > { %v924_v59 = vpop.permute.xlu1 %923 }
 0x530   : > { %v929_v62 = vsel %vm702_vm2, %v924_v59, 0 }
 0x533   : > { %v1035_v63 = vpop.permute.xlu1 %1034 }
 0x534   : > { %v1040_v3 = vsel %vm702_vm2, %v1035_v63, 0 }
 0x536   : > { %v1549_v57 = vpop.eup %1548 }
 0x537   : > { %v809_v58 = vmul.f32 %v1549_v57, %v1547_v49  ;;  %v1551_v61 = vpop.eup %1550 }
 0x538   : > { %v921_v50 = vmul.f32 %v1551_v61, %v1543_v41  ;;  %v1553_v1 = vpop.eup %1552 }
 0x539   : > { %v810_v60 = vpack.c.bf16 %v809_v58, %v809_v58  ;;  %v1032_v4 = vmul.f32 %v1553_v1, %v1545_v47 }
 0x53a   : > { %v922_v0 = vpack.c.bf16 %v921_v50, %v921_v50 }
 0x53b   : > { %1437 = vmatmul.mubr.msk.bf16.vlgmr.msra.gmra.mrb[16].mxu1 %vm686_vm3, %v810_v60  ;;  %v1033_v5 = vpack.c.bf16 %v1032_v4, %v1032_v4 }
 0x53c   : > { %1447 = vmatpush3.bf16.msra.mxu1 %v929_v62  ;;  %1448 = vmatprep.mubr.msk.bf16.mxu1 %vm1566_vm0, %v1564_v2 }
 0x53d   : > { %1458 = vmatprep.subr.bf16.mxu1 %v1564_v2 }
 0x543   : > { %1449 = vmatmul.mubr.msk.bf16.vlgmr.msra.gmra.mrb[20].mxu1 %vm686_vm3, %v922_v0 }
 0x544   : > { %1459 = vmatpush3.bf16.msra.mxu1 %v1040_v3  ;;  %1460 = vmatprep.mubr.msk.bf16.mxu1 %vm1566_vm0, %v1564_v2 }
 0x54b   : > { %1461 = vmatmul.mubr.msk.bf16.vlgmr.msra.gmra.mrb[24].mxu1 %vm686_vm3, %v1033_v5 }
 0x60e   : > { %v854_v13 = vpop.f32.mrb[16].mxu1 }
 0x60f   : > { %1083 = vrot.lane.b32.xlu0 %v854_v13, %s1569_s21  ;;  %v1438_v14 = vpop.f32.mrb[17].mxu1 }
 0x610   : > { %v857_v15 = vpop.f32.mrb[18].mxu1 }
 0x611   : > { %v1439_v16 = vpop.f32.mrb[19].mxu1 }
 0x616   : > { %v965_v19 = vpop.f32.mrb[20].mxu1 }
 0x617   : > { %1087 = vrot.lane.b32.xlu1 %v965_v19, %s1568_s20  ;;  %v1450_v20 = vpop.f32.mrb[21].mxu1 }
 0x618   : > { %v968_v21 = vpop.f32.mrb[22].mxu1 }
 0x619   : > { %v1451_v22 = vpop.f32.mrb[23].mxu1 }
 0x61e   : > { %v1076_v23 = vpop.f32.mrb[24].mxu1 }
 0x61f   : > { %1091 = vrot.lane.b32.xlu0 %v1076_v23, %s1567_s19  ;;  %v1462_v24 = vpop.f32.mrb[25].mxu1 }
 0x620   : > { %v1079_v25 = vpop.f32.mrb[26].mxu1 }
 0x621   : > { %v1463_v26 = vpop.f32.mrb[27].mxu1 }
 0x681   : > { %v1084_v28 = vpop.permute.xlu0 %1083 }
 0x682   : > { %v1094_v29 = vsel %vm638_vm1, %v1780_v17, %v1084_v28 }
 0x689   : > { %v1088_v2 = vpop.permute.xlu1 %1087 }
 0x68a   : > { %v1096_v30 = vsel %vm1095_vm4, %v1094_v29, %v1088_v2 }
 0x691   : > { %v1092_v31 = vpop.permute.xlu0 %1091 }
 0x692   : > { %v1098_v32 = vsel %vm1097_vm5, %v1096_v30, %v1092_v31 }
 0x693   : > { %v1099_v33 = vpack.c.bf16 %v1098_v32, %v1098_v32 }
 0x695   : > { %1481 = vmatmul.mubr.bf16.vlgmr.msra.gmra.mrb[12].mxu0 %v1099_v33 }
 0x768   : > { %v1205_v36 = vpop.f32.mrb[12].mxu0 }
 0x769   : > { %v1206_v37 = vadd.f32 %v1349_v34, %v1205_v36  ;;  %v1482_v38 = vpop.f32.mrb[13].mxu0 }
 0x76a   : > { %v1208_v39 = vpop.f32.mrb[14].mxu0 }
 0x76b   : > { %v1483_v40 = vpop.f32.mrb[15].mxu0  ;;  %v1214_v41 = vadd.f32 %v1211_v35, %v1206_v37 }
 0x76d   : > { %1215 = vadd.xlane.f32.xlu1 %v1214_v41 }
 0x7fa   : > { %v1216_v17 = vpop.xlane.xlu1 %1215 }
 0x7fb   : > { %v1218_v42 = vmul.f32 0.0078125, %v1216_v17 }
 0x7fd   : > { %v1219_v43 = vsub.f32 %v1214_v41, %v1218_v42 }
 0x7ff   : > { %v1220_v44 = vmul.f32 %v1219_v43, %v1219_v43 }
 0x801   : > { %1221 = vadd.xlane.f32.xlu0 %v1220_v44 }
 0x88e   : > { %v1222_v45 = vpop.xlane.xlu0 %1221 }
 0x88f   : > { %v1223_v46 = vmul.f32 0.0078125, %v1222_v45 }
 0x891   : > { %v1224_v47 = vadd.f32 1e-05, %v1223_v46 }
 0x893   : > { %1554 = vrsqrt.f32 %v1224_v47 }
 0x89d   : > { %v1555_v48 = vpop.eup %1554 }
 0x89e   : > { %v1226_v49 = vmul.f32 %v1555_v48, %v1219_v43 }
 0x8a0   : > { %v1233_v52 = vmul.f32 %v1358_v27, %v1226_v49 }
 0x8a2   : > { %v1240_v53 = vadd.f32 %v1359_v51, %v1233_v52 }
 0x8a4   : > { %v1241_v54 = vpack.c.bf16 %v1240_v53, %v1240_v53 }
 0x8a6   : > { %1242 = vst [vmem:[%s371_s29] sm:$0xf] %v1241_v54 }
 0x8a7 PF: > { %s20_s13 = sadd.s32 1, %s1562_s13  }
 0x8a8   : > { %p17_p4 = scmp.ge.s32.totalorder %s20_s13, 4  }
 0x8aa   :  { %19 = sbr.rel (!%p17_p4) target bundleno = 1 (0x1), region = 93 }

// kernel: forward.7
= control target key start
LH: loop header
LB: loop body
LE: loop exit
PB: predicated region body
PF: predicated region fallthrough
CT: control target
= control target key end

     0   :  { %s1504_s24 = smov 0   ;;  %s1752_s0 = inlined_call_operand.vmem [shape: bf16[2,8,128], index: 0, kind: input, shape index: {}]   ;;  %s1753_s1 = inlined_call_operand.vmem [shape: bf16[128,384], index: 1, kind: input, shape index: {}]   ;;  %s1754_s2 = inlined_call_operand.vmem [shape: f32[1,384], index: 2, kind: input, shape index: {}]   ;;  %s1755_s3 = inlined_call_operand.vmem [shape: bf16[128,128], index: 3, kind: input, shape index: {}]   ;;  %s1756_s4 = inlined_call_operand.vmem [shape: f32[1,128], index: 4, kind: input, shape index: {}]   ;;  %s1757_s5 = inlined_call_operand.vmem [shape: f32[1,128], index: 5, kind: input, shape index: {}]   ;;  %s1758_s6 = inlined_call_operand.vmem [shape: f32[1,128], index: 6, kind: input, shape index: {}]   ;;  %s1759_s7 = inlined_call_operand.vmem [shape: bf16[2,8,128], index: 7, kind: output, shape index: {}]  }
   0x1 LB: > { %s1204_s25 = sadd.s32 4294967295, %s1456_s24   ;;  %p1208_p0 = scmp.ge.s32.totalorder %s1456_s24, 1  ;;  %s1456_s24 = sphi %s1504_s24, %s17_s24  }
   0x2   : > { %p236_p1 = scmp.lt.s32.totalorder %s1456_s24, 3 }
   0x4   : > { %p237_p2 = pnand %p1208_p0, %p236_p1 }
   0x5   : > { %v1392_v0 = vld [vmem:[%s1753_s1 + $0x4] ss:$12 sps:$4 sm:$0xff] (!%p237_p2)   ;;  %v1394_v1 = vld [vmem:[%s1753_s1] ss:$12 sps:$4 sm:$0xff] (!%p237_p2)   ;;  %v1458_v2 = vmov (!%p237_p2), 0   ;;  %v1459_v4 = vmov (!%p237_p2), 0.0   ;;  %v310_v27 = vlaneseq (!%p237_p2) }
   0x6   : > { %240 = sbr.rel (%p237_p2) target bundleno = 2217 (0x8a9), region = 48  ;;  %485 = vmatprep.mubr.bf16.mxu0 (!%p237_p2), %v1458_v2  ;;  %453 = vmatprep.subr.bf16.mxu0 (!%p237_p2), %v1392_v0  ;;  %v1395_v3 = vld [vmem:[%s1753_s1 + $0x1c] ss:$12 sps:$4 sm:$0xff] (!%p237_p2)   ;;  %v1397_v5 = vld [vmem:[%s1753_s1 + $0x18] ss:$12 sps:$4 sm:$0xff] (!%p237_p2)   ;;  %p266_p3 = scmp.lt.s32.totalorder (!%p237_p2), %s1204_s25, 1 }
   0x7   : > { %1290 = vmatprep.subr.bf16.mxu1 (!%p237_p2), %v1459_v4  ;;  %454 = vmatpush1.bf16.msra.mxu0 (!%p237_p2), %v1394_v1  ;;  %v1398_v6 = vld [vmem:[%s1753_s1 + $0x34] ss:$12 sps:$4 sm:$0xff] (!%p237_p2)   ;;  %v1400_v7 = vld [vmem:[%s1753_s1 + $0x30] ss:$12 sps:$4 sm:$0xff] (!%p237_p2)   ;;  %v1401_v8 = vld [vmem:[%s1753_s1 + $0x4c] ss:$12 sps:$4 sm:$0xff] (!%p237_p2)  }
   0x8   : > { %455 = vmatprep.subr.bf16.mxu0 (!%p237_p2), %v1395_v3  ;;  %v1403_v9 = vld [vmem:[%s1753_s1 + $0x48] ss:$12 sps:$4 sm:$0xff] (!%p237_p2)   ;;  %v1404_v11 = vld [vmem:[%s1753_s1 + $0x64] ss:$12 sps:$4 sm:$0xff] (!%p237_p2)   ;;  %v1417_v12 = vld [vmem:[%s1753_s1 + $0x20] ss:$12 sps:$4 sm:$0xff] (!%p237_p2)  }
   0x9   : > { %v1416_v10 = vld [vmem:[%s1753_s1 + $0x8] ss:$12 sps:$4 sm:$0xff] (!%p237_p2)   ;;  %v1406_v13 = vld [vmem:[%s1753_s1 + $0x60] ss:$12 sps:$4 sm:$0xff] (!%p237_p2)   ;;  %v1409_v15 = vld [vmem:[%s1753_s1 + $0x78] ss:$12 sps:$4 sm:$0xff] (!%p237_p2)  }
   0xa   : > { %1291 = vmatpush3.bf16.msra.mxu1 (!%p237_p2), %v1416_v10  ;;  %v1407_v14 = vld [vmem:[%s1753_s1 + $0x7c] ss:$12 sps:$4 sm:$0xff] (!%p237_p2)   ;;  %v1418_v16 = vld [vmem:[%s1753_s1 + $0x38] ss:$12 sps:$4 sm:$0xff] (!%p237_p2)   ;;  %v1410_v17 = vld [vmem:[%s1753_s1 + $0x94] ss:$12 sps:$4 sm:$0xff] (!%p237_p2)  }
   0xb   : > { %456 = vmatpush1.bf16.msra.mxu0 (!%p237_p2), %v1397_v5  ;;  %1292 = vmatprep.subr.bf16.mxu1 (!%p237_p2), %v1459_v4  ;;  %v1419_v18 = vld [vmem:[%s1753_s1 + $0x50] ss:$12 sps:$4 sm:$0xff] (!%p237_p2)   ;;  %v1413_v20 = vld [vmem:[%s1753_s1 + $0xac] ss:$12 sps:$4 sm:$0xff] (!%p237_p2)   ;;  %v1420_v21 = vld [vmem:[%s1753_s1 + $0x68] ss:$12 sps:$4 sm:$0xff] (!%p237_p2)  }
   0xc   : > { %457 = vmatprep.subr.bf16.mxu0 (!%p237_p2), %v1398_v6  ;;  %v1412_v19 = vld [vmem:[%s1753_s1 + $0x90] ss:$12 sps:$4 sm:$0xff] (!%p237_p2)   ;;  %v1415_v22 = vld [vmem:[%s1753_s1 + $0xa8] ss:$12 sps:$4 sm:$0xff] (!%p237_p2)   ;;  %v1421_v23 = vld [vmem:[%s1753_s1 + $0x80] ss:$12 sps:$4 sm:$0xff] (!%p237_p2)  }
   0xd   : > { %s1761_s25 = smov (!%p266_p3, %s1204_s25), 1  ;;  %v1422_v25 = vld [vmem:[%s1753_s1 + $0x98] ss:$12 sps:$4 sm:$0xff]   ;;  %v1423_v26 = vld [vmem:[%s1753_s1 + $0xb0] ss:$12 sps:$4 sm:$0xff]   ;;  %vm1460_vm0 = vmmov 0  }
   0xe   : > { %1293 = vmatpush3.bf16.msra.mxu1 %v1417_v12  ;;  %s1209_s20 = sshll.u32 %s1761_s25, 2  ;;  %1306 = vmatprep.mubr.msk.bf16.mxu1 %vm1460_vm0, %v1459_v4  ;;  %v1612_v28 = vshrl.u32 %v310_v27, 7  ;;  %v308_v30 = vld [vmem:[%s1754_s2] sm:$0x7]  ;;  %vm537_vm1 = vcmask 261120   ;;  %s1461_s15 = smov 96  }
   0xf   : > { %458 = vmatpush1.bf16.msra.mxu0 %v1400_v7  ;;  %1294 = vmatprep.subr.bf16.mxu1 %v1459_v4  ;;  %s269_s29 = scalar_lea.vmem %s1752_s0, %s1209_s20  ;;  %s1462_s16 = smov 64   ;;  %vm607_vm2 = vcmask 1043456   ;;  %v1635_v52 = vand.u32 127, %v310_v27  ;;  %vm591_vm4 = vcmask 64512   ;;  %vm1003_vm5 = vcmask 523264  }
  0x10   : > { %459 = vmatprep.subr.bf16.mxu0 %v1401_v8  ;;  %v1592_v24 = vld [vmem:[%s269_s29] sm:$0xf]  ;;  %v316_v29 = vsub.s32 1, %v1612_v28  ;;  %v312_v31 = vsub.s32 0, %v1612_v28  ;;  %s1463_s17 = smov 32   ;;  %v320_v43 = vsub.s32 2, %v1612_v28  ;;  %s273_s23 = scalar_lea.vmem %s1759_s7, %s1209_s20 }
  0x11   : > { %vm589_vm3 = vcmp.ge.s32.totalorder %v1635_v52, %v1612_v28  ;;  %vm1005_vm6 = vcmask 785408  }
  0x12   : > { %1295 = vmatpush3.bf16.msra.mxu1 %v1418_v16  ;;  %v317_v32 = vrot.slane %v308_v30, %v316_v29  ;;  %v313_v33 = vrot.slane %v308_v30, %v312_v31  ;;  %v321_v44 = vrot.slane %v308_v30, %v320_v43 }
  0x13   : > { %460 = vmatpush1.bf16.msra.mxu0 %v1403_v9  ;;  %1296 = vmatprep.subr.bf16.mxu1 %v1459_v4 }
  0x14   : > { %461 = vmatprep.subr.bf16.mxu0 %v1404_v11 }
  0x16   : > { %1297 = vmatpush3.bf16.msra.mxu1 %v1419_v18 }
  0x17   : > { %462 = vmatpush1.bf16.msra.mxu0 %v1406_v13  ;;  %1298 = vmatprep.subr.bf16.mxu1 %v1459_v4 }
  0x18   : > { %463 = vmatprep.subr.bf16.mxu0 %v1407_v14 }
  0x1a   : > { %1299 = vmatpush3.bf16.msra.mxu1 %v1420_v21 }
  0x1b   : > { %464 = vmatpush1.bf16.msra.mxu0 %v1409_v15  ;;  %1300 = vmatprep.subr.bf16.mxu1 %v1459_v4 }
  0x1c   : > { %465 = vmatprep.subr.bf16.mxu0 %v1410_v17 }
  0x1e   : > { %1301 = vmatpush3.bf16.msra.mxu1 %v1421_v23 }
  0x1f   : > { %466 = vmatpush1.bf16.msra.mxu0 %v1412_v19  ;;  %1302 = vmatprep.subr.bf16.mxu1 %v1459_v4 }
  0x20   : > { %467 = vmatprep.subr.bf16.mxu0 %v1413_v20 }
  0x22   : > { %1303 = vmatpush3.bf16.msra.mxu1 %v1422_v25 }
  0x23   : > { %468 = vmatpush1.bf16.msra.mxu0 %v1415_v22  ;;  %1304 = vmatprep.subr.bf16.mxu1 %v1459_v4 }
  0x24   : > { %1334 = vmatprep.subr.bf16.mxu0 %v1459_v4 }
  0x26   : > { %486 = vmatmul.mubr.bf16.vlgmr.msra.gmra.mrb[0].mxu0 %v1592_v24  ;;  %1305 = vmatpush3.bf16.msra.mxu1 %v1423_v26 }
  0x27   : > { %1310 = vmatprep.subr.bf16.mxu1 %v1459_v4  ;;  %1336 = vmatprep.mubr.msk.bf16.mxu0 %vm1460_vm0, %v1459_v4 }
  0x29   : > { %1307 = vmatmul.mubr.bf16.vlgmr.msra.gmra.mrb[0].mxu1 %v1592_v24 }
  0x2a   : > { %1312 = vmatprep.mubr.msk.bf16.mxu1 %vm1460_vm0, %v1459_v4 }
  0xf9   : > { %v487_v34 = vpop.f32.mrb[0].mxu0 }
  0xfa   : > { %v489_v35 = vpop.f32.mrb[1].mxu0  ;;  %v488_v39 = vadd.f32 %v487_v34, %v313_v33 }
  0xfb   : > { %v490_v36 = vadd.f32 %v489_v35, %v317_v32  ;;  %v491_v37 = vpop.f32.mrb[2].mxu0 }
  0xfc   : > { %v492_v38 = vpop.f32.mrb[3].mxu0  ;;  %v534_v42 = vpack.c.bf16 %v488_v39, %v488_v39  ;;  %v528_v45 = vpop.f32.mrb[0].mxu1 }
  0xfd   : > { %v535_v40 = vpack.c.bf16 %v490_v36, %v490_v36  ;;  %v529_v46 = vadd.f32 %v528_v45, %v321_v44  ;;  %v1308_v47 = vpop.f32.mrb[1].mxu1 }
  0xfe   : > { %v531_v48 = vpop.f32.mrb[2].mxu1 }
  0xff   : > { %655 = vrot.lane.b32.xlu1 %v535_v40, %s1461_s15  ;;  %v542_v41 = vsel %vm537_vm1, %v535_v40, 0  ;;  %v1630_v49 = vpack.c.bf16 %v529_v46, %v529_v46  ;;  %v1309_v50 = vpop.f32.mrb[3].mxu1 }
 0x100   : > { %1311 = vmatpush3.bf16.xpose.msra.mxu1 %v542_v41 }
 0x101   : > { %1316 = vmatprep.subr.bf16.mxu1 %v1459_v4  ;;  %v609_v51 = vsel %vm607_vm2, %v1630_v49, 0 }
 0x103   : > { %652 = vrot.lane.b32.xlu1 %v534_v42, %s1461_s15 }
 0x107   : > { %766 = vrot.lane.b32.xlu1 %v534_v42, %s1462_s16  ;;  %1313 = vmatmul.mubr.msk.bf16.vlgmr.msra.gmra.mrb[4].mxu1 %vm537_vm1, %v534_v42 }
 0x108   : > { %1318 = vmatprep.mubr.msk.bf16.mxu1 %vm1460_vm0, %v1459_v4  ;;  %1317 = vmatpush3.bf16.msra.mxu1 %v609_v51 }
 0x109   : > { %1322 = vmatprep.subr.bf16.mxu1 %v1459_v4 }
 0x10b   : > { %880 = vrot.lane.b32.xlu1 %v535_v40, %s1463_s17 }
 0x10f   : > { %878 = vrot.lane.b32.xlu1 %v534_v42, %s1463_s17 }
 0x171   : > { %v656_v1 = vpop.permute.xlu1 %655 }
 0x172   : > { %v661_v13 = vsel %vm537_vm1, %v656_v1, 0 }
 0x175   : > { %v653_v2 = vpop.permute.xlu1 %652 }
 0x179   : > { %v767_v5 = vpop.permute.xlu1 %766 }
 0x17d   : > { %v881_v8 = vpop.permute.xlu1 %880 }
 0x17e   : > { %v886_v11 = vsel %vm537_vm1, %v881_v8, 0 }
 0x181   : > { %v879_v14 = vpop.permute.xlu1 %878 }
 0x1da   : > { %v578_v53 = vpop.f32.mrb[4].mxu1 }
 0x1db   : > { %v584_v54 = vmul.f32 0.17677669, %v578_v53  ;;  %v1314_v55 = vpop.f32.mrb[5].mxu1 }
 0x1dc   : > { %v581_v56 = vpop.f32.mrb[6].mxu1 }
 0x1dd   : > { %v1315_v57 = vpop.f32.mrb[7].mxu1  ;;  %v590_v58 = vsel %vm589_vm3, %v584_v54, -1e+30 }
 0x1de   : > { %v592_v59 = vsel %vm591_vm4, %v590_v58, -inf }
 0x1df   : > { %593 = vmax.xlane.f32.xlu0 %v592_v59 }
 0x26c   : > { %v594_v60 = vpop.xlane.xlu0 %593 }
 0x26d   : > { %v595_v61 = vsub.f32 %v590_v58, %v594_v60 }
 0x26f   : > { %v596_v62 = vmul.f32 1.442695, %v595_v61 }
 0x271   : > { %1432 = vpow2.f32 %v596_v62 }
 0x27b   : > { %v1433_v63 = vpop.eup %1432 }
 0x27c   : > { %v598_v0 = vsel %vm591_vm4, %v1433_v63, 0.0 }
 0x27d   : > { %599 = vadd.xlane.f32.xlu0 %v598_v0 }
 0x293   : > { %768 = vrot.lane.b32.xlu0 %v535_v40, %s1462_s16 }
 0x30a   : > { %v600_v3 = vpop.xlane.xlu0 %599 }
 0x30b   : > { %1434 = vrcp.f32 %v600_v3 }
 0x30e   : > { %v769_v6 = vpop.permute.xlu0 %768 }
 0x30f   : > { %v774_v7 = vsel %vm537_vm1, %v769_v6, 0 }
 0x310   : > { %1335 = vmatpush3.bf16.xpose.msra.mxu0 %v774_v7 }
 0x311   : > { %1346 = vmatprep.subr.bf16.mxu0 %v1459_v4 }
 0x315   : > { %v1435_v9 = vpop.eup %1434 }
 0x316   : > { %v602_v10 = vmul.f32 %v1435_v9, %v1433_v63 }
 0x317   : > { %1337 = vmatmul.mubr.msk.bf16.vlgmr.msra.gmra.mrb[4].mxu0 %vm537_vm1, %v767_v5 }
 0x318   : > { %1347 = vmatpush3.bf16.xpose.msra.mxu0 %v886_v11  ;;  %v603_v12 = vpack.c.bf16 %v602_v10, %v602_v10  ;;  %1348 = vmatprep.mubr.msk.bf16.mxu0 %vm1460_vm0, %v1459_v4  ;;  %v1424_v11 = vld [vmem:[%s1755_s3] sm:$0xff]  }
 0x319   : > { %1358 = vmatprep.subr.bf16.mxu0 %v1459_v4 }
 0x31a   : > { %1319 = vmatmul.mubr.msk.bf16.vlgmr.msra.gmra.mrb[8].mxu1 %vm591_vm4, %v603_v12  ;;  %v1425_v12 = vld [vmem:[%s1755_s3 + $0x8] sm:$0xff]  }
 0x31b   : > { %1323 = vmatpush3.bf16.xpose.msra.mxu1 %v661_v13  ;;  %1324 = vmatprep.mubr.msk.bf16.mxu1 %vm1460_vm0, %v1459_v4  ;;  %v1426_v13 = vld [vmem:[%s1755_s3 + $0x10] sm:$0xff]  }
 0x31c   : > { %1328 = vmatprep.subr.bf16.mxu1 %v1459_v4 }
 0x31f   : > { %1349 = vmatmul.mubr.msk.bf16.vlgmr.msra.gmra.mrb[8].mxu0 %vm537_vm1, %v879_v14  ;;  %v1427_v14 = vld [vmem:[%s1755_s3 + $0x18] sm:$0xff]  }
 0x320   : > { %1374 = vmatprep.mubr.msk.bf16.mxu0 %vm1460_vm0, %v1459_v4  ;;  %1359 = vmatpush3.bf16.msra.mxu0 %v1424_v11 }
 0x321   : > { %1360 = vmatprep.subr.bf16.mxu0 %v1459_v4 }
 0x322   : > { %1325 = vmatmul.mubr.msk.bf16.vlgmr.msra.gmra.mrb[12].mxu1 %vm537_vm1, %v653_v2 }
 0x323   : > { %1330 = vmatprep.mubr.msk.bf16.mxu1 %vm1460_vm0, %v1459_v4 }
 0x324   : > { %1361 = vmatpush3.bf16.msra.mxu0 %v1425_v12 }
 0x325   : > { %1362 = vmatprep.subr.bf16.mxu0 %v1459_v4 }
 0x328   : > { %1363 = vmatpush3.bf16.msra.mxu0 %v1426_v13 }
 0x329   : > { %1364 = vmatprep.subr.bf16.mxu0 %v1459_v4 }
 0x32c   : > { %1365 = vmatpush3.bf16.msra.mxu0 %v1427_v14 }
 0x32d   : > { %1366 = vmatprep.subr.bf16.mxu0 %v1459_v4 }
 0x3ea   : > { %v810_v15 = vpop.f32.mrb[4].mxu0 }
 0x3eb   : > { %v816_v16 = vmul.f32 0.17677669, %v810_v15  ;;  %v1338_v17 = vpop.f32.mrb[5].mxu0  ;;  %v1428_v15 = vld [vmem:[%s1755_s3 + $0x20] sm:$0xff]  }
 0x3ec   : > { %v813_v18 = vpop.f32.mrb[6].mxu0  ;;  %1367 = vmatpush3.bf16.msra.mxu0 %v1428_v15  ;;  %v1430_v17 = vld [vmem:[%s1755_s3 + $0x30] sm:$0xff]  }
 0x3ed   : > { %v1663_v19 = vpop.f32.mrb[8].mxu1  ;;  %v1339_v20 = vpop.f32.mrb[7].mxu0  ;;  %v817_v21 = vsel %vm589_vm3, %v816_v16, -1e+30  ;;  %1368 = vmatprep.subr.bf16.mxu0 %v1459_v4  ;;  %v1429_v16 = vld [vmem:[%s1755_s3 + $0x28] sm:$0xff]  }
 0x3ee   : > { %v1320_v22 = vpop.f32.mrb[9].mxu1  ;;  %v818_v23 = vsel %vm591_vm4, %v817_v21, -inf }
 0x3ef   : > { %819 = vmax.xlane.f32.xlu0 %v818_v23  ;;  %v648_v25 = vpop.f32.mrb[10].mxu1  ;;  %v1431_v23 = vld [vmem:[%s1755_s3 + $0x38] sm:$0xff]  }
 0x3f0   : > { %v1321_v26 = vpop.f32.mrb[11].mxu1  ;;  %1369 = vmatpush3.bf16.msra.mxu0 %v1429_v16 }
 0x3f1   : > { %1370 = vmatprep.subr.bf16.mxu0 %v1459_v4 }
 0x3f2   : > { %v922_v27 = vpop.f32.mrb[8].mxu0 }
 0x3f3   : > { %v1350_v29 = vpop.f32.mrb[9].mxu0  ;;  %v928_v33 = vmul.f32 0.17677669, %v922_v27 }
 0x3f4   : > { %v925_v30 = vpop.f32.mrb[10].mxu0  ;;  %1371 = vmatpush3.bf16.msra.mxu0 %v1430_v17 }
 0x3f5   : > { %v697_v31 = vpop.f32.mrb[12].mxu1  ;;  %v1351_v32 = vpop.f32.mrb[11].mxu0  ;;  %v929_v40 = vsel %vm589_vm3, %v928_v33, -1e+30  ;;  %1372 = vmatprep.subr.bf16.mxu0 %v1459_v4 }
 0x3f6   : > { %v703_v34 = vmul.f32 0.17677669, %v697_v31  ;;  %v1326_v35 = vpop.f32.mrb[13].mxu1  ;;  %v930_v41 = vsel %vm591_vm4, %v929_v40, -inf }
 0x3f7   : > { %v700_v36 = vpop.f32.mrb[14].mxu1 }
 0x3f8   : > { %v1327_v37 = vpop.f32.mrb[15].mxu1  ;;  %v704_v38 = vsel %vm589_vm3, %v703_v34, -1e+30  ;;  %1373 = vmatpush3.bf16.msra.mxu0 %v1431_v23 }
 0x3f9   : > { %v705_v39 = vsel %vm591_vm4, %v704_v38, -inf }
 0x3fa   : > { %706 = vmax.xlane.f32.xlu1 %v705_v39 }
 0x3fe   : > { %931 = vmax.xlane.f32.xlu1 %v930_v41  ;;  %v1119_v41 = vunpack.c.l.bf16 %v1592_v24  ;;  %v1252_v24 = vld [vmem:[%s1757_s5] ss:$0 sm:$0xff] }
 0x47c   : > { %v820_v42 = vpop.xlane.xlu0 %819 }
 0x47d   : > { %v821_v43 = vsub.f32 %v817_v21, %v820_v42 }
 0x47f   : > { %v822_v44 = vmul.f32 1.442695, %v821_v43 }
 0x481   : > { %1436 = vpow2.f32 %v822_v44 }
 0x487   : > { %v707_v45 = vpop.xlane.xlu1 %706 }
 0x488   : > { %v708_v46 = vsub.f32 %v704_v38, %v707_v45 }
 0x48a   : > { %v709_v53 = vmul.f32 1.442695, %v708_v46 }
 0x48b   : > { %v1437_v47 = vpop.eup %1436  ;;  %v932_v48 = vpop.xlane.xlu1 %931 }
 0x48c   : > { %v933_v50 = vsub.f32 %v929_v40, %v932_v48  ;;  %v824_v51 = vsel %vm591_vm4, %v1437_v47, 0.0  ;;  %v1243_v40 = vld [vmem:[%s1756_s4] ss:$0 sm:$0xff] }
 0x48d   : > { %825 = vadd.xlane.f32.xlu0 %v824_v51 }
 0x48e   : > { %v934_v54 = vmul.f32 1.442695, %v933_v50 }
 0x490   : > { %1438 = vpow2.f32 %v934_v54 }
 0x491   : > { %1440 = vpow2.f32 %v709_v53 }
 0x49a   : > { %v1439_v28 = vpop.eup %1438 }
 0x49b   : > { %v936_v52 = vsel %vm591_vm4, %v1439_v28, 0.0  ;;  %v1441_v55 = vpop.eup %1440 }
 0x49c   : > { %937 = vadd.xlane.f32.xlu1 %v936_v52  ;;  %v711_v56 = vsel %vm591_vm4, %v1441_v55, 0.0 }
 0x4a0   : > { %712 = vadd.xlane.f32.xlu1 %v711_v56  ;;  %v1253_v56 = vld [vmem:[%s1758_s6] ss:$0 sm:$0xff] }
 0x4a3   : > { %718 = vrot.lane.b32.xlu0 %v1630_v49, %s1461_s15 }
 0x4b1   : > { %830 = vrot.lane.b32.xlu1 %v1630_v49, %s1462_s16 }
 0x4b5   : > { %942 = vrot.lane.b32.xlu1 %v1630_v49, %s1463_s17 }
 0x51a   : > { %v826_v57 = vpop.xlane.xlu0 %825 }
 0x51e   : > { %v719_v58 = vpop.permute.xlu0 %718 }
 0x51f   : > { %v724_v59 = vsel %vm607_vm2, %v719_v58, 0 }
 0x520   : > { %1329 = vmatpush3.bf16.msra.mxu1 %v724_v59 }
 0x521   : > { %1340 = vmatprep.subr.bf16.mxu1 %v1459_v4 }
 0x529   : > { %v938_v60 = vpop.xlane.xlu1 %937 }
 0x52d   : > { %v713_v61 = vpop.xlane.xlu1 %712 }
 0x52e   : > { %1442 = vrcp.f32 %v713_v61 }
 0x52f   : > { %1444 = vrcp.f32 %v826_v57 }
 0x530   : > { %1446 = vrcp.f32 %v938_v60 }
 0x531   : > { %v831_v0 = vpop.permute.xlu1 %830 }
 0x532   : > { %v836_v3 = vsel %vm607_vm2, %v831_v0, 0 }
 0x535   : > { %v943_v5 = vpop.permute.xlu1 %942 }
 0x536   : > { %v948_v8 = vsel %vm607_vm2, %v943_v5, 0 }
 0x538   : > { %v1443_v62 = vpop.eup %1442 }
 0x539   : > { %v715_v63 = vmul.f32 %v1443_v62, %v1441_v55  ;;  %v1445_v2 = vpop.eup %1444 }
 0x53a   : > { %v828_v49 = vmul.f32 %v1445_v2, %v1437_v47  ;;  %v1447_v7 = vpop.eup %1446 }
 0x53b   : > { %v716_v1 = vpack.c.bf16 %v715_v63, %v715_v63  ;;  %v940_v9 = vmul.f32 %v1447_v7, %v1439_v28 }
 0x53c   : > { %v829_v6 = vpack.c.bf16 %v828_v49, %v828_v49 }
 0x53d   : > { %1331 = vmatmul.mubr.msk.bf16.vlgmr.msra.gmra.mrb[16].mxu1 %vm591_vm4, %v716_v1  ;;  %v941_v10 = vpack.c.bf16 %v940_v9, %v940_v9 }
 0x53e   : > { %1341 = vmatpush3.bf16.msra.mxu1 %v836_v3  ;;  %1342 = vmatprep.mubr.msk.bf16.mxu1 %vm1460_vm0, %v1459_v4 }
 0x53f   : > { %1352 = vmatprep.subr.bf16.mxu1 %v1459_v4 }
 0x545   : > { %1343 = vmatmul.mubr.msk.bf16.vlgmr.msra.gmra.mrb[20].mxu1 %vm591_vm4, %v829_v6 }
 0x546   : > { %1353 = vmatpush3.bf16.msra.mxu1 %v948_v8  ;;  %1354 = vmatprep.mubr.msk.bf16.mxu1 %vm1460_vm0, %v1459_v4 }
 0x54d   : > { %1355 = vmatmul.mubr.msk.bf16.vlgmr.msra.gmra.mrb[24].mxu1 %vm591_vm4, %v941_v10 }
 0x610   : > { %v760_v18 = vpop.f32.mrb[16].mxu1 }
 0x611   : > { %991 = vrot.lane.b32.xlu0 %v760_v18, %s1463_s17  ;;  %v1332_v20 = vpop.f32.mrb[17].mxu1 }
 0x612   : > { %v763_v21 = vpop.f32.mrb[18].mxu1 }
 0x613   : > { %v1333_v22 = vpop.f32.mrb[19].mxu1 }
 0x618   : > { %v872_v25 = vpop.f32.mrb[20].mxu1 }
 0x619   : > { %995 = vrot.lane.b32.xlu1 %v872_v25, %s1462_s16  ;;  %v1344_v26 = vpop.f32.mrb[21].mxu1 }
 0x61a   : > { %v875_v27 = vpop.f32.mrb[22].mxu1 }
 0x61b   : > { %v1345_v29 = vpop.f32.mrb[23].mxu1 }
 0x620   : > { %v984_v30 = vpop.f32.mrb[24].mxu1 }
 0x621   : > { %999 = vrot.lane.b32.xlu0 %v984_v30, %s1461_s15  ;;  %v1356_v31 = vpop.f32.mrb[25].mxu1 }
 0x622   : > { %v987_v32 = vpop.f32.mrb[26].mxu1 }
 0x623   : > { %v1357_v33 = vpop.f32.mrb[27].mxu1 }
 0x683   : > { %v992_v34 = vpop.permute.xlu0 %991 }
 0x684   : > { %v1002_v35 = vsel %vm537_vm1, %v1663_v19, %v992_v34 }
 0x68b   : > { %v996_v4 = vpop.permute.xlu1 %995 }
 0x68c   : > { %v1004_v36 = vsel %vm1003_vm5, %v1002_v35, %v996_v4 }
 0x693   : > { %v1000_v37 = vpop.permute.xlu0 %999 }
 0x694   : > { %v1006_v38 = vsel %vm1005_vm6, %v1004_v36, %v1000_v37 }
 0x695   : > { %v1007_v39 = vpack.c.bf16 %v1006_v38, %v1006_v38 }
 0x697   : > { %1375 = vmatmul.mubr.bf16.vlgmr.msra.gmra.mrb[12].mxu0 %v1007_v39 }
 0x76a   : > { %v1113_v42 = vpop.f32.mrb[12].mxu0 }
 0x76b   : > { %v1114_v43 = vadd.f32 %v1243_v40, %v1113_v42  ;;  %v1376_v44 = vpop.f32.mrb[13].mxu0 }
 0x76c   : > { %v1116_v45 = vpop.f32.mrb[14].mxu0 }
 0x76d   : > { %v1377_v46 = vpop.f32.mrb[15].mxu0  ;;  %v1122_v47 = vadd.f32 %v1119_v41, %v1114_v43 }
 0x76f   : > { %1123 = vadd.xlane.f32.xlu1 %v1122_v47 }
 0x7fc   : > { %v1124_v19 = vpop.xlane.xlu1 %1123 }
 0x7fd   : > { %v1126_v48 = vmul.f32 0.0078125, %v1124_v19 }
 0x7ff   : > { %v1127_v50 = vsub.f32 %v1122_v47, %v1126_v48 }
 0x801   : > { %v1128_v51 = vmul.f32 %v1127_v50, %v1127_v50 }
 0x803   : > { %1129 = vadd.xlane.f32.xlu0 %v1128_v51 }
 0x890   : > { %v1130_v53 = vpop.xlane.xlu0 %1129 }
 0x891   : > { %v1131_v54 = vmul.f32 0.0078125, %v1130_v53 }
 0x893   : > { %v1132_v28 = vadd.f32 1e-05, %v1131_v54 }
 0x895   : > { %1448 = vrsqrt.f32 %v1132_v28 }
 0x89f   : > { %v1449_v52 = vpop.eup %1448 }
 0x8a0   : > { %v1134_v55 = vmul.f32 %v1449_v52, %v1127_v50 }
 0x8a2   : > { %v1141_v57 = vmul.f32 %v1252_v24, %v1134_v55 }
 0x8a4   : > { %v1148_v58 = vadd.f32 %v1253_v56, %v1141_v57 }
 0x8a6   : > { %v1149_v59 = vpack.c.bf16 %v1148_v58, %v1148_v58 }
 0x8a8   : > { %1150 = vst [vmem:[%s273_s23] sm:$0xf] %v1149_v59 }
 0x8a9 PF: > { %s17_s24 = sadd.s32 1, %s1456_s24  }
 0x8aa   : > { %p14_p4 = scmp.ge.s32.totalorder %s17_s24, 4  }
 0x8ac   :  { %16 = sbr.rel (!%p14_p4) target bundleno = 1 (0x1), region = 78 }

// kernel: forward.13
= control target key start
LH: loop header
LB: loop body
LE: loop exit
PB: predicated region body
PF: predicated region fallthrough
CT: control target
= control target key end

     0   :  { %v225_v1 = vmov 0   ;;  %v35_v18 = vlaneseq  ;;  %s312_s1 = inlined_call_operand.vmem [shape: bf16[128,256], index: 1, kind: input, shape index: {}]   ;;  %s313_s0 = inlined_call_operand.vmem [shape: bf16[16,128], index: 0, kind: input, shape index: {}]   ;;  %s314_s2 = inlined_call_operand.vmem [shape: f32[1,256], index: 2, kind: input, shape index: {}]   ;;  %s315_s3 = inlined_call_operand.vmem [shape: f32[16,256], index: 3, kind: output, shape index: {}]  }
   0x1   :  { %v200_v0 = vld [vmem:[%s312_s1 + $0x4] ss:$8 sps:$4 sm:$0xff]   ;;  %163 = vmatprep.mubr.bf16.mxu0 %v225_v1  ;;  %v202_v2 = vld [vmem:[%s312_s1] ss:$8 sps:$4 sm:$0xff]   ;;  %v203_v3 = vld [vmem:[%s312_s1 + $0x14] ss:$8 sps:$4 sm:$0xff]  }
   0x2   :  { %131 = vmatprep.subr.bf16.mxu0 %v200_v0  ;;  %v205_v4 = vld [vmem:[%s312_s1 + $0x10] ss:$8 sps:$4 sm:$0xff]   ;;  %v206_v5 = vld [vmem:[%s312_s1 + $0x24] ss:$8 sps:$4 sm:$0xff]   ;;  %v208_v6 = vld [vmem:[%s312_s1 + $0x20] ss:$8 sps:$4 sm:$0xff]  }
   0x3   :  { %132 = vmatpush1.bf16.msra.mxu0 %v202_v2  ;;  %v209_v7 = vld [vmem:[%s312_s1 + $0x34] ss:$8 sps:$4 sm:$0xff]   ;;  %v211_v8 = vld [vmem:[%s312_s1 + $0x30] ss:$8 sps:$4 sm:$0xff]   ;;  %v212_v9 = vld [vmem:[%s312_s1 + $0x44] ss:$8 sps:$4 sm:$0xff]  }
   0x4   :  { %133 = vmatprep.subr.bf16.mxu0 %v203_v3  ;;  %v214_v10 = vld [vmem:[%s312_s1 + $0x40] ss:$8 sps:$4 sm:$0xff]   ;;  %v215_v11 = vld [vmem:[%s312_s1 + $0x54] ss:$8 sps:$4 sm:$0xff]   ;;  %v217_v12 = vld [vmem:[%s312_s1 + $0x50] ss:$8 sps:$4 sm:$0xff]  }
   0x5   :  { %v218_v13 = vld [vmem:[%s312_s1 + $0x64] ss:$8 sps:$4 sm:$0xff]   ;;  %v220_v14 = vld [vmem:[%s312_s1 + $0x60] ss:$8 sps:$4 sm:$0xff]   ;;  %v221_v15 = vld [vmem:[%s312_s1 + $0x74] ss:$8 sps:$4 sm:$0xff]  }
   0x6   :  { %v223_v16 = vld [vmem:[%s312_s1 + $0x70] ss:$8 sps:$4 sm:$0xff]   ;;  %v224_v17 = vld [vmem:[%s313_s0] sm:$0xff]   ;;  %v36_v19 = vshrl.u32 %v35_v18, 7 }
   0x7   :  { %134 = vmatpush1.bf16.msra.mxu0 %v205_v4  ;;  %v33_v21 = vld [vmem:[%s314_s2] sm:$0x3] }
   0x8   :  { %135 = vmatprep.subr.bf16.mxu0 %v206_v5  ;;  %v37_v20 = vsub.s32 0, %v36_v19  ;;  %v41_v22 = vsub.s32 1, %v36_v19 }
   0xa   :  { %v38_v23 = vrot.slane %v33_v21, %v37_v20  ;;  %v42_v24 = vrot.slane %v33_v21, %v41_v22 }
   0xb   :  { %136 = vmatpush1.bf16.msra.mxu0 %v208_v6 }
   0xc   :  { %137 = vmatprep.subr.bf16.mxu0 %v209_v7 }
   0xf   :  { %138 = vmatpush1.bf16.msra.mxu0 %v211_v8 }
  0x10   :  { %139 = vmatprep.subr.bf16.mxu0 %v212_v9 }
  0x13   :  { %140 = vmatpush1.bf16.msra.mxu0 %v214_v10 }
  0x14   :  { %141 = vmatprep.subr.bf16.mxu0 %v215_v11 }
  0x17   :  { %142 = vmatpush1.bf16.msra.mxu0 %v217_v12 }
  0x18   :  { %143 = vmatprep.subr.bf16.mxu0 %v218_v13 }
  0x1b   :  { %144 = vmatpush1.bf16.msra.mxu0 %v220_v14 }
  0x1c   :  { %145 = vmatprep.subr.bf16.mxu0 %v221_v15 }
  0x1f   :  { %146 = vmatpush1.bf16.msra.mxu0 %v223_v16 }
  0x22   :  { %164 = vmatmul.mubr.bf16.vlgmr.msra.gmra.mrb[0].mxu0 %v224_v17 }
  0xf5   :  { %v165_v25 = vpop.f32.mrb[0].mxu0 }
  0xf6   :  { %v166_v26 = vadd.f32 %v165_v25, %v38_v23  ;;  %v167_v27 = vpop.f32.mrb[1].mxu0 }
  0xf7   :  { %v168_v28 = vadd.f32 %v167_v27, %v42_v24  ;;  %v169_v29 = vpop.f32.mrb[2].mxu0 }
  0xf8   :  { %174 = vst [vmem:[%s315_s3] sm:$0xff] %v166_v26  ;;  %v170_v30 = vadd.f32 %v169_v29, %v38_v23  ;;  %v171_v31 = vpop.f32.mrb[3].mxu0 }
  0xf9   :  { %175 = vst [vmem:[%s315_s3 + $0x8] sm:$0xff] %v168_v28  ;;  %v172_v32 = vadd.f32 %v171_v31, %v42_v24 }
  0xfa   :  { %176 = vst [vmem:[%s315_s3 + $0x10] sm:$0xff] %v170_v30 }
  0xfb   :  { %177 = vst [vmem:[%s315_s3 + $0x18] sm:$0xff] %v172_v32 }

// kernel: forward.12
= control target key start
LH: loop header
LB: loop body
LE: loop exit
PB: predicated region body
PF: predicated region fallthrough
CT: control target
= control target key end

     0   :  { %v3278_v3 = vmov 0   ;;  %s4197_s1 = inlined_call_operand.vmem [shape: bf16[128,2048], index: 1, kind: input, shape index: {}]   ;;  %s4198_s0 = inlined_call_operand.vmem [shape: bf16[16,128], index: 0, kind: input, shape index: {}]   ;;  %s4199_s3 = inlined_call_operand.vmem [shape: bf16[2048,128], index: 3, kind: input, shape index: {}]   ;;  %s4200_s2 = inlined_call_operand.vmem [shape: f32[1,2048], index: 2, kind: input, shape index: {}]   ;;  %s4201_s4 = inlined_call_operand.vmem [shape: f32[1,128], index: 4, kind: input, shape index: {}]   ;;  %s4202_s5 = inlined_call_operand.vmem [shape: f32[1,128], index: 5, kind: input, shape index: {}]   ;;  %s4203_s6 = inlined_call_operand.vmem [shape: f32[1,128], index: 6, kind: input, shape index: {}]   ;;  %s4204_s7 = inlined_call_operand.vmem [shape: bf16[16,128], index: 7, kind: output, shape index: {}]  }
   0x1   :  { %v29_v0 = vld [vmem:[%s4197_s1] sm:$0xff]  ;;  %v30_v2 = vld [vmem:[%s4197_s1 + $0x8] sm:$0xff]  ;;  %919 = vmatprep.mubr.bf16.mxu0 %v3278_v3  ;;  %962 = vmatprep.mubr.bf16.mxu1 %v3278_v3  ;;  %v31_v63 = vld [vmem:[%s4197_s1 + $0x10] sm:$0xff] }
   0x2   :  { %v37_v1 = vld [vmem:[%s4197_s1 + $0x40] sm:$0xff]  ;;  %v38_v5 = vld [vmem:[%s4197_s1 + $0x48] sm:$0xff] }
   0x3   :  { %v2699_v4 = vcombine.high %v29_v0, %v37_v1  ;;  %v2698_v6 = vcombine.low %v29_v0, %v37_v1  ;;  %v45_v7 = vld [vmem:[%s4197_s1 + $0x80] sm:$0xff]  ;;  %v2701_v9 = vcombine.high %v30_v2, %v38_v5  ;;  %v2700_v10 = vcombine.low %v30_v2, %v38_v5  ;;  %v46_v12 = vld [vmem:[%s4197_s1 + $0x88] sm:$0xff]  ;;  %v39_v0 = vld [vmem:[%s4197_s1 + $0x50] sm:$0xff] }
   0x4   :  { %v53_v8 = vld [vmem:[%s4197_s1 + $0xc0] sm:$0xff]  ;;  %v54_v13 = vld [vmem:[%s4197_s1 + $0xc8] sm:$0xff]  ;;  %v32_v1 = vld [vmem:[%s4197_s1 + $0x18] sm:$0xff] }
   0x5   :  { %v2715_v11 = vcombine.high %v45_v7, %v53_v8  ;;  %v61_v14 = vld [vmem:[%s4197_s1 + $0x100] sm:$0xff]  ;;  %887 = vmatprep.subr.bf16.mxu0 %v2699_v4  ;;  %v2717_v15 = vcombine.high %v46_v12, %v54_v13  ;;  %v62_v17 = vld [vmem:[%s4197_s1 + $0x108] sm:$0xff]  ;;  %930 = vmatprep.subr.bf16.mxu1 %v2701_v9  ;;  %v2714_v19 = vcombine.low %v45_v7, %v53_v8  ;;  %v40_v2 = vld [vmem:[%s4197_s1 + $0x58] sm:$0xff] }
   0x6   :  { %v69_v16 = vld [vmem:[%s4197_s1 + $0x140] sm:$0xff]  ;;  %v70_v18 = vld [vmem:[%s4197_s1 + $0x148] sm:$0xff]  ;;  %888 = vmatpush1.bf16.msra.mxu0 %v2698_v6  ;;  %931 = vmatpush1.bf16.msra.mxu1 %v2700_v10  ;;  %v2716_v20 = vcombine.low %v46_v12, %v54_v13  ;;  %v2703_v7 = vcombine.high %v31_v63, %v39_v0  ;;  %v2705_v8 = vcombine.high %v32_v1, %v40_v2  ;;  %v47_v9 = vld [vmem:[%s4197_s1 + $0x90] sm:$0xff] }
   0x7   :  { %889 = vmatprep.subr.bf16.mxu0 %v2715_v11  ;;  %v2731_v21 = vcombine.high %v61_v14, %v69_v16  ;;  %932 = vmatprep.subr.bf16.mxu1 %v2717_v15  ;;  %v2733_v22 = vcombine.high %v62_v17, %v70_v18  ;;  %v77_v23 = vld [vmem:[%s4197_s1 + $0x180] sm:$0xff]  ;;  %v78_v25 = vld [vmem:[%s4197_s1 + $0x188] sm:$0xff]  ;;  %v2730_v27 = vcombine.low %v61_v14, %v69_v16  ;;  %v55_v10 = vld [vmem:[%s4197_s1 + $0xd0] sm:$0xff] }
   0x8   :  { %v85_v24 = vld [vmem:[%s4197_s1 + $0x1c0] sm:$0xff]  ;;  %v86_v26 = vld [vmem:[%s4197_s1 + $0x1c8] sm:$0xff]  ;;  %v2732_v28 = vcombine.low %v62_v17, %v70_v18  ;;  %v48_v11 = vld [vmem:[%s4197_s1 + $0x98] sm:$0xff]  ;;  %v2702_v13 = vcombine.low %v31_v63, %v39_v0  ;;  %v2704_v14 = vcombine.low %v32_v1, %v40_v2  ;;  %v2719_v15 = vcombine.high %v47_v9, %v55_v10 }
   0x9   :  { %v2747_v29 = vcombine.high %v77_v23, %v85_v24  ;;  %v2749_v30 = vcombine.high %v78_v25, %v86_v26  ;;  %v93_v31 = vld [vmem:[%s4197_s1 + $0x200] sm:$0xff]  ;;  %v94_v33 = vld [vmem:[%s4197_s1 + $0x208] sm:$0xff]  ;;  %v2746_v35 = vcombine.low %v77_v23, %v85_v24  ;;  %v2748_v36 = vcombine.low %v78_v25, %v86_v26  ;;  %v56_v12 = vld [vmem:[%s4197_s1 + $0xd8] sm:$0xff] }
   0xa   :  { %890 = vmatpush1.bf16.msra.mxu0 %v2714_v19  ;;  %933 = vmatpush1.bf16.msra.mxu1 %v2716_v20  ;;  %v101_v32 = vld [vmem:[%s4197_s1 + $0x240] sm:$0xff]  ;;  %v102_v34 = vld [vmem:[%s4197_s1 + $0x248] sm:$0xff]  ;;  %v2721_v16 = vcombine.high %v48_v11, %v56_v12  ;;  %v63_v17 = vld [vmem:[%s4197_s1 + $0x110] sm:$0xff] }
   0xb   :  { %891 = vmatprep.subr.bf16.mxu0 %v2731_v21  ;;  %934 = vmatprep.subr.bf16.mxu1 %v2733_v22  ;;  %v2763_v37 = vcombine.high %v93_v31, %v101_v32  ;;  %v2765_v38 = vcombine.high %v94_v33, %v102_v34  ;;  %v109_v39 = vld [vmem:[%s4197_s1 + $0x280] sm:$0xff]  ;;  %v110_v41 = vld [vmem:[%s4197_s1 + $0x288] sm:$0xff]  ;;  %v2762_v43 = vcombine.low %v93_v31, %v101_v32  ;;  %v71_v18 = vld [vmem:[%s4197_s1 + $0x150] sm:$0xff] }
   0xc   :  { %v117_v40 = vld [vmem:[%s4197_s1 + $0x2c0] sm:$0xff]  ;;  %v118_v42 = vld [vmem:[%s4197_s1 + $0x2c8] sm:$0xff]  ;;  %v2764_v44 = vcombine.low %v94_v33, %v102_v34  ;;  %v64_v19 = vld [vmem:[%s4197_s1 + $0x118] sm:$0xff]  ;;  %v2718_v21 = vcombine.low %v47_v9, %v55_v10  ;;  %v2720_v22 = vcombine.low %v48_v11, %v56_v12  ;;  %v2735_v23 = vcombine.high %v63_v17, %v71_v18 }
   0xd   :  { %v2779_v45 = vcombine.high %v109_v39, %v117_v40  ;;  %v2781_v46 = vcombine.high %v110_v41, %v118_v42  ;;  %v125_v47 = vld [vmem:[%s4197_s1 + $0x300] sm:$0xff]  ;;  %v126_v49 = vld [vmem:[%s4197_s1 + $0x308] sm:$0xff]  ;;  %v2778_v51 = vcombine.low %v109_v39, %v117_v40  ;;  %v2780_v52 = vcombine.low %v110_v41, %v118_v42  ;;  %v72_v20 = vld [vmem:[%s4197_s1 + $0x158] sm:$0xff] }
   0xe   :  { %892 = vmatpush1.bf16.msra.mxu0 %v2730_v27  ;;  %935 = vmatpush1.bf16.msra.mxu1 %v2732_v28  ;;  %v133_v48 = vld [vmem:[%s4197_s1 + $0x340] sm:$0xff]  ;;  %v134_v50 = vld [vmem:[%s4197_s1 + $0x348] sm:$0xff]  ;;  %v2737_v24 = vcombine.high %v64_v19, %v72_v20  ;;  %v79_v25 = vld [vmem:[%s4197_s1 + $0x190] sm:$0xff] }
   0xf   :  { %893 = vmatprep.subr.bf16.mxu0 %v2747_v29  ;;  %936 = vmatprep.subr.bf16.mxu1 %v2749_v30  ;;  %v2795_v53 = vcombine.high %v125_v47, %v133_v48  ;;  %v2797_v54 = vcombine.high %v126_v49, %v134_v50  ;;  %v141_v55 = vld [vmem:[%s4197_s1 + $0x380] sm:$0xff]  ;;  %v142_v57 = vld [vmem:[%s4197_s1 + $0x388] sm:$0xff]  ;;  %v2794_v59 = vcombine.low %v125_v47, %v133_v48  ;;  %v87_v26 = vld [vmem:[%s4197_s1 + $0x1d0] sm:$0xff] }
  0x10   :  { %v149_v56 = vld [vmem:[%s4197_s1 + $0x3c0] sm:$0xff]  ;;  %v150_v58 = vld [vmem:[%s4197_s1 + $0x3c8] sm:$0xff]  ;;  %v2796_v60 = vcombine.low %v126_v49, %v134_v50  ;;  %v80_v27 = vld [vmem:[%s4197_s1 + $0x198] sm:$0xff]  ;;  %v2734_v29 = vcombine.low %v63_v17, %v71_v18  ;;  %v2736_v30 = vcombine.low %v64_v19, %v72_v20  ;;  %v2751_v31 = vcombine.high %v79_v25, %v87_v26 }
  0x11   :  { %v2811_v61 = vcombine.high %v141_v55, %v149_v56  ;;  %v2813_v62 = vcombine.high %v142_v57, %v150_v58  ;;  %v2810_v4 = vcombine.low %v141_v55, %v149_v56  ;;  %v3432_v5 = vld [vmem:[%s4198_s0] sm:$0xff]   ;;  %v2812_v6 = vcombine.low %v142_v57, %v150_v58  ;;  %v88_v28 = vld [vmem:[%s4197_s1 + $0x1d8] sm:$0xff]  ;;  %v95_v33 = vld [vmem:[%s4197_s1 + $0x210] sm:$0xff] }
  0x12   :  { %894 = vmatpush1.bf16.msra.mxu0 %v2746_v35  ;;  %937 = vmatpush1.bf16.msra.mxu1 %v2748_v36  ;;  %v2753_v32 = vcombine.high %v80_v27, %v88_v28  ;;  %v103_v34 = vld [vmem:[%s4197_s1 + $0x250] sm:$0xff]  ;;  %v96_v35 = vld [vmem:[%s4197_s1 + $0x218] sm:$0xff]  ;;  %v2752_v39 = vcombine.low %v80_v27, %v88_v28  ;;  %v41_v1 = vld [vmem:[%s4197_s1 + $0x60] sm:$0xff] }
  0x13   :  { %895 = vmatprep.subr.bf16.mxu0 %v2763_v37  ;;  %938 = vmatprep.subr.bf16.mxu1 %v2765_v38  ;;  %v104_v36 = vld [vmem:[%s4197_s1 + $0x258] sm:$0xff]  ;;  %v2750_v37 = vcombine.low %v79_v25, %v87_v26  ;;  %v111_v38 = vld [vmem:[%s4197_s1 + $0x290] sm:$0xff]  ;;  %v2767_v40 = vcombine.high %v95_v33, %v103_v34  ;;  %v57_v11 = vld [vmem:[%s4197_s1 + $0xe0] sm:$0xff] }
  0x14   :  { %v119_v41 = vld [vmem:[%s4197_s1 + $0x2d0] sm:$0xff]  ;;  %v2769_v42 = vcombine.high %v96_v35, %v104_v36  ;;  %v2768_v47 = vcombine.low %v96_v35, %v104_v36  ;;  %v73_v17 = vld [vmem:[%s4197_s1 + $0x160] sm:$0xff]  ;;  %v66_v20 = vld [vmem:[%s4197_s1 + $0x128] sm:$0xff] }
  0x15   :  { %v2783_v48 = vcombine.high %v111_v38, %v119_v41  ;;  %v135_v49 = vld [vmem:[%s4197_s1 + $0x350] sm:$0xff]  ;;  %v89_v25 = vld [vmem:[%s4197_s1 + $0x1e0] sm:$0xff]  ;;  %v82_v28 = vld [vmem:[%s4197_s1 + $0x1a8] sm:$0xff] }
  0x16   :  { %896 = vmatpush1.bf16.msra.mxu0 %v2762_v43  ;;  %939 = vmatpush1.bf16.msra.mxu1 %v2764_v44  ;;  %v112_v43 = vld [vmem:[%s4197_s1 + $0x298] sm:$0xff]  ;;  %v151_v57 = vld [vmem:[%s4197_s1 + $0x3d0] sm:$0xff]  ;;  %v98_v36 = vld [vmem:[%s4197_s1 + $0x228] sm:$0xff] }
  0x17   :  { %897 = vmatprep.subr.bf16.mxu0 %v2779_v45  ;;  %940 = vmatprep.subr.bf16.mxu1 %v2781_v46  ;;  %v120_v44 = vld [vmem:[%s4197_s1 + $0x2d8] sm:$0xff]  ;;  %v2766_v45 = vcombine.low %v95_v33, %v103_v34  ;;  %v127_v46 = vld [vmem:[%s4197_s1 + $0x310] sm:$0xff]  ;;  %v105_v33 = vld [vmem:[%s4197_s1 + $0x260] sm:$0xff] }
  0x18   :  { %v2785_v50 = vcombine.high %v112_v43, %v120_v44  ;;  %v2784_v55 = vcombine.low %v112_v43, %v120_v44  ;;  %v2799_v56 = vcombine.high %v127_v46, %v135_v49  ;;  %v114_v44 = vld [vmem:[%s4197_s1 + $0x2a8] sm:$0xff] }
  0x1a   :  { %898 = vmatpush1.bf16.msra.mxu0 %v2778_v51  ;;  %941 = vmatpush1.bf16.msra.mxu1 %v2780_v52  ;;  %v128_v51 = vld [vmem:[%s4197_s1 + $0x318] sm:$0xff] }
  0x1b   :  { %899 = vmatprep.subr.bf16.mxu0 %v2795_v53  ;;  %942 = vmatprep.subr.bf16.mxu1 %v2797_v54  ;;  %v136_v52 = vld [vmem:[%s4197_s1 + $0x358] sm:$0xff]  ;;  %v2782_v53 = vcombine.low %v111_v38, %v119_v41  ;;  %v143_v54 = vld [vmem:[%s4197_s1 + $0x390] sm:$0xff]  ;;  %v121_v41 = vld [vmem:[%s4197_s1 + $0x2e0] sm:$0xff] }
  0x1c   :  { %v2801_v58 = vcombine.high %v128_v51, %v136_v52  ;;  %v2800_v63 = vcombine.low %v128_v51, %v136_v52  ;;  %v2815_v0 = vcombine.high %v143_v54, %v151_v57  ;;  %v130_v52 = vld [vmem:[%s4197_s1 + $0x328] sm:$0xff] }
  0x1e   :  { %900 = vmatpush1.bf16.msra.mxu0 %v2794_v59  ;;  %943 = vmatpush1.bf16.msra.mxu1 %v2796_v60  ;;  %v144_v59 = vld [vmem:[%s4197_s1 + $0x398] sm:$0xff] }
  0x1f   :  { %901 = vmatprep.subr.bf16.mxu0 %v2811_v61  ;;  %944 = vmatprep.subr.bf16.mxu1 %v2813_v62  ;;  %v152_v60 = vld [vmem:[%s4197_s1 + $0x3d8] sm:$0xff]  ;;  %v2798_v61 = vcombine.low %v127_v46, %v135_v49  ;;  %v33_v62 = vld [vmem:[%s4197_s1 + $0x20] sm:$0xff] }
  0x20   :  { %v2817_v2 = vcombine.high %v144_v59, %v152_v60  ;;  %v2816_v9 = vcombine.low %v144_v59, %v152_v60  ;;  %v2707_v10 = vcombine.high %v33_v62, %v41_v1  ;;  %v137_v49 = vld [vmem:[%s4197_s1 + $0x360] sm:$0xff]  ;;  %v146_v60 = vld [vmem:[%s4197_s1 + $0x3a8] sm:$0xff] }
  0x22   :  { %902 = vmatpush1.bf16.msra.mxu0 %v2810_v4  ;;  %945 = vmatpush1.bf16.msra.mxu1 %v2812_v6  ;;  %v34_v4 = vld [vmem:[%s4197_s1 + $0x28] sm:$0xff] }
  0x23   :  { %973 = vmatprep.subr.bf16.mxu0 %v2703_v7  ;;  %1016 = vmatprep.subr.bf16.mxu1 %v2705_v8  ;;  %v42_v6 = vld [vmem:[%s4197_s1 + $0x68] sm:$0xff]  ;;  %v2814_v7 = vcombine.low %v143_v54, %v151_v57  ;;  %v49_v8 = vld [vmem:[%s4197_s1 + $0xa0] sm:$0xff] }
  0x24   :  { %v2709_v12 = vcombine.high %v34_v4, %v42_v6  ;;  %v2708_v18 = vcombine.low %v34_v4, %v42_v6  ;;  %v2723_v19 = vcombine.high %v49_v8, %v57_v11  ;;  %v153_v57 = vld [vmem:[%s4197_s1 + $0x3e0] sm:$0xff]  ;;  %v36_v6 = vld [vmem:[%s4197_s1 + $0x38] sm:$0xff] }
  0x25   :  { %920 = vmatmul.mubr.bf16.vlgmr.msra.gmra.mrb[0].mxu0 %v3432_v5  ;;  %963 = vmatmul.mubr.bf16.vlgmr.msra.gmra.mrb[0].mxu1 %v3432_v5 }
  0x26   :  { %974 = vmatpush1.bf16.msra.mxu0 %v2702_v13  ;;  %1017 = vmatpush1.bf16.msra.mxu1 %v2704_v14  ;;  %v50_v13 = vld [vmem:[%s4197_s1 + $0xa8] sm:$0xff] }
  0x27   :  { %975 = vmatprep.subr.bf16.mxu0 %v2719_v15  ;;  %1018 = vmatprep.subr.bf16.mxu1 %v2721_v16  ;;  %v58_v14 = vld [vmem:[%s4197_s1 + $0xe8] sm:$0xff]  ;;  %v2706_v15 = vcombine.low %v33_v62, %v41_v1  ;;  %v65_v16 = vld [vmem:[%s4197_s1 + $0x120] sm:$0xff]  ;;  %v43_v1 = vld [vmem:[%s4197_s1 + $0x70] sm:$0xff] }
  0x28   :  { %1005 = vmatprep.mubr.bf16.mxu0 %v3278_v3  ;;  %1048 = vmatprep.mubr.bf16.mxu1 %v3278_v3  ;;  %v2724_v26 = vcombine.low %v50_v13, %v58_v14  ;;  %v2739_v27 = vcombine.high %v65_v16, %v73_v17 }
  0x2a   :  { %976 = vmatpush1.bf16.msra.mxu0 %v2718_v21  ;;  %1019 = vmatpush1.bf16.msra.mxu1 %v2720_v22  ;;  %v74_v21 = vld [vmem:[%s4197_s1 + $0x168] sm:$0xff]  ;;  %v2725_v22 = vcombine.high %v50_v13, %v58_v14  ;;  %v52_v14 = vld [vmem:[%s4197_s1 + $0xb8] sm:$0xff] }
  0x2b   :  { %977 = vmatprep.subr.bf16.mxu0 %v2735_v23  ;;  %1020 = vmatprep.subr.bf16.mxu1 %v2737_v24  ;;  %v2722_v23 = vcombine.low %v49_v8, %v57_v11  ;;  %v81_v24 = vld [vmem:[%s4197_s1 + $0x1a0] sm:$0xff]  ;;  %v2740_v34 = vcombine.low %v66_v20, %v74_v21  ;;  %v59_v11 = vld [vmem:[%s4197_s1 + $0xf0] sm:$0xff] }
  0x2c   :  { %v2755_v35 = vcombine.high %v81_v24, %v89_v25 }
  0x2e   :  { %978 = vmatpush1.bf16.msra.mxu0 %v2734_v29  ;;  %1021 = vmatpush1.bf16.msra.mxu1 %v2736_v30  ;;  %v90_v29 = vld [vmem:[%s4197_s1 + $0x1e8] sm:$0xff]  ;;  %v2741_v30 = vcombine.high %v66_v20, %v74_v21 }
  0x2f   :  { %979 = vmatprep.subr.bf16.mxu0 %v2751_v31  ;;  %1022 = vmatprep.subr.bf16.mxu1 %v2753_v32  ;;  %v2738_v31 = vcombine.low %v65_v16, %v73_v17  ;;  %v97_v32 = vld [vmem:[%s4197_s1 + $0x220] sm:$0xff]  ;;  %v2757_v38 = vcombine.high %v82_v28, %v90_v29 }
  0x30   :  { %v2771_v43 = vcombine.high %v97_v32, %v105_v33 }
  0x32   :  { %980 = vmatpush1.bf16.msra.mxu0 %v2750_v37  ;;  %1023 = vmatpush1.bf16.msra.mxu1 %v2752_v39  ;;  %v106_v37 = vld [vmem:[%s4197_s1 + $0x268] sm:$0xff]  ;;  %v2754_v39 = vcombine.low %v81_v24, %v89_v25 }
  0x33   :  { %981 = vmatprep.subr.bf16.mxu0 %v2767_v40  ;;  %1024 = vmatprep.subr.bf16.mxu1 %v2769_v42  ;;  %v113_v40 = vld [vmem:[%s4197_s1 + $0x2a0] sm:$0xff]  ;;  %v2756_v42 = vcombine.low %v82_v28, %v90_v29  ;;  %v2773_v46 = vcombine.high %v98_v36, %v106_v37 }
  0x34   :  { %v2787_v51 = vcombine.high %v113_v40, %v121_v41 }
  0x36   :  { %982 = vmatpush1.bf16.msra.mxu0 %v2766_v45  ;;  %1025 = vmatpush1.bf16.msra.mxu1 %v2768_v47  ;;  %v122_v45 = vld [vmem:[%s4197_s1 + $0x2e8] sm:$0xff]  ;;  %v2770_v47 = vcombine.low %v97_v32, %v105_v33 }
  0x37   :  { %983 = vmatprep.subr.bf16.mxu0 %v2783_v48  ;;  %1026 = vmatprep.subr.bf16.mxu1 %v2785_v50  ;;  %v129_v48 = vld [vmem:[%s4197_s1 + $0x320] sm:$0xff]  ;;  %v2772_v50 = vcombine.low %v98_v36, %v106_v37  ;;  %v2789_v54 = vcombine.high %v114_v44, %v122_v45 }
  0x38   :  { %v2803_v59 = vcombine.high %v129_v48, %v137_v49 }
  0x3a   :  { %984 = vmatpush1.bf16.msra.mxu0 %v2782_v53  ;;  %1027 = vmatpush1.bf16.msra.mxu1 %v2784_v55  ;;  %v138_v53 = vld [vmem:[%s4197_s1 + $0x368] sm:$0xff]  ;;  %v2786_v55 = vcombine.low %v113_v40, %v121_v41  ;;  %v115_v41 = vld [vmem:[%s4197_s1 + $0x2b0] sm:$0xff] }
  0x3b   :  { %985 = vmatprep.subr.bf16.mxu0 %v2799_v56  ;;  %1028 = vmatprep.subr.bf16.mxu1 %v2801_v58  ;;  %v145_v56 = vld [vmem:[%s4197_s1 + $0x3a0] sm:$0xff]  ;;  %v2788_v58 = vcombine.low %v114_v44, %v122_v45  ;;  %v2805_v62 = vcombine.high %v130_v52, %v138_v53  ;;  %v116_v45 = vld [vmem:[%s4197_s1 + $0x2b8] sm:$0xff] }
  0x3c   :  { %v2819_v4 = vcombine.high %v145_v56, %v153_v57 }
  0x3e   :  { %986 = vmatpush1.bf16.msra.mxu0 %v2798_v61  ;;  %1029 = vmatpush1.bf16.msra.mxu1 %v2800_v63  ;;  %v154_v61 = vld [vmem:[%s4197_s1 + $0x3e8] sm:$0xff]  ;;  %v2802_v63 = vcombine.low %v129_v48, %v137_v49  ;;  %v131_v49 = vld [vmem:[%s4197_s1 + $0x330] sm:$0xff] }
  0x3f   :  { %987 = vmatprep.subr.bf16.mxu0 %v2815_v0  ;;  %1030 = vmatprep.subr.bf16.mxu1 %v2817_v2  ;;  %v35_v0 = vld [vmem:[%s4197_s1 + $0x30] sm:$0xff]  ;;  %v2804_v2 = vcombine.low %v130_v52, %v138_v53  ;;  %v2821_v8 = vcombine.high %v146_v60, %v154_v61  ;;  %v132_v53 = vld [vmem:[%s4197_s1 + $0x338] sm:$0xff] }
  0x40   :  { %v2711_v13 = vcombine.high %v35_v0, %v43_v1  ;;  %v2710_v17 = vcombine.low %v35_v0, %v43_v1 }
  0x42   :  { %988 = vmatpush1.bf16.msra.mxu0 %v2814_v7  ;;  %1031 = vmatpush1.bf16.msra.mxu1 %v2816_v9  ;;  %v44_v7 = vld [vmem:[%s4197_s1 + $0x78] sm:$0xff]  ;;  %v2818_v9 = vcombine.low %v145_v56, %v153_v57  ;;  %v147_v57 = vld [vmem:[%s4197_s1 + $0x3b0] sm:$0xff] }
  0x43   :  { %1059 = vmatprep.subr.bf16.mxu0 %v2707_v10  ;;  %1102 = vmatprep.subr.bf16.mxu1 %v2709_v12  ;;  %v51_v10 = vld [vmem:[%s4197_s1 + $0xb0] sm:$0xff]  ;;  %v2820_v12 = vcombine.low %v146_v60, %v154_v61  ;;  %v2713_v16 = vcombine.high %v36_v6, %v44_v7  ;;  %v2712_v20 = vcombine.low %v36_v6, %v44_v7  ;;  %v148_v61 = vld [vmem:[%s4197_s1 + $0x3b8] sm:$0xff] }
  0x44   :  { %v2727_v21 = vcombine.high %v51_v10, %v59_v11  ;;  %v2726_v25 = vcombine.low %v51_v10, %v59_v11  ;;  %v155_v60 = vld [vmem:[%s4197_s1 + $0x3f0] sm:$0xff]  ;;  %v3146_v10 = vld [vmem:[%s4199_s3] sm:$0xff]  }
  0x45   :  { %1006 = vmatmul.mubr.bf16.vlgmr.msra.gmra.mrb[4].mxu0 %v3432_v5  ;;  %1049 = vmatmul.mubr.bf16.vlgmr.msra.gmra.mrb[4].mxu1 %v3432_v5  ;;  %v2822_v6 = vcombine.low %v147_v57, %v155_v60  ;;  %v3147_v11 = vld [vmem:[%s4199_s3 + $0x80] sm:$0xff]  }
  0x46   :  { %1060 = vmatpush1.bf16.msra.mxu0 %v2706_v15  ;;  %1103 = vmatpush1.bf16.msra.mxu1 %v2708_v18  ;;  %v60_v15 = vld [vmem:[%s4197_s1 + $0xf8] sm:$0xff]  ;;  %v67_v18 = vld [vmem:[%s4197_s1 + $0x130] sm:$0xff] }
  0x47   :  { %1061 = vmatprep.subr.bf16.mxu0 %v2723_v19  ;;  %1104 = vmatprep.subr.bf16.mxu1 %v2725_v22  ;;  %v75_v19 = vld [vmem:[%s4197_s1 + $0x170] sm:$0xff]  ;;  %v68_v22 = vld [vmem:[%s4197_s1 + $0x138] sm:$0xff]  ;;  %v2729_v24 = vcombine.high %v52_v14, %v60_v15  ;;  %v2728_v28 = vcombine.low %v52_v14, %v60_v15  ;;  %v3150_v14 = vld [vmem:[%s4199_s3 + $0x8] sm:$0xff]  }
  0x48   :  { %1091 = vmatprep.mubr.bf16.mxu0 %v3278_v3  ;;  %1134 = vmatprep.mubr.bf16.mxu1 %v3278_v3  ;;  %v2743_v29 = vcombine.high %v67_v18, %v75_v19  ;;  %v2742_v33 = vcombine.low %v67_v18, %v75_v19  ;;  %v3151_v15 = vld [vmem:[%s4199_s3 + $0x88] sm:$0xff]   ;;  %v3154_v18 = vld [vmem:[%s4199_s3 + $0x10] sm:$0xff]   ;;  %v3156_v19 = vld [vmem:[%s4199_s3 + $0x58] sm:$0xff]  }
  0x4a   :  { %1062 = vmatpush1.bf16.msra.mxu0 %v2722_v23  ;;  %1105 = vmatpush1.bf16.msra.mxu1 %v2724_v26  ;;  %v76_v23 = vld [vmem:[%s4197_s1 + $0x178] sm:$0xff]  ;;  %v83_v26 = vld [vmem:[%s4197_s1 + $0x1b0] sm:$0xff] }
  0x4b   :  { %1063 = vmatprep.subr.bf16.mxu0 %v2739_v27  ;;  %1106 = vmatprep.subr.bf16.mxu1 %v2741_v30  ;;  %v91_v27 = vld [vmem:[%s4197_s1 + $0x1f0] sm:$0xff]  ;;  %v84_v30 = vld [vmem:[%s4197_s1 + $0x1b8] sm:$0xff]  ;;  %v2745_v32 = vcombine.high %v68_v22, %v76_v23  ;;  %v2744_v36 = vcombine.low %v68_v22, %v76_v23  ;;  %v3160_v23 = vld [vmem:[%s4199_s3 + $0x60] sm:$0xff]  }
  0x4c   :  { %v2759_v37 = vcombine.high %v83_v26, %v91_v27  ;;  %v2758_v40 = vcombine.low %v83_v26, %v91_v27  ;;  %v3159_v22 = vld [vmem:[%s4199_s3 + $0x98] sm:$0xff]   ;;  %v3163_v26 = vld [vmem:[%s4199_s3 + $0xa0] sm:$0xff]   ;;  %v3164_v27 = vld [vmem:[%s4199_s3 + $0x68] sm:$0xff]  }
  0x4e   :  { %1064 = vmatpush1.bf16.msra.mxu0 %v2738_v31  ;;  %1107 = vmatpush1.bf16.msra.mxu1 %v2740_v34  ;;  %v92_v31 = vld [vmem:[%s4197_s1 + $0x1f8] sm:$0xff]  ;;  %v99_v34 = vld [vmem:[%s4197_s1 + $0x230] sm:$0xff] }
  0x4f   :  { %1065 = vmatprep.subr.bf16.mxu0 %v2755_v35  ;;  %1108 = vmatprep.subr.bf16.mxu1 %v2757_v38  ;;  %v107_v35 = vld [vmem:[%s4197_s1 + $0x270] sm:$0xff]  ;;  %v100_v38 = vld [vmem:[%s4197_s1 + $0x238] sm:$0xff] }
  0x50   :  { %v2775_v44 = vcombine.high %v99_v34, %v107_v35  ;;  %v2774_v48 = vcombine.low %v99_v34, %v107_v35  ;;  %v3171_v34 = vld [vmem:[%s4199_s3 + $0xb0] sm:$0xff]   ;;  %v3172_v35 = vld [vmem:[%s4199_s3 + $0x78] sm:$0xff]  }
  0x52   :  { %1066 = vmatpush1.bf16.msra.mxu0 %v2754_v39  ;;  %1109 = vmatpush1.bf16.msra.mxu1 %v2756_v42  ;;  %v2761_v39 = vcombine.high %v84_v30, %v92_v31  ;;  %v123_v42 = vld [vmem:[%s4197_s1 + $0x2f0] sm:$0xff] }
  0x53   :  { %1067 = vmatprep.subr.bf16.mxu0 %v2771_v43  ;;  %1110 = vmatprep.subr.bf16.mxu1 %v2773_v46  ;;  %v2760_v43 = vcombine.low %v84_v30, %v92_v31  ;;  %v124_v46 = vld [vmem:[%s4197_s1 + $0x2f8] sm:$0xff]  ;;  %v2791_v52 = vcombine.high %v115_v41, %v123_v42  ;;  %v2790_v56 = vcombine.low %v115_v41, %v123_v42  ;;  %v3167_v30 = vld [vmem:[%s4199_s3 + $0xa8] sm:$0xff]   ;;  %v3168_v31 = vld [vmem:[%s4199_s3 + $0x70] sm:$0xff]  }
  0x56   :  { %1068 = vmatpush1.bf16.msra.mxu0 %v2770_v47  ;;  %1111 = vmatpush1.bf16.msra.mxu1 %v2772_v50  ;;  %v139_v50 = vld [vmem:[%s4197_s1 + $0x370] sm:$0xff] }
  0x57   :  { %1069 = vmatprep.subr.bf16.mxu0 %v2787_v51  ;;  %1112 = vmatprep.subr.bf16.mxu1 %v2789_v54  ;;  %v140_v54 = vld [vmem:[%s4197_s1 + $0x378] sm:$0xff]  ;;  %v2806_v0 = vcombine.low %v131_v49, %v139_v50 }
  0x58   :  { %v2808_v1 = vcombine.low %v132_v53, %v140_v54 }
  0x5a   :  { %1070 = vmatpush1.bf16.msra.mxu0 %v2786_v55  ;;  %1113 = vmatpush1.bf16.msra.mxu1 %v2788_v58  ;;  %v2793_v55 = vcombine.high %v116_v45, %v124_v46  ;;  %v2792_v58 = vcombine.low %v116_v45, %v124_v46 }
  0x5b   :  { %1071 = vmatprep.subr.bf16.mxu0 %v2803_v59  ;;  %1114 = vmatprep.subr.bf16.mxu1 %v2805_v62  ;;  %v2807_v59 = vcombine.high %v131_v49, %v139_v50  ;;  %v2809_v62 = vcombine.high %v132_v53, %v140_v54 }
  0x5e   :  { %1072 = vmatpush1.bf16.msra.mxu0 %v2802_v63  ;;  %1115 = vmatpush1.bf16.msra.mxu1 %v2804_v2  ;;  %v156_v63 = vld [vmem:[%s4197_s1 + $0x3f8] sm:$0xff]  ;;  %v2823_v2 = vcombine.high %v147_v57, %v155_v60 }
  0x5f   :  { %1073 = vmatprep.subr.bf16.mxu0 %v2819_v4  ;;  %1116 = vmatprep.subr.bf16.mxu1 %v2821_v8  ;;  %v2825_v4 = vcombine.high %v148_v61, %v156_v63  ;;  %v2824_v7 = vcombine.low %v148_v61, %v156_v63  ;;  %v3144_v8 = vld [vmem:[%s4199_s3 + $0x40] sm:$0xff]  }
  0x62   :  { %1074 = vmatpush1.bf16.msra.mxu0 %v2818_v9  ;;  %1117 = vmatpush1.bf16.msra.mxu1 %v2820_v12  ;;  %v3145_v9 = vld [vmem:[%s4199_s3 + $0xc0] sm:$0xff]   ;;  %v3148_v12 = vld [vmem:[%s4199_s3 + $0x48] sm:$0xff]  }
  0x63   :  { %1145 = vmatprep.subr.bf16.mxu0 %v2711_v13  ;;  %1188 = vmatprep.subr.bf16.mxu1 %v2713_v16  ;;  %v3149_v13 = vld [vmem:[%s4199_s3 + $0xc8] sm:$0xff]   ;;  %v3152_v16 = vld [vmem:[%s4199_s3 + $0x50] sm:$0xff]  }
  0x65   :  { %1092 = vmatmul.mubr.bf16.vlgmr.msra.gmra.mrb[8].mxu0 %v3432_v5  ;;  %1135 = vmatmul.mubr.bf16.vlgmr.msra.gmra.mrb[8].mxu1 %v3432_v5 }
  0x66   :  { %1146 = vmatpush1.bf16.msra.mxu0 %v2710_v17  ;;  %1189 = vmatpush1.bf16.msra.mxu1 %v2712_v20  ;;  %v3153_v17 = vld [vmem:[%s4199_s3 + $0xd0] sm:$0xff]   ;;  %v3157_v20 = vld [vmem:[%s4199_s3 + $0xd8] sm:$0xff]  }
  0x67   :  { %1147 = vmatprep.subr.bf16.mxu0 %v2727_v21  ;;  %1190 = vmatprep.subr.bf16.mxu1 %v2729_v24  ;;  %v3158_v21 = vld [vmem:[%s4199_s3 + $0x18] sm:$0xff]   ;;  %v3161_v24 = vld [vmem:[%s4199_s3 + $0xe0] sm:$0xff]  }
  0x68   :  { %1177 = vmatprep.mubr.bf16.mxu0 %v3278_v3  ;;  %1220 = vmatprep.mubr.bf16.mxu1 %v3278_v3  ;;  %v108_v3 = vld [vmem:[%s4197_s1 + $0x278] sm:$0xff] }
  0x69   :  { %v2777_v47 = vcombine.high %v100_v38, %v108_v3  ;;  %v2776_v51 = vcombine.low %v100_v38, %v108_v3  ;;  %v3175_v38 = vld [vmem:[%s4199_s3 + $0xb8] sm:$0xff]   ;;  %v3176_v3 = vld [vmem:[%s4199_s3 + $0x140] sm:$0xff]  }
  0x6a   :  { %1148 = vmatpush1.bf16.msra.mxu0 %v2726_v25  ;;  %1191 = vmatpush1.bf16.msra.mxu1 %v2728_v28  ;;  %v3162_v25 = vld [vmem:[%s4199_s3 + $0x20] sm:$0xff]   ;;  %v3165_v28 = vld [vmem:[%s4199_s3 + $0xe8] sm:$0xff]  }
  0x6b   :  { %1149 = vmatprep.subr.bf16.mxu0 %v2743_v29  ;;  %1192 = vmatprep.subr.bf16.mxu1 %v2745_v32  ;;  %v3166_v29 = vld [vmem:[%s4199_s3 + $0x28] sm:$0xff]   ;;  %v3169_v32 = vld [vmem:[%s4199_s3 + $0xf0] sm:$0xff]  }
  0x6e   :  { %1150 = vmatpush1.bf16.msra.mxu0 %v2742_v33  ;;  %1193 = vmatpush1.bf16.msra.mxu1 %v2744_v36  ;;  %v3170_v33 = vld [vmem:[%s4199_s3 + $0x30] sm:$0xff]   ;;  %v3173_v36 = vld [vmem:[%s4199_s3 + $0xf8] sm:$0xff]  }
  0x6f   :  { %1151 = vmatprep.subr.bf16.mxu0 %v2759_v37  ;;  %1194 = vmatprep.subr.bf16.mxu1 %v2761_v39  ;;  %v3174_v37 = vld [vmem:[%s4199_s3 + $0x38] sm:$0xff]   ;;  %v3177_v39 = vld [vmem:[%s4199_s3 + $0x1c0] sm:$0xff]  }
  0x72   :  { %1152 = vmatpush1.bf16.msra.mxu0 %v2758_v40  ;;  %1195 = vmatpush1.bf16.msra.mxu1 %v2760_v43  ;;  %v161_v40 = vlaneseq  ;;  %v158_v43 = vld [vmem:[%s4200_s2 + $0x8] sm:$0xff] }
  0x73   :  { %1153 = vmatprep.subr.bf16.mxu0 %v2775_v44  ;;  %1196 = vmatprep.subr.bf16.mxu1 %v2777_v47 }
  0x74   :  { %v3826_v41 = vshrl.u32 %v161_v40, 7  ;;  %v3190_v40 = vld [vmem:[%s4199_s3 + $0x118] sm:$0xff]  }
  0x76   :  { %1154 = vmatpush1.bf16.msra.mxu0 %v2774_v48  ;;  %1197 = vmatpush1.bf16.msra.mxu1 %v2776_v51  ;;  %v163_v42 = vsub.s32 0, %v3826_v41  ;;  %v167_v44 = vsub.s32 1, %v3826_v41  ;;  %v171_v46 = vsub.s32 2, %v3826_v41  ;;  %v175_v47 = vsub.s32 3, %v3826_v41 }
  0x77   :  { %1155 = vmatprep.subr.bf16.mxu0 %v2791_v52  ;;  %1198 = vmatprep.subr.bf16.mxu1 %v2793_v55  ;;  %v179_v51 = vsub.s32 4, %v3826_v41  ;;  %v183_v53 = vsub.s32 5, %v3826_v41  ;;  %v187_v54 = vsub.s32 6, %v3826_v41  ;;  %v191_v55 = vsub.s32 7, %v3826_v41  ;;  %v3204_v41 = vld [vmem:[%s4199_s3 + $0x178] sm:$0xff]  }
  0x78   :  { %v3833_v45 = vrot.slane %v158_v43, %v163_v42  ;;  %v3837_v48 = vrot.slane %v158_v43, %v167_v44  ;;  %v3839_v49 = vrot.slane %v158_v43, %v171_v46  ;;  %v3841_v50 = vrot.slane %v158_v43, %v175_v47 }
  0x79   :  { %v3846_v52 = vrot.slane %v158_v43, %v179_v51  ;;  %v3857_v57 = vrot.slane %v158_v43, %v187_v54 }
  0x7a   :  { %1156 = vmatpush1.bf16.msra.mxu0 %v2790_v56  ;;  %1199 = vmatpush1.bf16.msra.mxu1 %v2792_v58  ;;  %v3853_v56 = vrot.slane %v158_v43, %v183_v53  ;;  %v3861_v58 = vrot.slane %v158_v43, %v191_v55  ;;  %v3192_v43 = vld [vmem:[%s4199_s3 + $0x160] sm:$0xff]  }
  0x7b   :  { %1157 = vmatprep.subr.bf16.mxu0 %v2807_v59  ;;  %1200 = vmatprep.subr.bf16.mxu1 %v2809_v62  ;;  %v3866_v59 = vld [vmem:[%s4200_s2] sm:$0xff] }
  0x7c   :  { %v164_v60 = vrot.slane %v3866_v59, %v163_v42  ;;  %v172_v61 = vrot.slane %v3866_v59, %v171_v46  ;;  %v168_v62 = vrot.slane %v3866_v59, %v167_v44  ;;  %v176_v63 = vrot.slane %v3866_v59, %v175_v47  ;;  %v3191_v42 = vld [vmem:[%s4199_s3 + $0x198] sm:$0xff]   ;;  %v3193_v44 = vld [vmem:[%s4199_s3 + $0x1e0] sm:$0xff]  }
  0x7d   :  { %v3194_v46 = vld [vmem:[%s4199_s3 + $0x120] sm:$0xff]  }
  0x7e   :  { %1158 = vmatpush1.bf16.msra.mxu0 %v2806_v0  ;;  %1201 = vmatpush1.bf16.msra.mxu1 %v2808_v1  ;;  %v3195_v47 = vld [vmem:[%s4199_s3 + $0x1a0] sm:$0xff]  }
  0x7f   :  { %1159 = vmatprep.subr.bf16.mxu0 %v2823_v2  ;;  %1202 = vmatprep.subr.bf16.mxu1 %v2825_v4 }
  0x82   :  { %1160 = vmatpush1.bf16.msra.mxu0 %v2822_v6  ;;  %1203 = vmatpush1.bf16.msra.mxu1 %v2824_v7 }
  0x83   :  { %2966 = vmatprep.subr.bf16.mxu0 %v3144_v8  ;;  %2988 = vmatprep.subr.bf16.mxu1 %v3145_v9 }
  0x85   :  { %1178 = vmatmul.mubr.bf16.vlgmr.msra.gmra.mrb[12].mxu0 %v3432_v5  ;;  %1221 = vmatmul.mubr.bf16.vlgmr.msra.gmra.mrb[12].mxu1 %v3432_v5  ;;  %v3155_v5 = vld [vmem:[%s4199_s3 + $0x90] sm:$0xff]  }
  0x86   :  { %2967 = vmatpush3.bf16.msra.mxu0 %v3146_v10  ;;  %2989 = vmatpush3.bf16.msra.mxu1 %v3147_v11 }
  0x87   :  { %2968 = vmatprep.subr.bf16.mxu0 %v3148_v12  ;;  %2990 = vmatprep.subr.bf16.mxu1 %v3149_v13 }
  0x8a   :  { %2969 = vmatpush3.bf16.msra.mxu0 %v3150_v14  ;;  %2991 = vmatpush3.bf16.msra.mxu1 %v3151_v15 }
  0x8b   :  { %2970 = vmatprep.subr.bf16.mxu0 %v3152_v16  ;;  %2992 = vmatprep.subr.bf16.mxu1 %v3153_v17 }
  0x8e   :  { %2971 = vmatpush3.bf16.msra.mxu0 %v3154_v18  ;;  %2993 = vmatpush3.bf16.msra.mxu1 %v3155_v5 }
  0x8f   :  { %2972 = vmatprep.subr.bf16.mxu0 %v3156_v19  ;;  %2994 = vmatprep.subr.bf16.mxu1 %v3157_v20 }
  0x92   :  { %2973 = vmatpush3.bf16.msra.mxu0 %v3158_v21  ;;  %2995 = vmatpush3.bf16.msra.mxu1 %v3159_v22 }
  0x93   :  { %2974 = vmatprep.subr.bf16.mxu0 %v3160_v23  ;;  %2996 = vmatprep.subr.bf16.mxu1 %v3161_v24 }
  0x96   :  { %2975 = vmatpush3.bf16.msra.mxu0 %v3162_v25  ;;  %2997 = vmatpush3.bf16.msra.mxu1 %v3163_v26 }
  0x97   :  { %2976 = vmatprep.subr.bf16.mxu0 %v3164_v27  ;;  %2998 = vmatprep.subr.bf16.mxu1 %v3165_v28  ;;  %v3178_v28 = vld [vmem:[%s4199_s3 + $0x100] sm:$0xff]  }
  0x9a   :  { %2977 = vmatpush3.bf16.msra.mxu0 %v3166_v29  ;;  %2999 = vmatpush3.bf16.msra.mxu1 %v3167_v30  ;;  %v3179_v30 = vld [vmem:[%s4199_s3 + $0x180] sm:$0xff]  }
  0x9b   :  { %2978 = vmatprep.subr.bf16.mxu0 %v3168_v31  ;;  %3000 = vmatprep.subr.bf16.mxu1 %v3169_v32  ;;  %v3180_v31 = vld [vmem:[%s4199_s3 + $0x148] sm:$0xff]  }
  0x9c   :  { %v3181_v32 = vld [vmem:[%s4199_s3 + $0x1c8] sm:$0xff]  }
  0x9e   :  { %2979 = vmatpush3.bf16.msra.mxu0 %v3170_v33  ;;  %3001 = vmatpush3.bf16.msra.mxu1 %v3171_v34  ;;  %v3182_v33 = vld [vmem:[%s4199_s3 + $0x108] sm:$0xff]  }
  0x9f   :  { %2980 = vmatprep.subr.bf16.mxu0 %v3172_v35  ;;  %3002 = vmatprep.subr.bf16.mxu1 %v3173_v36  ;;  %v3183_v34 = vld [vmem:[%s4199_s3 + $0x188] sm:$0xff]   ;;  %v3184_v35 = vld [vmem:[%s4199_s3 + $0x150] sm:$0xff]  }
  0xa0   :  { %v3185_v36 = vld [vmem:[%s4199_s3 + $0x1d0] sm:$0xff]  }
  0xa2   :  { %2981 = vmatpush3.bf16.msra.mxu0 %v3174_v37  ;;  %3003 = vmatpush3.bf16.msra.mxu1 %v3175_v38  ;;  %v3186_v37 = vld [vmem:[%s4199_s3 + $0x110] sm:$0xff]  }
  0xa3   :  { %3010 = vmatprep.subr.bf16.mxu0 %v3176_v3  ;;  %3032 = vmatprep.subr.bf16.mxu1 %v3177_v39  ;;  %v3187_v38 = vld [vmem:[%s4199_s3 + $0x190] sm:$0xff]   ;;  %v3188_v3 = vld [vmem:[%s4199_s3 + $0x158] sm:$0xff]  }
  0xa4   :  { %v3189_v39 = vld [vmem:[%s4199_s3 + $0x1d8] sm:$0xff]  }
  0xf8   :  { %v921_v0 = vpop.f32.mrb[0].mxu0  ;;  %v964_v2 = vpop.f32.mrb[0].mxu1 }
  0xf9   :  { %v922_v1 = vadd.f32 %v921_v0, %v164_v60  ;;  %v923_v4 = vpop.f32.mrb[1].mxu0  ;;  %v965_v6 = vadd.f32 %v964_v2, %v172_v61  ;;  %v966_v8 = vpop.f32.mrb[1].mxu1  ;;  %v3199_v0 = vld [vmem:[%s4199_s3 + $0x1a8] sm:$0xff]   ;;  %v188_v2 = vrot.slane %v3866_v59, %v187_v54 }
  0xfa   :  { %v924_v7 = vadd.f32 %v923_v4, %v168_v62  ;;  %v925_v9 = vpop.f32.mrb[2].mxu0  ;;  %v967_v11 = vadd.f32 %v966_v8, %v176_v63  ;;  %v968_v13 = vpop.f32.mrb[2].mxu1  ;;  %v184_v4 = vrot.slane %v3866_v59, %v183_v53  ;;  %v3202_v8 = vld [vmem:[%s4199_s3 + $0x130] sm:$0xff]  }
  0xfb   :  { %v1231_v10 = vmax.f32 %v922_v1, 0.0  ;;  %v926_v12 = vadd.f32 %v925_v9, %v164_v60  ;;  %v927_v14 = vpop.f32.mrb[3].mxu0  ;;  %v1233_v15 = vmax.f32 %v965_v6, 0.0  ;;  %v969_v16 = vadd.f32 %v968_v13, %v172_v61  ;;  %v970_v18 = vpop.f32.mrb[3].mxu1  ;;  %v3196_v60 = vld [vmem:[%s4199_s3 + $0x168] sm:$0xff]   ;;  %v3200_v1 = vld [vmem:[%s4199_s3 + $0x170] sm:$0xff]  }
  0xfc   :  { %v928_v17 = vadd.f32 %v927_v14, %v168_v62  ;;  %v1234_v5 = vmax.f32 %v967_v11, 0.0  ;;  %v971_v20 = vadd.f32 %v970_v18, %v176_v63  ;;  %v1232_v21 = vmax.f32 %v924_v7, 0.0  ;;  %v3197_v61 = vld [vmem:[%s4199_s3 + $0x1e8] sm:$0xff]   ;;  %v3203_v53 = vld [vmem:[%s4199_s3 + $0x1b0] sm:$0xff]   ;;  %v3205_v13 = vld [vmem:[%s4199_s3 + $0x1f8] sm:$0xff]  }
  0xfd   :  { %v1247_v19 = vmax.f32 %v926_v12, 0.0  ;;  %v1249_v22 = vmax.f32 %v969_v16, 0.0  ;;  %v3198_v62 = vld [vmem:[%s4199_s3 + $0x128] sm:$0xff]   ;;  %v180_v63 = vrot.slane %v3866_v59, %v179_v51  ;;  %v3201_v51 = vld [vmem:[%s4199_s3 + $0x1f0] sm:$0xff]   ;;  %v192_v6 = vrot.slane %v3866_v59, %v191_v55 }
  0xfe   :  { %v1248_v23 = vmax.f32 %v928_v17, 0.0  ;;  %v1250_v25 = vmax.f32 %v971_v20, 0.0 }
  0xff   :  { %v1263_v24 = vpack.c.bf16 %v1247_v19, %v1231_v10  ;;  %v1265_v26 = vpack.c.bf16 %v1249_v22, %v1233_v15  ;;  %v3206_v22 = vld [vmem:[%s4199_s3 + $0x138] sm:$0xff]  }
 0x100   :  { %v1264_v27 = vpack.c.bf16 %v1248_v23, %v1232_v21  ;;  %v1266_v29 = vpack.c.bf16 %v1250_v25, %v1234_v5 }
 0x102   :  { %2342 = vmatprep.mubr.bf16.mxu0 %v1264_v27  ;;  %2383 = vmatprep.mubr.bf16.mxu1 %v1266_v29  ;;  %v3208_v27 = vld [vmem:[%s4199_s3 + $0x240] sm:$0xff]  }
 0x103   :  { %2343 = vmatmul.mubr.bf16.vlgmr.msra.gmra.mrb[16].mxu0 %v1263_v24  ;;  %2384 = vmatmul.mubr.bf16.vlgmr.msra.gmra.mrb[16].mxu1 %v1265_v26  ;;  %v3207_v26 = vld [vmem:[%s4199_s3 + $0x1b8] sm:$0xff]  }
 0x104   :  { %3011 = vmatpush3.bf16.msra.mxu0 %v3178_v28  ;;  %3033 = vmatpush3.bf16.msra.mxu1 %v3179_v30 }
 0x105   :  { %3012 = vmatprep.subr.bf16.mxu0 %v3180_v31  ;;  %3034 = vmatprep.subr.bf16.mxu1 %v3181_v32  ;;  %v3209_v31 = vld [vmem:[%s4199_s3 + $0x2c0] sm:$0xff]  }
 0x108   :  { %3013 = vmatpush3.bf16.msra.mxu0 %v3182_v33  ;;  %3035 = vmatpush3.bf16.msra.mxu1 %v3183_v34 }
 0x109   :  { %3014 = vmatprep.subr.bf16.mxu0 %v3184_v35  ;;  %3036 = vmatprep.subr.bf16.mxu1 %v3185_v36  ;;  %v3210_v36 = vld [vmem:[%s4199_s3 + $0x200] sm:$0xff]  }
 0x10c   :  { %3015 = vmatpush3.bf16.msra.mxu0 %v3186_v37  ;;  %3037 = vmatpush3.bf16.msra.mxu1 %v3187_v38  ;;  %v3211_v38 = vld [vmem:[%s4199_s3 + $0x280] sm:$0xff]  }
 0x10d   :  { %3016 = vmatprep.subr.bf16.mxu0 %v3188_v3  ;;  %3038 = vmatprep.subr.bf16.mxu1 %v3189_v39  ;;  %v3212_v3 = vld [vmem:[%s4199_s3 + $0x248] sm:$0xff]  }
 0x10e   :  { %v3213_v39 = vld [vmem:[%s4199_s3 + $0x2c8] sm:$0xff]  }
 0x110   :  { %3017 = vmatpush3.bf16.msra.mxu0 %v3190_v40  ;;  %3039 = vmatpush3.bf16.msra.mxu1 %v3191_v42  ;;  %v3214_v40 = vld [vmem:[%s4199_s3 + $0x208] sm:$0xff]  }
 0x111   :  { %3018 = vmatprep.subr.bf16.mxu0 %v3192_v43  ;;  %3040 = vmatprep.subr.bf16.mxu1 %v3193_v44  ;;  %v3215_v42 = vld [vmem:[%s4199_s3 + $0x288] sm:$0xff]   ;;  %v3216_v43 = vld [vmem:[%s4199_s3 + $0x250] sm:$0xff]  }
 0x112   :  { %v3217_v44 = vld [vmem:[%s4199_s3 + $0x2d0] sm:$0xff]  }
 0x114   :  { %3019 = vmatpush3.bf16.msra.mxu0 %v3194_v46  ;;  %3041 = vmatpush3.bf16.msra.mxu1 %v3195_v47  ;;  %v3218_v46 = vld [vmem:[%s4199_s3 + $0x210] sm:$0xff]  }
 0x115   :  { %3020 = vmatprep.subr.bf16.mxu0 %v3196_v60  ;;  %3042 = vmatprep.subr.bf16.mxu1 %v3197_v61  ;;  %v3219_v47 = vld [vmem:[%s4199_s3 + $0x290] sm:$0xff]   ;;  %v3220_v60 = vld [vmem:[%s4199_s3 + $0x258] sm:$0xff]  }
 0x116   :  { %v3221_v61 = vld [vmem:[%s4199_s3 + $0x2d8] sm:$0xff]  }
 0x118   :  { %v1007_v7 = vpop.f32.mrb[4].mxu0  ;;  %3021 = vmatpush3.bf16.msra.mxu0 %v3198_v62  ;;  %v1050_v54 = vpop.f32.mrb[4].mxu1  ;;  %3043 = vmatpush3.bf16.msra.mxu1 %v3199_v0  ;;  %v3222_v62 = vld [vmem:[%s4199_s3 + $0x218] sm:$0xff]   ;;  %v3224_v0 = vld [vmem:[%s4199_s3 + $0x260] sm:$0xff]  }
 0x119   :  { %v1008_v9 = vadd.f32 %v1007_v7, %v180_v63  ;;  %v1009_v10 = vpop.f32.mrb[5].mxu0  ;;  %3022 = vmatprep.subr.bf16.mxu0 %v3200_v1  ;;  %v1051_v55 = vadd.f32 %v1050_v54, %v188_v2  ;;  %v1052_v11 = vpop.f32.mrb[5].mxu1  ;;  %3044 = vmatprep.subr.bf16.mxu1 %v3201_v51  ;;  %v3225_v1 = vld [vmem:[%s4199_s3 + $0x2e0] sm:$0xff]   ;;  %v3228_v51 = vld [vmem:[%s4199_s3 + $0x268] sm:$0xff]   ;;  %v3233_v54 = vld [vmem:[%s4199_s3 + $0x2f0] sm:$0xff]  }
 0x11a   :  { %v1010_v59 = vadd.f32 %v1009_v10, %v184_v4  ;;  %v1011_v12 = vpop.f32.mrb[6].mxu0  ;;  %v1053_v15 = vadd.f32 %v1052_v11, %v192_v6  ;;  %v1054_v17 = vpop.f32.mrb[6].mxu1  ;;  %v3230_v7 = vld [vmem:[%s4199_s3 + $0x228] sm:$0xff]   ;;  %v3235_v11 = vld [vmem:[%s4199_s3 + $0x2b0] sm:$0xff]  }
 0x11b   :  { %v1235_v14 = vmax.f32 %v1008_v9, 0.0  ;;  %v1012_v16 = vadd.f32 %v1011_v12, %v180_v63  ;;  %v1013_v18 = vpop.f32.mrb[7].mxu0  ;;  %v1237_v5 = vmax.f32 %v1051_v55, 0.0  ;;  %v1055_v19 = vadd.f32 %v1054_v17, %v188_v2  ;;  %v1056_v21 = vpop.f32.mrb[7].mxu1  ;;  %v3223_v63 = vld [vmem:[%s4199_s3 + $0x298] sm:$0xff]   ;;  %v3226_v2 = vld [vmem:[%s4199_s3 + $0x220] sm:$0xff]  }
 0x11c   :  { %v1014_v20 = vadd.f32 %v1013_v18, %v184_v4  ;;  %3023 = vmatpush3.bf16.msra.mxu0 %v3202_v8  ;;  %v1238_v23 = vmax.f32 %v1053_v15, 0.0  ;;  %v1057_v25 = vadd.f32 %v1056_v21, %v192_v6  ;;  %3045 = vmatpush3.bf16.msra.mxu1 %v3203_v53  ;;  %v1236_v28 = vmax.f32 %v1010_v59, 0.0  ;;  %v3227_v4 = vld [vmem:[%s4199_s3 + $0x2a0] sm:$0xff]   ;;  %v3229_v6 = vld [vmem:[%s4199_s3 + $0x2e8] sm:$0xff]   ;;  %v3232_v9 = vld [vmem:[%s4199_s3 + $0x270] sm:$0xff]  }
 0x11d   :  { %v1251_v24 = vmax.f32 %v1012_v16, 0.0  ;;  %3024 = vmatprep.subr.bf16.mxu0 %v3204_v41  ;;  %v1253_v29 = vmax.f32 %v1055_v19, 0.0  ;;  %3046 = vmatprep.subr.bf16.mxu1 %v3205_v13  ;;  %v3231_v8 = vld [vmem:[%s4199_s3 + $0x2a8] sm:$0xff]   ;;  %v3234_v53 = vld [vmem:[%s4199_s3 + $0x230] sm:$0xff]   ;;  %v3236_v12 = vld [vmem:[%s4199_s3 + $0x278] sm:$0xff]  }
 0x11e   :  { %v1252_v30 = vmax.f32 %v1014_v20, 0.0  ;;  %v1254_v33 = vmax.f32 %v1057_v25, 0.0  ;;  %v3237_v17 = vld [vmem:[%s4199_s3 + $0x2f8] sm:$0xff]  }
 0x11f   :  { %v1267_v32 = vpack.c.bf16 %v1251_v24, %v1235_v14  ;;  %v1269_v34 = vpack.c.bf16 %v1253_v29, %v1237_v5 }
 0x120   :  { %v1268_v35 = vpack.c.bf16 %v1252_v30, %v1236_v28  ;;  %3025 = vmatpush3.bf16.msra.mxu0 %v3206_v22  ;;  %v1270_v37 = vpack.c.bf16 %v1254_v33, %v1238_v23  ;;  %3047 = vmatpush3.bf16.msra.mxu1 %v3207_v26  ;;  %v3238_v26 = vld [vmem:[%s4199_s3 + $0x238] sm:$0xff]  }
 0x121   :  { %3054 = vmatprep.subr.bf16.mxu0 %v3208_v27  ;;  %3076 = vmatprep.subr.bf16.mxu1 %v3209_v31 }
 0x122   :  { %2424 = vmatprep.mubr.bf16.mxu0 %v1268_v35  ;;  %2465 = vmatprep.mubr.bf16.mxu1 %v1270_v37 }
 0x123   :  { %2425 = vmatmul.mubr.bf16.vlgmr.msra.gmra.mrb[20].mxu0 %v1267_v32  ;;  %2466 = vmatmul.mubr.bf16.vlgmr.msra.gmra.mrb[20].mxu1 %v1269_v34  ;;  %v3241_v32 = vld [vmem:[%s4199_s3 + $0x3c0] sm:$0xff]  }
 0x124   :  { %3055 = vmatpush3.bf16.msra.mxu0 %v3210_v36  ;;  %3077 = vmatpush3.bf16.msra.mxu1 %v3211_v38  ;;  %v3242_v36 = vld [vmem:[%s4199_s3 + $0x300] sm:$0xff]  }
 0x125   :  { %3056 = vmatprep.subr.bf16.mxu0 %v3212_v3  ;;  %3078 = vmatprep.subr.bf16.mxu1 %v3213_v39  ;;  %v3243_v38 = vld [vmem:[%s4199_s3 + $0x380] sm:$0xff]   ;;  %v3244_v3 = vld [vmem:[%s4199_s3 + $0x348] sm:$0xff]  }
 0x126   :  { %v3245_v39 = vld [vmem:[%s4199_s3 + $0x3c8] sm:$0xff]  }
 0x128   :  { %3057 = vmatpush3.bf16.msra.mxu0 %v3214_v40  ;;  %3079 = vmatpush3.bf16.msra.mxu1 %v3215_v42  ;;  %v3246_v40 = vld [vmem:[%s4199_s3 + $0x308] sm:$0xff]  }
 0x129   :  { %3058 = vmatprep.subr.bf16.mxu0 %v3216_v43  ;;  %3080 = vmatprep.subr.bf16.mxu1 %v3217_v44  ;;  %v3247_v42 = vld [vmem:[%s4199_s3 + $0x388] sm:$0xff]   ;;  %v3248_v43 = vld [vmem:[%s4199_s3 + $0x350] sm:$0xff]  }
 0x12a   :  { %v3249_v44 = vld [vmem:[%s4199_s3 + $0x3d0] sm:$0xff]  }
 0x12c   :  { %3059 = vmatpush3.bf16.msra.mxu0 %v3218_v46  ;;  %3081 = vmatpush3.bf16.msra.mxu1 %v3219_v47  ;;  %v3250_v46 = vld [vmem:[%s4199_s3 + $0x310] sm:$0xff]  }
 0x12d   :  { %3060 = vmatprep.subr.bf16.mxu0 %v3220_v60  ;;  %3082 = vmatprep.subr.bf16.mxu1 %v3221_v61  ;;  %v3251_v47 = vld [vmem:[%s4199_s3 + $0x390] sm:$0xff]   ;;  %v3252_v60 = vld [vmem:[%s4199_s3 + $0x358] sm:$0xff]  }
 0x12e   :  { %v3253_v61 = vld [vmem:[%s4199_s3 + $0x3d8] sm:$0xff]  }
 0x130   :  { %3061 = vmatpush3.bf16.msra.mxu0 %v3222_v62  ;;  %3083 = vmatpush3.bf16.msra.mxu1 %v3223_v63  ;;  %v3254_v62 = vld [vmem:[%s4199_s3 + $0x318] sm:$0xff]  }
 0x131   :  { %3062 = vmatprep.subr.bf16.mxu0 %v3224_v0  ;;  %3084 = vmatprep.subr.bf16.mxu1 %v3225_v1  ;;  %v3255_v63 = vld [vmem:[%s4199_s3 + $0x398] sm:$0xff]   ;;  %v3256_v0 = vld [vmem:[%s4199_s3 + $0x360] sm:$0xff]  }
 0x132   :  { %v3257_v1 = vld [vmem:[%s4199_s3 + $0x3e0] sm:$0xff]  }
 0x134   :  { %3063 = vmatpush3.bf16.msra.mxu0 %v3226_v2  ;;  %3085 = vmatpush3.bf16.msra.mxu1 %v3227_v4  ;;  %v3258_v2 = vld [vmem:[%s4199_s3 + $0x320] sm:$0xff]  }
 0x135   :  { %3064 = vmatprep.subr.bf16.mxu0 %v3228_v51  ;;  %3086 = vmatprep.subr.bf16.mxu1 %v3229_v6  ;;  %v3259_v4 = vld [vmem:[%s4199_s3 + $0x3a0] sm:$0xff]   ;;  %v3260_v51 = vld [vmem:[%s4199_s3 + $0x368] sm:$0xff]  }
 0x136   :  { %v3261_v6 = vld [vmem:[%s4199_s3 + $0x3e8] sm:$0xff]  }
 0x138   :  { %v1093_v10 = vpop.f32.mrb[8].mxu0  ;;  %3065 = vmatpush3.bf16.msra.mxu0 %v3230_v7  ;;  %v1136_v55 = vpop.f32.mrb[8].mxu1  ;;  %3087 = vmatpush3.bf16.msra.mxu1 %v3231_v8  ;;  %v3262_v7 = vld [vmem:[%s4199_s3 + $0x328] sm:$0xff]  }
 0x139   :  { %v1094_v41 = vadd.f32 %v1093_v10, %v3833_v45  ;;  %v1095_v59 = vpop.f32.mrb[9].mxu0  ;;  %3066 = vmatprep.subr.bf16.mxu0 %v3232_v9  ;;  %v1137_v13 = vadd.f32 %v1136_v55, %v3839_v49  ;;  %v1138_v15 = vpop.f32.mrb[9].mxu1  ;;  %3088 = vmatprep.subr.bf16.mxu1 %v3233_v54  ;;  %v3263_v8 = vld [vmem:[%s4199_s3 + $0x3a8] sm:$0xff]   ;;  %v3264_v9 = vld [vmem:[%s4199_s3 + $0x370] sm:$0xff]  }
 0x13a   :  { %v1096_v14 = vadd.f32 %v1095_v59, %v3837_v48  ;;  %v1097_v16 = vpop.f32.mrb[10].mxu0  ;;  %v1139_v5 = vadd.f32 %v1138_v15, %v3841_v50  ;;  %v1140_v20 = vpop.f32.mrb[10].mxu1  ;;  %v3265_v54 = vld [vmem:[%s4199_s3 + $0x3f0] sm:$0xff]  }
 0x13b   :  { %v1239_v18 = vmax.f32 %v1094_v41, 0.0  ;;  %v1098_v19 = vadd.f32 %v1097_v16, %v3833_v45  ;;  %v1099_v21 = vpop.f32.mrb[11].mxu0  ;;  %v1241_v22 = vmax.f32 %v1137_v13, 0.0  ;;  %v1141_v23 = vadd.f32 %v1140_v20, %v3839_v49  ;;  %v1142_v25 = vpop.f32.mrb[11].mxu1  ;;  %v3239_v45 = vld [vmem:[%s4199_s3 + $0x2b8] sm:$0xff]  }
 0x13c   :  { %v1100_v24 = vadd.f32 %v1099_v21, %v3837_v48  ;;  %3067 = vmatpush3.bf16.msra.mxu0 %v3234_v53  ;;  %v1242_v27 = vmax.f32 %v1139_v5, 0.0  ;;  %v1143_v29 = vadd.f32 %v1142_v25, %v3841_v50  ;;  %3089 = vmatpush3.bf16.msra.mxu1 %v3235_v11  ;;  %v3240_v48 = vld [vmem:[%s4199_s3 + $0x340] sm:$0xff]   ;;  %v1240_v49 = vmax.f32 %v1096_v14, 0.0  ;;  %v3266_v53 = vld [vmem:[%s4199_s3 + $0x330] sm:$0xff]   ;;  %v3270_v25 = vld [vmem:[%s4199_s3 + $0x338] sm:$0xff]  }
 0x13d   :  { %v1255_v28 = vmax.f32 %v1098_v19, 0.0  ;;  %3068 = vmatprep.subr.bf16.mxu0 %v3236_v12  ;;  %v1257_v30 = vmax.f32 %v1141_v23, 0.0  ;;  %3090 = vmatprep.subr.bf16.mxu1 %v3237_v17  ;;  %v3267_v11 = vld [vmem:[%s4199_s3 + $0x3b0] sm:$0xff]   ;;  %v3268_v12 = vld [vmem:[%s4199_s3 + $0x378] sm:$0xff]  }
 0x13e   :  { %v1256_v31 = vmax.f32 %v1100_v24, 0.0  ;;  %v1258_v50 = vmax.f32 %v1143_v29, 0.0  ;;  %v3269_v17 = vld [vmem:[%s4199_s3 + $0x3f8] sm:$0xff]  }
 0x13f   :  { %v1271_v33 = vpack.c.bf16 %v1255_v28, %v1239_v18  ;;  %v1273_v34 = vpack.c.bf16 %v1257_v30, %v1241_v22 }
 0x140   :  { %v1272_v35 = vpack.c.bf16 %v1256_v31, %v1240_v49  ;;  %3069 = vmatpush3.bf16.msra.mxu0 %v3238_v26  ;;  %v1274_v37 = vpack.c.bf16 %v1258_v50, %v1242_v27  ;;  %3091 = vmatpush3.bf16.msra.mxu1 %v3239_v45  ;;  %v2826_v50 = vld [vmem:[%s4201_s4] ss:$0 sm:$0xff] }
 0x141   :  { %3098 = vmatprep.subr.bf16.mxu0 %v3240_v48  ;;  %3120 = vmatprep.subr.bf16.mxu1 %v3241_v32 }
 0x142   :  { %2506 = vmatprep.mubr.bf16.mxu0 %v1272_v35  ;;  %2547 = vmatprep.mubr.bf16.mxu1 %v1274_v37 }
 0x143   :  { %2507 = vmatmul.mubr.bf16.vlgmr.msra.gmra.mrb[24].mxu0 %v1271_v33  ;;  %2548 = vmatmul.mubr.bf16.vlgmr.msra.gmra.mrb[24].mxu1 %v1273_v34 }
 0x144   :  { %3099 = vmatpush3.bf16.msra.mxu0 %v3242_v36  ;;  %3121 = vmatpush3.bf16.msra.mxu1 %v3243_v38 }
 0x145   :  { %3100 = vmatprep.subr.bf16.mxu0 %v3244_v3  ;;  %3122 = vmatprep.subr.bf16.mxu1 %v3245_v39 }
 0x148   :  { %3101 = vmatpush3.bf16.msra.mxu0 %v3246_v40  ;;  %3123 = vmatpush3.bf16.msra.mxu1 %v3247_v42 }
 0x149   :  { %3102 = vmatprep.subr.bf16.mxu0 %v3248_v43  ;;  %3124 = vmatprep.subr.bf16.mxu1 %v3249_v44 }
 0x14c   :  { %3103 = vmatpush3.bf16.msra.mxu0 %v3250_v46  ;;  %3125 = vmatpush3.bf16.msra.mxu1 %v3251_v47 }
 0x14d   :  { %3104 = vmatprep.subr.bf16.mxu0 %v3252_v60  ;;  %3126 = vmatprep.subr.bf16.mxu1 %v3253_v61 }
 0x150   :  { %3105 = vmatpush3.bf16.msra.mxu0 %v3254_v62  ;;  %3127 = vmatpush3.bf16.msra.mxu1 %v3255_v63 }
 0x151   :  { %3106 = vmatprep.subr.bf16.mxu0 %v3256_v0  ;;  %3128 = vmatprep.subr.bf16.mxu1 %v3257_v1 }
 0x154   :  { %3107 = vmatpush3.bf16.msra.mxu0 %v3258_v2  ;;  %3129 = vmatpush3.bf16.msra.mxu1 %v3259_v4 }
 0x155   :  { %3108 = vmatprep.subr.bf16.mxu0 %v3260_v51  ;;  %3130 = vmatprep.subr.bf16.mxu1 %v3261_v6 }
 0x158   :  { %v1179_v10 = vpop.f32.mrb[12].mxu0  ;;  %3109 = vmatpush3.bf16.msra.mxu0 %v3262_v7  ;;  %v1222_v55 = vpop.f32.mrb[12].mxu1  ;;  %3131 = vmatpush3.bf16.msra.mxu1 %v3263_v8 }
 0x159   :  { %v1180_v41 = vadd.f32 %v1179_v10, %v3846_v52  ;;  %v1181_v59 = vpop.f32.mrb[13].mxu0  ;;  %3110 = vmatprep.subr.bf16.mxu0 %v3264_v9  ;;  %v1223_v13 = vadd.f32 %v1222_v55, %v3857_v57  ;;  %v1224_v15 = vpop.f32.mrb[13].mxu1  ;;  %3132 = vmatprep.subr.bf16.mxu1 %v3265_v54 }
 0x15a   :  { %v1182_v14 = vadd.f32 %v1181_v59, %v3853_v56  ;;  %v1183_v16 = vpop.f32.mrb[14].mxu0  ;;  %v1225_v18 = vadd.f32 %v1224_v15, %v3861_v58  ;;  %v1226_v19 = vpop.f32.mrb[14].mxu1 }
 0x15b   :  { %v1184_v5 = vadd.f32 %v1183_v16, %v3846_v52  ;;  %v1185_v20 = vpop.f32.mrb[15].mxu0  ;;  %v1245_v21 = vmax.f32 %v1223_v13, 0.0  ;;  %v1227_v22 = vadd.f32 %v1226_v19, %v3857_v57  ;;  %v1228_v24 = vpop.f32.mrb[15].mxu1  ;;  %v1243_v26 = vmax.f32 %v1180_v41, 0.0  ;;  %v3271_v52 = vld [vmem:[%s4199_s3 + $0x3b8] sm:$0xff]  }
 0x15c   :  { %v1186_v23 = vadd.f32 %v1185_v20, %v3853_v56  ;;  %3111 = vmatpush3.bf16.msra.mxu0 %v3266_v53  ;;  %v1246_v27 = vmax.f32 %v1225_v18, 0.0  ;;  %v1229_v29 = vadd.f32 %v1228_v24, %v3861_v58  ;;  %3133 = vmatpush3.bf16.msra.mxu1 %v3267_v11  ;;  %v1244_v57 = vmax.f32 %v1182_v14, 0.0 }
 0x15d   :  { %v1259_v28 = vmax.f32 %v1184_v5, 0.0  ;;  %3112 = vmatprep.subr.bf16.mxu0 %v3268_v12  ;;  %v1261_v45 = vmax.f32 %v1227_v22, 0.0  ;;  %3134 = vmatprep.subr.bf16.mxu1 %v3269_v17 }
 0x15e   :  { %v1260_v56 = vmax.f32 %v1186_v23, 0.0  ;;  %v1262_v49 = vmax.f32 %v1229_v29, 0.0 }
 0x15f   :  { %v1275_v48 = vpack.c.bf16 %v1259_v28, %v1243_v26  ;;  %v1277_v30 = vpack.c.bf16 %v1261_v45, %v1245_v21 }
 0x160   :  { %v1276_v31 = vpack.c.bf16 %v1260_v56, %v1244_v57  ;;  %3113 = vmatpush3.bf16.msra.mxu0 %v3270_v25  ;;  %v1278_v32 = vpack.c.bf16 %v1262_v49, %v1246_v27  ;;  %3135 = vmatpush3.bf16.msra.mxu1 %v3271_v52 }
 0x162   :  { %2588 = vmatprep.mubr.bf16.mxu0 %v1276_v31  ;;  %2629 = vmatprep.mubr.bf16.mxu1 %v1278_v32 }
 0x163   :  { %2589 = vmatmul.mubr.bf16.vlgmr.msra.gmra.mrb[28].mxu0 %v1275_v48  ;;  %2630 = vmatmul.mubr.bf16.vlgmr.msra.gmra.mrb[28].mxu1 %v1277_v30  ;;  %v3277_v30 = vld [vmem:[%s4198_s0] sm:$0xff]  }
 0x164   :  { %v2638_v31 = vunpack.c.l.bf16 %v3277_v30 }
 0x1d6   :  { %v2982_v58 = vpop.f32.mrb[16].mxu0  ;;  %v3004_v33 = vpop.f32.mrb[16].mxu1 }
 0x1d7   :  { %v2983_v34 = vpop.f32.mrb[17].mxu0  ;;  %v3005_v36 = vpop.f32.mrb[17].mxu1 }
 0x1d8   :  { %v2984_v35 = vadd.f32 %v2983_v34, %v2982_v58  ;;  %v2985_v37 = vpop.f32.mrb[18].mxu0  ;;  %v3006_v38 = vadd.f32 %v3005_v36, %v3004_v33  ;;  %v3007_v3 = vpop.f32.mrb[18].mxu1 }
 0x1d9   :  { %v2986_v39 = vpop.f32.mrb[19].mxu0  ;;  %v3008_v43 = vpop.f32.mrb[19].mxu1 }
 0x1da   :  { %v2345_v40 = vadd.f32 %v2984_v35, %v2826_v50  ;;  %v2987_v42 = vadd.f32 %v2986_v39, %v2985_v37  ;;  %v3009_v44 = vadd.f32 %v3008_v43, %v3007_v3  ;;  %v2639_v35 = vunpack.c.h.bf16 %v3277_v30 }
 0x1dc   :  { %v2386_v46 = vadd.f32 %v3006_v38, %v2345_v40  ;;  %v2348_v47 = vadd.f32 %v2987_v42, %v2826_v50 }
 0x1de   :  { %v2389_v60 = vadd.f32 %v3009_v44, %v2348_v47 }
 0x1f6   :  { %v3026_v61 = vpop.f32.mrb[20].mxu0  ;;  %v3048_v62 = vpop.f32.mrb[20].mxu1 }
 0x1f7   :  { %v3027_v63 = vpop.f32.mrb[21].mxu0  ;;  %v3049_v1 = vpop.f32.mrb[21].mxu1 }
 0x1f8   :  { %v3028_v0 = vadd.f32 %v3027_v63, %v3026_v61  ;;  %v3029_v2 = vpop.f32.mrb[22].mxu0  ;;  %v3050_v4 = vadd.f32 %v3049_v1, %v3048_v62  ;;  %v3051_v51 = vpop.f32.mrb[22].mxu1 }
 0x1f9   :  { %v3030_v6 = vpop.f32.mrb[23].mxu0  ;;  %v3052_v9 = vpop.f32.mrb[23].mxu1 }
 0x1fa   :  { %v2427_v7 = vadd.f32 %v3028_v0, %v2386_v46  ;;  %v3031_v8 = vadd.f32 %v3030_v6, %v3029_v2  ;;  %v3053_v54 = vadd.f32 %v3052_v9, %v3051_v51  ;;  %v2955_v2 = vld [vmem:[%s4202_s5] ss:$0 sm:$0xff] }
 0x1fc   :  { %v2468_v10 = vadd.f32 %v3050_v4, %v2427_v7  ;;  %v2430_v53 = vadd.f32 %v3031_v8, %v2389_v60  ;;  %v2956_v7 = vld [vmem:[%s4203_s6] ss:$0 sm:$0xff] }
 0x1fe   :  { %v2471_v41 = vadd.f32 %v3053_v54, %v2430_v53 }
 0x216   :  { %v3070_v55 = vpop.f32.mrb[24].mxu0  ;;  %v3092_v59 = vpop.f32.mrb[24].mxu1 }
 0x217   :  { %v3071_v11 = vpop.f32.mrb[25].mxu0  ;;  %v3093_v13 = vpop.f32.mrb[25].mxu1 }
 0x218   :  { %v3072_v12 = vadd.f32 %v3071_v11, %v3070_v55  ;;  %v3073_v14 = vpop.f32.mrb[26].mxu0  ;;  %v3094_v15 = vadd.f32 %v3093_v13, %v3092_v59  ;;  %v3095_v16 = vpop.f32.mrb[26].mxu1 }
 0x219   :  { %v3074_v17 = vpop.f32.mrb[27].mxu0  ;;  %v3096_v19 = vpop.f32.mrb[27].mxu1 }
 0x21a   :  { %v2509_v18 = vadd.f32 %v3072_v12, %v2468_v10  ;;  %v3075_v5 = vadd.f32 %v3074_v17, %v3073_v14  ;;  %v3097_v20 = vadd.f32 %v3096_v19, %v3095_v16 }
 0x21c   :  { %v2550_v21 = vadd.f32 %v3094_v15, %v2509_v18  ;;  %v2512_v22 = vadd.f32 %v3075_v5, %v2471_v41 }
 0x21e   :  { %v2553_v23 = vadd.f32 %v3097_v20, %v2512_v22 }
 0x236   :  { %v3114_v24 = vpop.f32.mrb[28].mxu0  ;;  %v3136_v25 = vpop.f32.mrb[28].mxu1 }
 0x237   :  { %v3115_v26 = vpop.f32.mrb[29].mxu0  ;;  %v3137_v28 = vpop.f32.mrb[29].mxu1 }
 0x238   :  { %v3116_v27 = vadd.f32 %v3115_v26, %v3114_v24  ;;  %v3117_v29 = vpop.f32.mrb[30].mxu0  ;;  %v3138_v52 = vadd.f32 %v3137_v28, %v3136_v25  ;;  %v3139_v57 = vpop.f32.mrb[30].mxu1 }
 0x239   :  { %v3118_v45 = vpop.f32.mrb[31].mxu0  ;;  %v3140_v49 = vpop.f32.mrb[31].mxu1 }
 0x23a   :  { %v2591_v56 = vadd.f32 %v3116_v27, %v2550_v21  ;;  %v3119_v48 = vadd.f32 %v3118_v45, %v3117_v29  ;;  %v3141_v32 = vadd.f32 %v3140_v49, %v3139_v57 }
 0x23c   :  { %v2632_v58 = vadd.f32 %v3138_v52, %v2591_v56  ;;  %v2594_v33 = vadd.f32 %v3119_v48, %v2553_v23 }
 0x23e   :  { %v2635_v50 = vadd.f32 %v3141_v32, %v2594_v33  ;;  %v2642_v34 = vadd.f32 %v2638_v31, %v2632_v58 }
 0x240   :  { %2644 = vadd.xlane.f32.xlu0 %v2642_v34  ;;  %v2643_v36 = vadd.f32 %v2639_v35, %v2635_v50 }
 0x244   :  { %2646 = vadd.xlane.f32.xlu0 %v2643_v36 }
 0x2cd   :  { %v2645_v37 = vpop.xlane.xlu0 %2644 }
 0x2ce   :  { %v2649_v38 = vmul.f32 0.0078125, %v2645_v37 }
 0x2d0   :  { %v2651_v3 = vsub.f32 %v2642_v34, %v2649_v38 }
 0x2d1   :  { %v2647_v39 = vpop.xlane.xlu0 %2646 }
 0x2d2   :  { %v2650_v40 = vmul.f32 0.0078125, %v2647_v39  ;;  %v2653_v42 = vmul.f32 %v2651_v3, %v2651_v3 }
 0x2d4   :  { %v2652_v43 = vsub.f32 %v2643_v36, %v2650_v40  ;;  %2655 = vadd.xlane.f32.xlu1 %v2653_v42 }
 0x2d6   :  { %v2654_v44 = vmul.f32 %v2652_v43, %v2652_v43 }
 0x2d8   :  { %2657 = vadd.xlane.f32.xlu1 %v2654_v44 }
 0x361   :  { %v2656_v46 = vpop.xlane.xlu1 %2655 }
 0x362   :  { %v2659_v47 = vmul.f32 0.0078125, %v2656_v46 }
 0x364   :  { %v2661_v60 = vadd.f32 1e-05, %v2659_v47 }
 0x365   :  { %v2658_v61 = vpop.xlane.xlu1 %2657 }
 0x366   :  { %3273 = vrsqrt.f32 %v2661_v60  ;;  %v2660_v62 = vmul.f32 0.0078125, %v2658_v61 }
 0x368   :  { %v2662_v63 = vadd.f32 1e-05, %v2660_v62 }
 0x36a   :  { %3275 = vrsqrt.f32 %v2662_v63 }
 0x370   :  { %v3274_v0 = vpop.eup %3273 }
 0x371   :  { %v2665_v1 = vmul.f32 %v3274_v0, %v2651_v3 }
 0x373   :  { %v2673_v51 = vmul.f32 %v2955_v2, %v2665_v1 }
 0x374   :  { %v3276_v4 = vpop.eup %3275 }
 0x375   :  { %v2666_v6 = vmul.f32 %v3276_v4, %v2652_v43  ;;  %v2681_v9 = vadd.f32 %v2956_v7, %v2673_v51 }
 0x377   :  { %v2674_v8 = vmul.f32 %v2955_v2, %v2666_v6 }
 0x379   :  { %v2682_v54 = vadd.f32 %v2956_v7, %v2674_v8 }
 0x37b   :  { %v2964_v10 = vpack.c.bf16 %v2682_v54, %v2681_v9 }
 0x37d   :  { %2965 = vst [vmem:[%s4204_s7] sm:$0xff] %v2964_v10  }

// kernel: forward.9
= control target key start
LH: loop header
LB: loop body
LE: loop exit
PB: predicated region body
PF: predicated region fallthrough
CT: control target
= control target key end

     0   :  { %12 = vsyncpa [#allocation3], 0  ;;  %s3535_s0 = inlined_call_operand.vmem [shape: bf16[16,128], index: 0, kind: input, shape index: {}]   ;;  %s3536_s1 = inlined_call_operand.hbm [shape: bf16[128,2048], index: 1, kind: input, shape index: {}]   ;;  %s3537_s2 = inlined_call_operand.vmem [shape: f32[1,2048], index: 2, kind: input, shape index: {}]   ;;  %s3538_s3 = inlined_call_operand.hbm [shape: bf16[2048,128], index: 3, kind: input, shape index: {}]   ;;  %s3539_s4 = inlined_call_operand.vmem [shape: f32[1,128], index: 4, kind: input, shape index: {}]   ;;  %s3540_s5 = inlined_call_operand.vmem [shape: f32[1,128], index: 5, kind: input, shape index: {}]   ;;  %s3541_s6 = inlined_call_operand.vmem [shape: f32[1,128], index: 6, kind: input, shape index: {}]   ;;  %s3542_s7 = inlined_call_operand.vmem [shape: bf16[16,128], index: 7, kind: output, shape index: {}]  }
   0x1   :  { %13 = vsyncpa [#allocation5], 0  ;;  %s3361_s24 = smov [#allocation2]   ;;  %s3313_s28 = scalar_lea.hbm %s3536_s1, 16384 }
   0x2   :  { %s21_s25 = sshll.u32 %s3361_s24, 4  ;;  %p3314_p0 = scmp.ne.s32.totalorder %s3536_s1, %s3313_s28  ;;  %s22_s25 = int_to_ptr.vmem [resolvable:$true] %s21_s25 }
   0x3   :  { %p3317_p1 = scmp.lt.u32.totalorder %s3313_s28, %s3536_s1 }
   0x5   :  { %p3319_p2 = pnand %p3317_p1, %p3314_p0 }
   0x7   :  { %3322 = shalt.err (!%p3319_p2)
}
   0x8   :  { %s3323_s10 = scalar_lea.vmem %s22_s25, 16384  ;;  %p3328_p4 = scmp.lt.s32.totalorder %s22_s25, %s22_s25 }
   0x9   :  { %p3324_p3 = scmp.ne.s32.totalorder %s22_s25, %s3323_s10  ;;  %p3329_p5 = scmp.lt.s32.totalorder %s3323_s10, %s3323_s10 }
   0xb   :  { %p3330_p6 = por %p3329_p5, %p3328_p4 }
   0xd   :  { %p3331_p7 = pnand %p3330_p6, %p3324_p3 }
   0xf   :  { %3334 = shalt.err (!%p3331_p7)
}
  0x10   :  { %s3362_s11 = smov 1024   ;;  %s3363_s12 = smov 64  }
  0x11   :  { %27 = dma.hbm_to_vmem [thread:$0]  %s3536_s1, 16384, %s22_s25, [#allocation3], %s3362_s11, %s3362_s11, %s3363_s12  }
  0x12   :  { %s3364_s15 = smov [#allocation4]   ;;  %s3335_s19 = scalar_lea.hbm %s3538_s3, 16384 }
  0x13   :  { %s35_s16 = sshll.u32 %s3364_s15, 4  ;;  %p3336_p8 = scmp.ne.s32.totalorder %s3538_s3, %s3335_s19  ;;  %s36_s16 = int_to_ptr.vmem [resolvable:$true] %s35_s16 }
  0x14   :  { %p3339_p9 = scmp.lt.u32.totalorder %s3335_s19, %s3538_s3 }
  0x16   :  { %p3341_p10 = pnand %p3339_p9, %p3336_p8 }
  0x18   :  { %3344 = shalt.err (!%p3341_p10)
}
  0x19   :  { %s3345_s24 = scalar_lea.vmem %s36_s16, 16384  ;;  %p3350_p12 = scmp.lt.s32.totalorder %s36_s16, %s36_s16 }
  0x1a   :  { %p3346_p11 = scmp.ne.s32.totalorder %s36_s16, %s3345_s24  ;;  %p3351_p13 = scmp.lt.s32.totalorder %s3345_s24, %s3345_s24 }
  0x1c   :  { %p3352_p0 = por %p3351_p13, %p3350_p12 }
  0x1e   :  { %p3353_p1 = pnand %p3352_p0, %p3346_p11 }
  0x20   :  { %3356 = shalt.err (!%p3353_p1)
}
  0x21   :  { %s3365_s1 = smov 4  }
  0x22   :  { %41 = dma.hbm_to_vmem [thread:$0]  %s3538_s3, 16384, %s36_s16, [#allocation5], %s3363_s12, %s3363_s12, %s3365_s1  }
  0x23   :  { %3357 = dma.done.wait [#allocation3], 16384  }
  0x24   :  { %3358 = vsyncadd [#allocation3], 4294950912 }
  0x25   :  { %3359 = dma.done.wait [#allocation5], 16384  }
  0x26   :  { %3360 = vsyncadd [#allocation5], 4294950912  ;;  %v3366_v0 = vmov 0   ;;  %v57_v1 = vld [vmem:[#allocation2] sm:$0xff]  ;;  %v58_v3 = vld [vmem:[#allocation2 + $0x8] sm:$0xff] }
  0x27   :  { %947 = vmatprep.mubr.bf16.mxu0 %v3366_v0  ;;  %990 = vmatprep.mubr.bf16.mxu1 %v3366_v0  ;;  %v65_v2 = vld [vmem:[#allocation2 + $0x40] sm:$0xff]  ;;  %v66_v5 = vld [vmem:[#allocation2 + $0x48] sm:$0xff]  ;;  %v59_v63 = vld [vmem:[#allocation2 + $0x10] sm:$0xff] }
  0x28   :  { %v2729_v4 = vcombine.high %v57_v1, %v65_v2  ;;  %v2728_v6 = vcombine.low %v57_v1, %v65_v2  ;;  %v73_v7 = vld [vmem:[#allocation2 + $0x80] sm:$0xff]  ;;  %v2731_v9 = vcombine.high %v58_v3, %v66_v5  ;;  %v2730_v10 = vcombine.low %v58_v3, %v66_v5  ;;  %v74_v12 = vld [vmem:[#allocation2 + $0x88] sm:$0xff]  ;;  %v67_v1 = vld [vmem:[#allocation2 + $0x50] sm:$0xff] }
  0x29   :  { %v81_v8 = vld [vmem:[#allocation2 + $0xc0] sm:$0xff]  ;;  %v82_v13 = vld [vmem:[#allocation2 + $0xc8] sm:$0xff]  ;;  %v60_v2 = vld [vmem:[#allocation2 + $0x18] sm:$0xff] }
  0x2a   :  { %v2745_v11 = vcombine.high %v73_v7, %v81_v8  ;;  %v89_v14 = vld [vmem:[#allocation2 + $0x100] sm:$0xff]  ;;  %915 = vmatprep.subr.bf16.mxu0 %v2729_v4  ;;  %v2747_v15 = vcombine.high %v74_v12, %v82_v13  ;;  %v90_v17 = vld [vmem:[#allocation2 + $0x108] sm:$0xff]  ;;  %958 = vmatprep.subr.bf16.mxu1 %v2731_v9  ;;  %v2744_v19 = vcombine.low %v73_v7, %v81_v8  ;;  %v68_v3 = vld [vmem:[#allocation2 + $0x58] sm:$0xff] }
  0x2b   :  { %v97_v16 = vld [vmem:[#allocation2 + $0x140] sm:$0xff]  ;;  %v98_v18 = vld [vmem:[#allocation2 + $0x148] sm:$0xff]  ;;  %916 = vmatpush1.bf16.msra.mxu0 %v2728_v6  ;;  %959 = vmatpush1.bf16.msra.mxu1 %v2730_v10  ;;  %v2746_v20 = vcombine.low %v74_v12, %v82_v13  ;;  %v2733_v7 = vcombine.high %v59_v63, %v67_v1  ;;  %v2735_v8 = vcombine.high %v60_v2, %v68_v3  ;;  %v75_v9 = vld [vmem:[#allocation2 + $0x90] sm:$0xff] }
  0x2c   :  { %917 = vmatprep.subr.bf16.mxu0 %v2745_v11  ;;  %v2761_v21 = vcombine.high %v89_v14, %v97_v16  ;;  %960 = vmatprep.subr.bf16.mxu1 %v2747_v15  ;;  %v2763_v22 = vcombine.high %v90_v17, %v98_v18  ;;  %v105_v23 = vld [vmem:[#allocation2 + $0x180] sm:$0xff]  ;;  %v106_v25 = vld [vmem:[#allocation2 + $0x188] sm:$0xff]  ;;  %v2760_v27 = vcombine.low %v89_v14, %v97_v16  ;;  %v83_v10 = vld [vmem:[#allocation2 + $0xd0] sm:$0xff] }
  0x2d   :  { %v113_v24 = vld [vmem:[#allocation2 + $0x1c0] sm:$0xff]  ;;  %v114_v26 = vld [vmem:[#allocation2 + $0x1c8] sm:$0xff]  ;;  %v2762_v28 = vcombine.low %v90_v17, %v98_v18  ;;  %v76_v11 = vld [vmem:[#allocation2 + $0x98] sm:$0xff]  ;;  %v2732_v13 = vcombine.low %v59_v63, %v67_v1  ;;  %v2734_v14 = vcombine.low %v60_v2, %v68_v3  ;;  %v2749_v15 = vcombine.high %v75_v9, %v83_v10 }
  0x2e   :  { %v2777_v29 = vcombine.high %v105_v23, %v113_v24  ;;  %v2779_v30 = vcombine.high %v106_v25, %v114_v26  ;;  %v121_v31 = vld [vmem:[#allocation2 + $0x200] sm:$0xff]  ;;  %v122_v33 = vld [vmem:[#allocation2 + $0x208] sm:$0xff]  ;;  %v2776_v35 = vcombine.low %v105_v23, %v113_v24  ;;  %v2778_v36 = vcombine.low %v106_v25, %v114_v26  ;;  %v84_v12 = vld [vmem:[#allocation2 + $0xd8] sm:$0xff] }
  0x2f   :  { %918 = vmatpush1.bf16.msra.mxu0 %v2744_v19  ;;  %961 = vmatpush1.bf16.msra.mxu1 %v2746_v20  ;;  %v129_v32 = vld [vmem:[#allocation2 + $0x240] sm:$0xff]  ;;  %v130_v34 = vld [vmem:[#allocation2 + $0x248] sm:$0xff]  ;;  %v2751_v16 = vcombine.high %v76_v11, %v84_v12  ;;  %v91_v17 = vld [vmem:[#allocation2 + $0x110] sm:$0xff] }
  0x30   :  { %919 = vmatprep.subr.bf16.mxu0 %v2761_v21  ;;  %962 = vmatprep.subr.bf16.mxu1 %v2763_v22  ;;  %v2793_v37 = vcombine.high %v121_v31, %v129_v32  ;;  %v2795_v38 = vcombine.high %v122_v33, %v130_v34  ;;  %v137_v39 = vld [vmem:[#allocation2 + $0x280] sm:$0xff]  ;;  %v138_v41 = vld [vmem:[#allocation2 + $0x288] sm:$0xff]  ;;  %v2792_v43 = vcombine.low %v121_v31, %v129_v32  ;;  %v99_v18 = vld [vmem:[#allocation2 + $0x150] sm:$0xff] }
  0x31   :  { %v145_v40 = vld [vmem:[#allocation2 + $0x2c0] sm:$0xff]  ;;  %v146_v42 = vld [vmem:[#allocation2 + $0x2c8] sm:$0xff]  ;;  %v2794_v44 = vcombine.low %v122_v33, %v130_v34  ;;  %v92_v19 = vld [vmem:[#allocation2 + $0x118] sm:$0xff]  ;;  %v2748_v21 = vcombine.low %v75_v9, %v83_v10  ;;  %v2750_v22 = vcombine.low %v76_v11, %v84_v12  ;;  %v2765_v23 = vcombine.high %v91_v17, %v99_v18 }
  0x32   :  { %v2809_v45 = vcombine.high %v137_v39, %v145_v40  ;;  %v2811_v46 = vcombine.high %v138_v41, %v146_v42  ;;  %v153_v47 = vld [vmem:[#allocation2 + $0x300] sm:$0xff]  ;;  %v154_v49 = vld [vmem:[#allocation2 + $0x308] sm:$0xff]  ;;  %v2808_v51 = vcombine.low %v137_v39, %v145_v40  ;;  %v2810_v52 = vcombine.low %v138_v41, %v146_v42  ;;  %v100_v20 = vld [vmem:[#allocation2 + $0x158] sm:$0xff] }
  0x33   :  { %920 = vmatpush1.bf16.msra.mxu0 %v2760_v27  ;;  %963 = vmatpush1.bf16.msra.mxu1 %v2762_v28  ;;  %v161_v48 = vld [vmem:[#allocation2 + $0x340] sm:$0xff]  ;;  %v162_v50 = vld [vmem:[#allocation2 + $0x348] sm:$0xff]  ;;  %v2767_v24 = vcombine.high %v92_v19, %v100_v20  ;;  %v107_v25 = vld [vmem:[#allocation2 + $0x190] sm:$0xff] }
  0x34   :  { %921 = vmatprep.subr.bf16.mxu0 %v2777_v29  ;;  %964 = vmatprep.subr.bf16.mxu1 %v2779_v30  ;;  %v2825_v53 = vcombine.high %v153_v47, %v161_v48  ;;  %v2827_v54 = vcombine.high %v154_v49, %v162_v50  ;;  %v169_v55 = vld [vmem:[#allocation2 + $0x380] sm:$0xff]  ;;  %v170_v57 = vld [vmem:[#allocation2 + $0x388] sm:$0xff]  ;;  %v2824_v59 = vcombine.low %v153_v47, %v161_v48  ;;  %v115_v26 = vld [vmem:[#allocation2 + $0x1d0] sm:$0xff] }
  0x35   :  { %v177_v56 = vld [vmem:[#allocation2 + $0x3c0] sm:$0xff]  ;;  %v178_v58 = vld [vmem:[#allocation2 + $0x3c8] sm:$0xff]  ;;  %v2826_v60 = vcombine.low %v154_v49, %v162_v50  ;;  %v108_v27 = vld [vmem:[#allocation2 + $0x198] sm:$0xff]  ;;  %v2764_v29 = vcombine.low %v91_v17, %v99_v18  ;;  %v2766_v30 = vcombine.low %v92_v19, %v100_v20  ;;  %v2781_v31 = vcombine.high %v107_v25, %v115_v26 }
  0x36   :  { %v2841_v61 = vcombine.high %v169_v55, %v177_v56  ;;  %v2843_v62 = vcombine.high %v170_v57, %v178_v58  ;;  %v2840_v4 = vcombine.low %v169_v55, %v177_v56  ;;  %v3436_v5 = vld [vmem:[%s3535_s0] sm:$0xff]   ;;  %v2842_v6 = vcombine.low %v170_v57, %v178_v58  ;;  %v116_v28 = vld [vmem:[#allocation2 + $0x1d8] sm:$0xff]  ;;  %v123_v33 = vld [vmem:[#allocation2 + $0x210] sm:$0xff] }
  0x37   :  { %922 = vmatpush1.bf16.msra.mxu0 %v2776_v35  ;;  %965 = vmatpush1.bf16.msra.mxu1 %v2778_v36  ;;  %v2783_v32 = vcombine.high %v108_v27, %v116_v28  ;;  %v131_v34 = vld [vmem:[#allocation2 + $0x250] sm:$0xff]  ;;  %v124_v35 = vld [vmem:[#allocation2 + $0x218] sm:$0xff]  ;;  %v2782_v39 = vcombine.low %v108_v27, %v116_v28  ;;  %v69_v2 = vld [vmem:[#allocation2 + $0x60] sm:$0xff] }
  0x38   :  { %923 = vmatprep.subr.bf16.mxu0 %v2793_v37  ;;  %966 = vmatprep.subr.bf16.mxu1 %v2795_v38  ;;  %v132_v36 = vld [vmem:[#allocation2 + $0x258] sm:$0xff]  ;;  %v2780_v37 = vcombine.low %v107_v25, %v115_v26  ;;  %v139_v38 = vld [vmem:[#allocation2 + $0x290] sm:$0xff]  ;;  %v2797_v40 = vcombine.high %v123_v33, %v131_v34  ;;  %v85_v11 = vld [vmem:[#allocation2 + $0xe0] sm:$0xff] }
  0x39   :  { %v147_v41 = vld [vmem:[#allocation2 + $0x2d0] sm:$0xff]  ;;  %v2799_v42 = vcombine.high %v124_v35, %v132_v36  ;;  %v2798_v47 = vcombine.low %v124_v35, %v132_v36  ;;  %v101_v17 = vld [vmem:[#allocation2 + $0x160] sm:$0xff]  ;;  %v94_v20 = vld [vmem:[#allocation2 + $0x128] sm:$0xff] }
  0x3a   :  { %v2813_v48 = vcombine.high %v139_v38, %v147_v41  ;;  %v163_v49 = vld [vmem:[#allocation2 + $0x350] sm:$0xff]  ;;  %v117_v25 = vld [vmem:[#allocation2 + $0x1e0] sm:$0xff]  ;;  %v110_v28 = vld [vmem:[#allocation2 + $0x1a8] sm:$0xff] }
  0x3b   :  { %924 = vmatpush1.bf16.msra.mxu0 %v2792_v43  ;;  %967 = vmatpush1.bf16.msra.mxu1 %v2794_v44  ;;  %v140_v43 = vld [vmem:[#allocation2 + $0x298] sm:$0xff]  ;;  %v179_v57 = vld [vmem:[#allocation2 + $0x3d0] sm:$0xff]  ;;  %v126_v36 = vld [vmem:[#allocation2 + $0x228] sm:$0xff] }
  0x3c   :  { %925 = vmatprep.subr.bf16.mxu0 %v2809_v45  ;;  %968 = vmatprep.subr.bf16.mxu1 %v2811_v46  ;;  %v148_v44 = vld [vmem:[#allocation2 + $0x2d8] sm:$0xff]  ;;  %v2796_v45 = vcombine.low %v123_v33, %v131_v34  ;;  %v155_v46 = vld [vmem:[#allocation2 + $0x310] sm:$0xff]  ;;  %v133_v33 = vld [vmem:[#allocation2 + $0x260] sm:$0xff] }
  0x3d   :  { %v2815_v50 = vcombine.high %v140_v43, %v148_v44  ;;  %v2814_v55 = vcombine.low %v140_v43, %v148_v44  ;;  %v2829_v56 = vcombine.high %v155_v46, %v163_v49  ;;  %v142_v44 = vld [vmem:[#allocation2 + $0x2a8] sm:$0xff] }
  0x3f   :  { %926 = vmatpush1.bf16.msra.mxu0 %v2808_v51  ;;  %969 = vmatpush1.bf16.msra.mxu1 %v2810_v52  ;;  %v156_v51 = vld [vmem:[#allocation2 + $0x318] sm:$0xff] }
  0x40   :  { %927 = vmatprep.subr.bf16.mxu0 %v2825_v53  ;;  %970 = vmatprep.subr.bf16.mxu1 %v2827_v54  ;;  %v164_v52 = vld [vmem:[#allocation2 + $0x358] sm:$0xff]  ;;  %v2812_v53 = vcombine.low %v139_v38, %v147_v41  ;;  %v171_v54 = vld [vmem:[#allocation2 + $0x390] sm:$0xff]  ;;  %v149_v41 = vld [vmem:[#allocation2 + $0x2e0] sm:$0xff] }
  0x41   :  { %v2831_v58 = vcombine.high %v156_v51, %v164_v52  ;;  %v2830_v63 = vcombine.low %v156_v51, %v164_v52  ;;  %v2845_v1 = vcombine.high %v171_v54, %v179_v57  ;;  %v158_v52 = vld [vmem:[#allocation2 + $0x328] sm:$0xff] }
  0x43   :  { %928 = vmatpush1.bf16.msra.mxu0 %v2824_v59  ;;  %971 = vmatpush1.bf16.msra.mxu1 %v2826_v60  ;;  %v172_v59 = vld [vmem:[#allocation2 + $0x398] sm:$0xff] }
  0x44   :  { %929 = vmatprep.subr.bf16.mxu0 %v2841_v61  ;;  %972 = vmatprep.subr.bf16.mxu1 %v2843_v62  ;;  %v180_v60 = vld [vmem:[#allocation2 + $0x3d8] sm:$0xff]  ;;  %v2828_v61 = vcombine.low %v155_v46, %v163_v49  ;;  %v61_v62 = vld [vmem:[#allocation2 + $0x20] sm:$0xff] }
  0x45   :  { %v2847_v3 = vcombine.high %v172_v59, %v180_v60  ;;  %v2846_v9 = vcombine.low %v172_v59, %v180_v60  ;;  %v2737_v10 = vcombine.high %v61_v62, %v69_v2  ;;  %v165_v49 = vld [vmem:[#allocation2 + $0x360] sm:$0xff]  ;;  %v174_v60 = vld [vmem:[#allocation2 + $0x3a8] sm:$0xff] }
  0x47   :  { %930 = vmatpush1.bf16.msra.mxu0 %v2840_v4  ;;  %973 = vmatpush1.bf16.msra.mxu1 %v2842_v6  ;;  %v62_v4 = vld [vmem:[#allocation2 + $0x28] sm:$0xff] }
  0x48   :  { %1001 = vmatprep.subr.bf16.mxu0 %v2733_v7  ;;  %1044 = vmatprep.subr.bf16.mxu1 %v2735_v8  ;;  %v70_v6 = vld [vmem:[#allocation2 + $0x68] sm:$0xff]  ;;  %v2844_v7 = vcombine.low %v171_v54, %v179_v57  ;;  %v77_v8 = vld [vmem:[#allocation2 + $0xa0] sm:$0xff] }
  0x49   :  { %v2739_v12 = vcombine.high %v62_v4, %v70_v6  ;;  %v2738_v18 = vcombine.low %v62_v4, %v70_v6  ;;  %v2753_v19 = vcombine.high %v77_v8, %v85_v11  ;;  %v181_v57 = vld [vmem:[#allocation2 + $0x3e0] sm:$0xff]  ;;  %v64_v6 = vld [vmem:[#allocation2 + $0x38] sm:$0xff] }
  0x4a   :  { %948 = vmatmul.mubr.bf16.vlgmr.msra.gmra.mrb[0].mxu0 %v3436_v5  ;;  %991 = vmatmul.mubr.bf16.vlgmr.msra.gmra.mrb[0].mxu1 %v3436_v5 }
  0x4b   :  { %1002 = vmatpush1.bf16.msra.mxu0 %v2732_v13  ;;  %1045 = vmatpush1.bf16.msra.mxu1 %v2734_v14  ;;  %v78_v13 = vld [vmem:[#allocation2 + $0xa8] sm:$0xff] }
  0x4c   :  { %1003 = vmatprep.subr.bf16.mxu0 %v2749_v15  ;;  %1046 = vmatprep.subr.bf16.mxu1 %v2751_v16  ;;  %v86_v14 = vld [vmem:[#allocation2 + $0xe8] sm:$0xff]  ;;  %v2736_v15 = vcombine.low %v61_v62, %v69_v2  ;;  %v93_v16 = vld [vmem:[#allocation2 + $0x120] sm:$0xff]  ;;  %v71_v2 = vld [vmem:[#allocation2 + $0x70] sm:$0xff] }
  0x4d   :  { %1033 = vmatprep.mubr.bf16.mxu0 %v3366_v0  ;;  %1076 = vmatprep.mubr.bf16.mxu1 %v3366_v0  ;;  %v2754_v26 = vcombine.low %v78_v13, %v86_v14  ;;  %v2769_v27 = vcombine.high %v93_v16, %v101_v17 }
  0x4f   :  { %1004 = vmatpush1.bf16.msra.mxu0 %v2748_v21  ;;  %1047 = vmatpush1.bf16.msra.mxu1 %v2750_v22  ;;  %v102_v21 = vld [vmem:[#allocation2 + $0x168] sm:$0xff]  ;;  %v2755_v22 = vcombine.high %v78_v13, %v86_v14  ;;  %v80_v14 = vld [vmem:[#allocation2 + $0xb8] sm:$0xff] }
  0x50   :  { %1005 = vmatprep.subr.bf16.mxu0 %v2765_v23  ;;  %1048 = vmatprep.subr.bf16.mxu1 %v2767_v24  ;;  %v2752_v23 = vcombine.low %v77_v8, %v85_v11  ;;  %v109_v24 = vld [vmem:[#allocation2 + $0x1a0] sm:$0xff]  ;;  %v2770_v34 = vcombine.low %v94_v20, %v102_v21  ;;  %v87_v11 = vld [vmem:[#allocation2 + $0xf0] sm:$0xff] }
  0x51   :  { %v2785_v35 = vcombine.high %v109_v24, %v117_v25 }
  0x53   :  { %1006 = vmatpush1.bf16.msra.mxu0 %v2764_v29  ;;  %1049 = vmatpush1.bf16.msra.mxu1 %v2766_v30  ;;  %v118_v29 = vld [vmem:[#allocation2 + $0x1e8] sm:$0xff]  ;;  %v2771_v30 = vcombine.high %v94_v20, %v102_v21 }
  0x54   :  { %1007 = vmatprep.subr.bf16.mxu0 %v2781_v31  ;;  %1050 = vmatprep.subr.bf16.mxu1 %v2783_v32  ;;  %v2768_v31 = vcombine.low %v93_v16, %v101_v17  ;;  %v125_v32 = vld [vmem:[#allocation2 + $0x220] sm:$0xff]  ;;  %v2787_v38 = vcombine.high %v110_v28, %v118_v29 }
  0x55   :  { %v2801_v43 = vcombine.high %v125_v32, %v133_v33 }
  0x57   :  { %1008 = vmatpush1.bf16.msra.mxu0 %v2780_v37  ;;  %1051 = vmatpush1.bf16.msra.mxu1 %v2782_v39  ;;  %v134_v37 = vld [vmem:[#allocation2 + $0x268] sm:$0xff]  ;;  %v2784_v39 = vcombine.low %v109_v24, %v117_v25 }
  0x58   :  { %1009 = vmatprep.subr.bf16.mxu0 %v2797_v40  ;;  %1052 = vmatprep.subr.bf16.mxu1 %v2799_v42  ;;  %v141_v40 = vld [vmem:[#allocation2 + $0x2a0] sm:$0xff]  ;;  %v2786_v42 = vcombine.low %v110_v28, %v118_v29  ;;  %v2803_v46 = vcombine.high %v126_v36, %v134_v37 }
  0x59   :  { %v2817_v51 = vcombine.high %v141_v40, %v149_v41 }
  0x5b   :  { %1010 = vmatpush1.bf16.msra.mxu0 %v2796_v45  ;;  %1053 = vmatpush1.bf16.msra.mxu1 %v2798_v47  ;;  %v150_v45 = vld [vmem:[#allocation2 + $0x2e8] sm:$0xff]  ;;  %v2800_v47 = vcombine.low %v125_v32, %v133_v33 }
  0x5c   :  { %1011 = vmatprep.subr.bf16.mxu0 %v2813_v48  ;;  %1054 = vmatprep.subr.bf16.mxu1 %v2815_v50  ;;  %v157_v48 = vld [vmem:[#allocation2 + $0x320] sm:$0xff]  ;;  %v2802_v50 = vcombine.low %v126_v36, %v134_v37  ;;  %v2819_v54 = vcombine.high %v142_v44, %v150_v45 }
  0x5d   :  { %v2833_v59 = vcombine.high %v157_v48, %v165_v49 }
  0x5f   :  { %1012 = vmatpush1.bf16.msra.mxu0 %v2812_v53  ;;  %1055 = vmatpush1.bf16.msra.mxu1 %v2814_v55  ;;  %v166_v53 = vld [vmem:[#allocation2 + $0x368] sm:$0xff]  ;;  %v2816_v55 = vcombine.low %v141_v40, %v149_v41 }
  0x60   :  { %1013 = vmatprep.subr.bf16.mxu0 %v2829_v56  ;;  %1056 = vmatprep.subr.bf16.mxu1 %v2831_v58  ;;  %v173_v56 = vld [vmem:[#allocation2 + $0x3a0] sm:$0xff]  ;;  %v2818_v58 = vcombine.low %v142_v44, %v150_v45  ;;  %v2835_v62 = vcombine.high %v158_v52, %v166_v53  ;;  %v144_v45 = vld [vmem:[#allocation2 + $0x2b8] sm:$0xff] }
  0x61   :  { %v2849_v4 = vcombine.high %v173_v56, %v181_v57 }
  0x63   :  { %1014 = vmatpush1.bf16.msra.mxu0 %v2828_v61  ;;  %1057 = vmatpush1.bf16.msra.mxu1 %v2830_v63  ;;  %v182_v61 = vld [vmem:[#allocation2 + $0x3e8] sm:$0xff]  ;;  %v2832_v63 = vcombine.low %v157_v48, %v165_v49  ;;  %v159_v49 = vld [vmem:[#allocation2 + $0x330] sm:$0xff] }
  0x64   :  { %1015 = vmatprep.subr.bf16.mxu0 %v2845_v1  ;;  %1058 = vmatprep.subr.bf16.mxu1 %v2847_v3  ;;  %v63_v1 = vld [vmem:[#allocation2 + $0x30] sm:$0xff]  ;;  %v2834_v3 = vcombine.low %v158_v52, %v166_v53  ;;  %v2851_v8 = vcombine.high %v174_v60, %v182_v61  ;;  %v160_v53 = vld [vmem:[#allocation2 + $0x338] sm:$0xff] }
  0x65   :  { %v2741_v13 = vcombine.high %v63_v1, %v71_v2  ;;  %v2740_v17 = vcombine.low %v63_v1, %v71_v2 }
  0x67   :  { %1016 = vmatpush1.bf16.msra.mxu0 %v2844_v7  ;;  %1059 = vmatpush1.bf16.msra.mxu1 %v2846_v9  ;;  %v72_v7 = vld [vmem:[#allocation2 + $0x78] sm:$0xff]  ;;  %v2848_v9 = vcombine.low %v173_v56, %v181_v57  ;;  %v175_v57 = vld [vmem:[#allocation2 + $0x3b0] sm:$0xff] }
  0x68   :  { %1087 = vmatprep.subr.bf16.mxu0 %v2737_v10  ;;  %1130 = vmatprep.subr.bf16.mxu1 %v2739_v12  ;;  %v79_v10 = vld [vmem:[#allocation2 + $0xb0] sm:$0xff]  ;;  %v2850_v12 = vcombine.low %v174_v60, %v182_v61  ;;  %v2743_v16 = vcombine.high %v64_v6, %v72_v7  ;;  %v2742_v20 = vcombine.low %v64_v6, %v72_v7  ;;  %v176_v61 = vld [vmem:[#allocation2 + $0x3b8] sm:$0xff] }
  0x69   :  { %v2757_v21 = vcombine.high %v79_v10, %v87_v11  ;;  %v2756_v25 = vcombine.low %v79_v10, %v87_v11  ;;  %v183_v60 = vld [vmem:[#allocation2 + $0x3f0] sm:$0xff]  ;;  %v3181_v10 = vld [vmem:[#allocation4] sm:$0xff]  }
  0x6a   :  { %1034 = vmatmul.mubr.bf16.vlgmr.msra.gmra.mrb[4].mxu0 %v3436_v5  ;;  %1077 = vmatmul.mubr.bf16.vlgmr.msra.gmra.mrb[4].mxu1 %v3436_v5  ;;  %v2852_v6 = vcombine.low %v175_v57, %v183_v60  ;;  %v3182_v11 = vld [vmem:[#allocation4 + $0x80] sm:$0xff]  }
  0x6b   :  { %1088 = vmatpush1.bf16.msra.mxu0 %v2736_v15  ;;  %1131 = vmatpush1.bf16.msra.mxu1 %v2738_v18  ;;  %v88_v15 = vld [vmem:[#allocation2 + $0xf8] sm:$0xff]  ;;  %v95_v18 = vld [vmem:[#allocation2 + $0x130] sm:$0xff] }
  0x6c   :  { %1089 = vmatprep.subr.bf16.mxu0 %v2753_v19  ;;  %1132 = vmatprep.subr.bf16.mxu1 %v2755_v22  ;;  %v103_v19 = vld [vmem:[#allocation2 + $0x170] sm:$0xff]  ;;  %v96_v22 = vld [vmem:[#allocation2 + $0x138] sm:$0xff]  ;;  %v2759_v24 = vcombine.high %v80_v14, %v88_v15  ;;  %v2758_v28 = vcombine.low %v80_v14, %v88_v15  ;;  %v3185_v14 = vld [vmem:[#allocation4 + $0x8] sm:$0xff]  }
  0x6d   :  { %1119 = vmatprep.mubr.bf16.mxu0 %v3366_v0  ;;  %1162 = vmatprep.mubr.bf16.mxu1 %v3366_v0  ;;  %v2773_v29 = vcombine.high %v95_v18, %v103_v19  ;;  %v2772_v33 = vcombine.low %v95_v18, %v103_v19  ;;  %v3186_v15 = vld [vmem:[#allocation4 + $0x88] sm:$0xff]   ;;  %v3189_v18 = vld [vmem:[#allocation4 + $0x10] sm:$0xff]  }
  0x6e   :  { %v3190_v19 = vld [vmem:[#allocation4 + $0x90] sm:$0xff]  }
  0x6f   :  { %1090 = vmatpush1.bf16.msra.mxu0 %v2752_v23  ;;  %1133 = vmatpush1.bf16.msra.mxu1 %v2754_v26  ;;  %v104_v23 = vld [vmem:[#allocation2 + $0x178] sm:$0xff]  ;;  %v111_v26 = vld [vmem:[#allocation2 + $0x1b0] sm:$0xff] }
  0x70   :  { %1091 = vmatprep.subr.bf16.mxu0 %v2769_v27  ;;  %1134 = vmatprep.subr.bf16.mxu1 %v2771_v30  ;;  %v119_v27 = vld [vmem:[#allocation2 + $0x1f0] sm:$0xff]  ;;  %v112_v30 = vld [vmem:[#allocation2 + $0x1b8] sm:$0xff]  ;;  %v2775_v32 = vcombine.high %v96_v22, %v104_v23  ;;  %v2774_v36 = vcombine.low %v96_v22, %v104_v23 }
  0x71   :  { %v2789_v37 = vcombine.high %v111_v26, %v119_v27  ;;  %v2788_v41 = vcombine.low %v111_v26, %v119_v27  ;;  %v3193_v22 = vld [vmem:[#allocation4 + $0x18] sm:$0xff]   ;;  %v3198_v26 = vld [vmem:[#allocation4 + $0xa0] sm:$0xff]   ;;  %v3199_v27 = vld [vmem:[#allocation4 + $0x68] sm:$0xff]  }
  0x72   :  { %v3194_v23 = vld [vmem:[#allocation4 + $0x98] sm:$0xff]  }
  0x73   :  { %1092 = vmatpush1.bf16.msra.mxu0 %v2768_v31  ;;  %1135 = vmatpush1.bf16.msra.mxu1 %v2770_v34  ;;  %v120_v31 = vld [vmem:[#allocation2 + $0x1f8] sm:$0xff]  ;;  %v127_v34 = vld [vmem:[#allocation2 + $0x230] sm:$0xff] }
  0x74   :  { %1093 = vmatprep.subr.bf16.mxu0 %v2785_v35  ;;  %1136 = vmatprep.subr.bf16.mxu1 %v2787_v38  ;;  %v135_v35 = vld [vmem:[#allocation2 + $0x270] sm:$0xff]  ;;  %v128_v38 = vld [vmem:[#allocation2 + $0x238] sm:$0xff]  ;;  %v2791_v40 = vcombine.high %v112_v30, %v120_v31  ;;  %v2790_v44 = vcombine.low %v112_v30, %v120_v31  ;;  %v3202_v30 = vld [vmem:[#allocation4 + $0xa8] sm:$0xff]  }
  0x75   :  { %v2804_v48 = vcombine.low %v127_v34, %v135_v35  ;;  %v3203_v31 = vld [vmem:[#allocation4 + $0x70] sm:$0xff]  }
  0x77   :  { %1094 = vmatpush1.bf16.msra.mxu0 %v2784_v39  ;;  %1137 = vmatpush1.bf16.msra.mxu1 %v2786_v42  ;;  %v136_v39 = vld [vmem:[#allocation2 + $0x278] sm:$0xff]  ;;  %v143_v42 = vld [vmem:[#allocation2 + $0x2b0] sm:$0xff] }
  0x78   :  { %1095 = vmatprep.subr.bf16.mxu0 %v2801_v43  ;;  %1138 = vmatprep.subr.bf16.mxu1 %v2803_v46  ;;  %v151_v43 = vld [vmem:[#allocation2 + $0x2f0] sm:$0xff]  ;;  %v152_v46 = vld [vmem:[#allocation2 + $0x2f8] sm:$0xff] }
  0x79   :  { %v2821_v52 = vcombine.high %v143_v42, %v151_v43  ;;  %v2820_v56 = vcombine.low %v143_v42, %v151_v43 }
  0x7b   :  { %1096 = vmatpush1.bf16.msra.mxu0 %v2800_v47  ;;  %1139 = vmatpush1.bf16.msra.mxu1 %v2802_v50  ;;  %v2807_v47 = vcombine.high %v128_v38, %v136_v39  ;;  %v167_v50 = vld [vmem:[#allocation2 + $0x370] sm:$0xff] }
  0x7c   :  { %1097 = vmatprep.subr.bf16.mxu0 %v2817_v51  ;;  %1140 = vmatprep.subr.bf16.mxu1 %v2819_v54  ;;  %v2806_v51 = vcombine.low %v128_v38, %v136_v39  ;;  %v168_v54 = vld [vmem:[#allocation2 + $0x378] sm:$0xff]  ;;  %v2836_v1 = vcombine.low %v159_v49, %v167_v50  ;;  %v3211_v39 = vld [vmem:[#allocation4 + $0x140] sm:$0xff]  }
  0x7d   :  { %v2838_v2 = vcombine.low %v160_v53, %v168_v54  ;;  %v3210_v38 = vld [vmem:[#allocation4 + $0xb8] sm:$0xff]  }
  0x7f   :  { %1098 = vmatpush1.bf16.msra.mxu0 %v2816_v55  ;;  %1141 = vmatpush1.bf16.msra.mxu1 %v2818_v58  ;;  %v2823_v55 = vcombine.high %v144_v45, %v152_v46  ;;  %v2822_v58 = vcombine.low %v144_v45, %v152_v46 }
  0x80   :  { %1099 = vmatprep.subr.bf16.mxu0 %v2833_v59  ;;  %1142 = vmatprep.subr.bf16.mxu1 %v2835_v62  ;;  %v2837_v59 = vcombine.high %v159_v49, %v167_v50  ;;  %v2839_v62 = vcombine.high %v160_v53, %v168_v54 }
  0x83   :  { %1100 = vmatpush1.bf16.msra.mxu0 %v2832_v63  ;;  %1143 = vmatpush1.bf16.msra.mxu1 %v2834_v3  ;;  %v184_v63 = vld [vmem:[#allocation2 + $0x3f8] sm:$0xff]  ;;  %v2853_v3 = vcombine.high %v175_v57, %v183_v60 }
  0x84   :  { %1101 = vmatprep.subr.bf16.mxu0 %v2849_v4  ;;  %1144 = vmatprep.subr.bf16.mxu1 %v2851_v8  ;;  %v2855_v4 = vcombine.high %v176_v61, %v184_v63  ;;  %v2854_v7 = vcombine.low %v176_v61, %v184_v63  ;;  %v3179_v8 = vld [vmem:[#allocation4 + $0x40] sm:$0xff]  }
  0x87   :  { %1102 = vmatpush1.bf16.msra.mxu0 %v2848_v9  ;;  %1145 = vmatpush1.bf16.msra.mxu1 %v2850_v12  ;;  %v3180_v9 = vld [vmem:[#allocation4 + $0xc0] sm:$0xff]   ;;  %v3183_v12 = vld [vmem:[#allocation4 + $0x48] sm:$0xff]  }
  0x88   :  { %1173 = vmatprep.subr.bf16.mxu0 %v2741_v13  ;;  %1216 = vmatprep.subr.bf16.mxu1 %v2743_v16  ;;  %v3184_v13 = vld [vmem:[#allocation4 + $0xc8] sm:$0xff]   ;;  %v3187_v16 = vld [vmem:[#allocation4 + $0x50] sm:$0xff]  }
  0x8a   :  { %1120 = vmatmul.mubr.bf16.vlgmr.msra.gmra.mrb[8].mxu0 %v3436_v5  ;;  %1163 = vmatmul.mubr.bf16.vlgmr.msra.gmra.mrb[8].mxu1 %v3436_v5 }
  0x8b   :  { %1174 = vmatpush1.bf16.msra.mxu0 %v2740_v17  ;;  %1217 = vmatpush1.bf16.msra.mxu1 %v2742_v20  ;;  %v3188_v17 = vld [vmem:[#allocation4 + $0xd0] sm:$0xff]   ;;  %v3191_v20 = vld [vmem:[#allocation4 + $0x58] sm:$0xff]  }
  0x8c   :  { %1175 = vmatprep.subr.bf16.mxu0 %v2757_v21  ;;  %1218 = vmatprep.subr.bf16.mxu1 %v2759_v24  ;;  %v3192_v21 = vld [vmem:[#allocation4 + $0xd8] sm:$0xff]   ;;  %v3195_v24 = vld [vmem:[#allocation4 + $0x60] sm:$0xff]  }
  0x8d   :  { %1205 = vmatprep.mubr.bf16.mxu0 %v3366_v0  ;;  %1248 = vmatprep.mubr.bf16.mxu1 %v3366_v0  ;;  %v2805_v0 = vcombine.high %v127_v34, %v135_v35  ;;  %v3206_v34 = vld [vmem:[#allocation4 + $0xb0] sm:$0xff]   ;;  %v3207_v35 = vld [vmem:[#allocation4 + $0x78] sm:$0xff]  }
  0x8f   :  { %1176 = vmatpush1.bf16.msra.mxu0 %v2756_v25  ;;  %1219 = vmatpush1.bf16.msra.mxu1 %v2758_v28  ;;  %v3197_v25 = vld [vmem:[#allocation4 + $0x20] sm:$0xff]   ;;  %v3200_v28 = vld [vmem:[#allocation4 + $0xe8] sm:$0xff]  }
  0x90   :  { %1177 = vmatprep.subr.bf16.mxu0 %v2773_v29  ;;  %1220 = vmatprep.subr.bf16.mxu1 %v2775_v32  ;;  %v3201_v29 = vld [vmem:[#allocation4 + $0x28] sm:$0xff]   ;;  %v3204_v32 = vld [vmem:[#allocation4 + $0xf0] sm:$0xff]  }
  0x93   :  { %1178 = vmatpush1.bf16.msra.mxu0 %v2772_v33  ;;  %1221 = vmatpush1.bf16.msra.mxu1 %v2774_v36  ;;  %v3205_v33 = vld [vmem:[#allocation4 + $0x30] sm:$0xff]   ;;  %v3208_v36 = vld [vmem:[#allocation4 + $0xf8] sm:$0xff]  }
  0x94   :  { %1179 = vmatprep.subr.bf16.mxu0 %v2789_v37  ;;  %1222 = vmatprep.subr.bf16.mxu1 %v2791_v40  ;;  %v3209_v37 = vld [vmem:[#allocation4 + $0x38] sm:$0xff]   ;;  %v3212_v40 = vld [vmem:[#allocation4 + $0x1c0] sm:$0xff]  }
  0x97   :  { %1180 = vmatpush1.bf16.msra.mxu0 %v2788_v41  ;;  %1223 = vmatpush1.bf16.msra.mxu1 %v2790_v44  ;;  %v189_v41 = vlaneseq  ;;  %v3458_v44 = vld [vmem:[%s3537_s2] sm:$0xff] }
  0x98   :  { %1181 = vmatprep.subr.bf16.mxu0 %v2805_v0  ;;  %1224 = vmatprep.subr.bf16.mxu1 %v2807_v47 }
  0x99   :  { %v3452_v42 = vshrl.u32 %v189_v41, 7 }
  0x9b   :  { %1182 = vmatpush1.bf16.msra.mxu0 %v2804_v48  ;;  %1225 = vmatpush1.bf16.msra.mxu1 %v2806_v51  ;;  %v191_v43 = vsub.s32 0, %v3452_v42  ;;  %v199_v0 = vsub.s32 2, %v3452_v42  ;;  %v195_v45 = vsub.s32 1, %v3452_v42  ;;  %v203_v46 = vsub.s32 3, %v3452_v42 }
  0x9c   :  { %1183 = vmatprep.subr.bf16.mxu0 %v2821_v52  ;;  %1226 = vmatprep.subr.bf16.mxu1 %v2823_v55 }
  0x9d   :  { %v192_v47 = vrot.slane %v3458_v44, %v191_v43  ;;  %v200_v48 = vrot.slane %v3458_v44, %v199_v0  ;;  %v196_v49 = vrot.slane %v3458_v44, %v195_v45  ;;  %v204_v50 = vrot.slane %v3458_v44, %v203_v46 }
  0x9f   :  { %1184 = vmatpush1.bf16.msra.mxu0 %v2820_v56  ;;  %1227 = vmatpush1.bf16.msra.mxu1 %v2822_v58 }
  0xa0   :  { %1185 = vmatprep.subr.bf16.mxu0 %v2837_v59  ;;  %1228 = vmatprep.subr.bf16.mxu1 %v2839_v62 }
  0xa3   :  { %1186 = vmatpush1.bf16.msra.mxu0 %v2836_v1  ;;  %1229 = vmatpush1.bf16.msra.mxu1 %v2838_v2 }
  0xa4   :  { %1187 = vmatprep.subr.bf16.mxu0 %v2853_v3  ;;  %1230 = vmatprep.subr.bf16.mxu1 %v2855_v4 }
  0xa7   :  { %1188 = vmatpush1.bf16.msra.mxu0 %v2852_v6  ;;  %1231 = vmatpush1.bf16.msra.mxu1 %v2854_v7 }
  0xa8   :  { %2996 = vmatprep.subr.bf16.mxu0 %v3179_v8  ;;  %3018 = vmatprep.subr.bf16.mxu1 %v3180_v9 }
  0xaa   :  { %1206 = vmatmul.mubr.bf16.vlgmr.msra.gmra.mrb[12].mxu0 %v3436_v5  ;;  %1249 = vmatmul.mubr.bf16.vlgmr.msra.gmra.mrb[12].mxu1 %v3436_v5  ;;  %v3196_v5 = vld [vmem:[#allocation4 + $0xe0] sm:$0xff]  }
  0xab   :  { %2997 = vmatpush3.bf16.msra.mxu0 %v3181_v10  ;;  %3019 = vmatpush3.bf16.msra.mxu1 %v3182_v11 }
  0xac   :  { %2998 = vmatprep.subr.bf16.mxu0 %v3183_v12  ;;  %3020 = vmatprep.subr.bf16.mxu1 %v3184_v13 }
  0xaf   :  { %2999 = vmatpush3.bf16.msra.mxu0 %v3185_v14  ;;  %3021 = vmatpush3.bf16.msra.mxu1 %v3186_v15 }
  0xb0   :  { %3000 = vmatprep.subr.bf16.mxu0 %v3187_v16  ;;  %3022 = vmatprep.subr.bf16.mxu1 %v3188_v17  ;;  %v3213_v16 = vld [vmem:[#allocation4 + $0x100] sm:$0xff]  }
  0xb3   :  { %3001 = vmatpush3.bf16.msra.mxu0 %v3189_v18  ;;  %3023 = vmatpush3.bf16.msra.mxu1 %v3190_v19  ;;  %v3214_v18 = vld [vmem:[#allocation4 + $0x180] sm:$0xff]   ;;  %v3215_v19 = vld [vmem:[#allocation4 + $0x148] sm:$0xff]  }
  0xb4   :  { %3002 = vmatprep.subr.bf16.mxu0 %v3191_v20  ;;  %3024 = vmatprep.subr.bf16.mxu1 %v3192_v21  ;;  %v3216_v20 = vld [vmem:[#allocation4 + $0x1c8] sm:$0xff]  }
  0xb5   :  { %v3217_v21 = vld [vmem:[#allocation4 + $0x108] sm:$0xff]  }
  0xb7   :  { %3003 = vmatpush3.bf16.msra.mxu0 %v3193_v22  ;;  %3025 = vmatpush3.bf16.msra.mxu1 %v3194_v23  ;;  %v3218_v22 = vld [vmem:[#allocation4 + $0x188] sm:$0xff]   ;;  %v3219_v23 = vld [vmem:[#allocation4 + $0x150] sm:$0xff]  }
  0xb8   :  { %3004 = vmatprep.subr.bf16.mxu0 %v3195_v24  ;;  %3026 = vmatprep.subr.bf16.mxu1 %v3196_v5  ;;  %v3220_v24 = vld [vmem:[#allocation4 + $0x1d0] sm:$0xff]  }
  0xb9   :  { %v3221_v5 = vld [vmem:[#allocation4 + $0x110] sm:$0xff]  }
  0xbb   :  { %3005 = vmatpush3.bf16.msra.mxu0 %v3197_v25  ;;  %3027 = vmatpush3.bf16.msra.mxu1 %v3198_v26  ;;  %v3222_v25 = vld [vmem:[#allocation4 + $0x190] sm:$0xff]   ;;  %v3223_v26 = vld [vmem:[#allocation4 + $0x158] sm:$0xff]  }
  0xbc   :  { %3006 = vmatprep.subr.bf16.mxu0 %v3199_v27  ;;  %3028 = vmatprep.subr.bf16.mxu1 %v3200_v28  ;;  %v3224_v27 = vld [vmem:[#allocation4 + $0x1d8] sm:$0xff]  }
  0xbd   :  { %v3225_v28 = vld [vmem:[#allocation4 + $0x118] sm:$0xff]  }
  0xbf   :  { %3007 = vmatpush3.bf16.msra.mxu0 %v3201_v29  ;;  %3029 = vmatpush3.bf16.msra.mxu1 %v3202_v30  ;;  %v3226_v29 = vld [vmem:[#allocation4 + $0x198] sm:$0xff]   ;;  %v3227_v30 = vld [vmem:[#allocation4 + $0x160] sm:$0xff]  }
  0xc0   :  { %3008 = vmatprep.subr.bf16.mxu0 %v3203_v31  ;;  %3030 = vmatprep.subr.bf16.mxu1 %v3204_v32  ;;  %v3228_v31 = vld [vmem:[#allocation4 + $0x1e0] sm:$0xff]  }
  0xc1   :  { %v3229_v32 = vld [vmem:[#allocation4 + $0x120] sm:$0xff]  }
  0xc3   :  { %3009 = vmatpush3.bf16.msra.mxu0 %v3205_v33  ;;  %3031 = vmatpush3.bf16.msra.mxu1 %v3206_v34  ;;  %v3230_v33 = vld [vmem:[#allocation4 + $0x1a0] sm:$0xff]   ;;  %v3231_v34 = vld [vmem:[#allocation4 + $0x168] sm:$0xff]  }
  0xc4   :  { %3010 = vmatprep.subr.bf16.mxu0 %v3207_v35  ;;  %3032 = vmatprep.subr.bf16.mxu1 %v3208_v36  ;;  %v207_v35 = vsub.s32 4, %v3452_v42  ;;  %v3232_v36 = vld [vmem:[#allocation4 + $0x1e8] sm:$0xff]  }
  0xc6   :  { %v208_v41 = vrot.slane %v3458_v44, %v207_v35 }
  0xc7   :  { %3011 = vmatpush3.bf16.msra.mxu0 %v3209_v37  ;;  %3033 = vmatpush3.bf16.msra.mxu1 %v3210_v38  ;;  %v215_v37 = vsub.s32 6, %v3452_v42  ;;  %v211_v38 = vsub.s32 5, %v3452_v42 }
  0xc8   :  { %3040 = vmatprep.subr.bf16.mxu0 %v3211_v39  ;;  %3062 = vmatprep.subr.bf16.mxu1 %v3212_v40  ;;  %v219_v39 = vsub.s32 7, %v3452_v42  ;;  %v3233_v40 = vld [vmem:[#allocation4 + $0x128] sm:$0xff]  }
 0x11d   :  { %v949_v51 = vpop.f32.mrb[0].mxu0  ;;  %v992_v53 = vpop.f32.mrb[0].mxu1 }
 0x11e   :  { %v950_v52 = vadd.f32 %v949_v51, %v192_v47  ;;  %v951_v54 = vpop.f32.mrb[1].mxu0  ;;  %v993_v55 = vadd.f32 %v992_v53, %v200_v48  ;;  %v994_v57 = vpop.f32.mrb[1].mxu1  ;;  %v3236_v51 = vld [vmem:[#allocation4 + $0x1f0] sm:$0xff]  }
 0x11f   :  { %v952_v56 = vadd.f32 %v951_v54, %v196_v49  ;;  %v953_v58 = vpop.f32.mrb[2].mxu0  ;;  %v995_v60 = vadd.f32 %v994_v57, %v204_v50  ;;  %v996_v62 = vpop.f32.mrb[2].mxu1  ;;  %v3237_v54 = vld [vmem:[#allocation4 + $0x130] sm:$0xff]  }
 0x120   :  { %v1259_v59 = vmax.f32 %v950_v52, 0.0  ;;  %v954_v61 = vadd.f32 %v953_v58, %v192_v47  ;;  %v955_v63 = vpop.f32.mrb[3].mxu0  ;;  %v1261_v1 = vmax.f32 %v993_v55, 0.0  ;;  %v997_v2 = vadd.f32 %v996_v62, %v200_v48  ;;  %v998_v4 = vpop.f32.mrb[3].mxu1  ;;  %v3234_v47 = vld [vmem:[#allocation4 + $0x1a8] sm:$0xff]   ;;  %v3235_v48 = vld [vmem:[#allocation4 + $0x170] sm:$0xff]  }
 0x121   :  { %v956_v3 = vadd.f32 %v955_v63, %v196_v49  ;;  %v1262_v6 = vmax.f32 %v995_v60, 0.0  ;;  %v999_v8 = vadd.f32 %v998_v4, %v204_v50  ;;  %v1260_v9 = vmax.f32 %v952_v56, 0.0  ;;  %v3238_v58 = vld [vmem:[#allocation4 + $0x1b0] sm:$0xff]  }
 0x122   :  { %v1275_v7 = vmax.f32 %v954_v61, 0.0  ;;  %v1277_v10 = vmax.f32 %v997_v2, 0.0  ;;  %v216_v49 = vrot.slane %v3458_v44, %v215_v37  ;;  %v212_v50 = vrot.slane %v3458_v44, %v211_v38 }
 0x123   :  { %v1276_v11 = vmax.f32 %v956_v3, 0.0  ;;  %v1278_v13 = vmax.f32 %v999_v8, 0.0  ;;  %v220_v52 = vrot.slane %v3458_v44, %v219_v39 }
 0x124   :  { %v1291_v12 = vpack.c.bf16 %v1275_v7, %v1259_v59  ;;  %v1293_v14 = vpack.c.bf16 %v1277_v10, %v1261_v1  ;;  %v3239_v59 = vld [vmem:[#allocation4 + $0x178] sm:$0xff]  }
 0x125   :  { %v1292_v15 = vpack.c.bf16 %v1276_v11, %v1260_v9  ;;  %v1294_v17 = vpack.c.bf16 %v1278_v13, %v1262_v6  ;;  %v3240_v1 = vld [vmem:[#allocation4 + $0x1f8] sm:$0xff]  }
 0x126   :  { %v3241_v11 = vld [vmem:[#allocation4 + $0x138] sm:$0xff]  }
 0x127   :  { %2370 = vmatprep.mubr.bf16.mxu0 %v1292_v15  ;;  %2411 = vmatprep.mubr.bf16.mxu1 %v1294_v17  ;;  %v3242_v15 = vld [vmem:[#allocation4 + $0x1b8] sm:$0xff]  }
 0x128   :  { %2371 = vmatmul.mubr.bf16.vlgmr.msra.gmra.mrb[16].mxu0 %v1291_v12  ;;  %2412 = vmatmul.mubr.bf16.vlgmr.msra.gmra.mrb[16].mxu1 %v1293_v14 }
 0x129   :  { %3041 = vmatpush3.bf16.msra.mxu0 %v3213_v16  ;;  %3063 = vmatpush3.bf16.msra.mxu1 %v3214_v18  ;;  %v3243_v16 = vld [vmem:[#allocation4 + $0x240] sm:$0xff]  }
 0x12a   :  { %3042 = vmatprep.subr.bf16.mxu0 %v3215_v19  ;;  %3064 = vmatprep.subr.bf16.mxu1 %v3216_v20  ;;  %v3244_v20 = vld [vmem:[#allocation4 + $0x2c0] sm:$0xff]  }
 0x12d   :  { %3043 = vmatpush3.bf16.msra.mxu0 %v3217_v21  ;;  %3065 = vmatpush3.bf16.msra.mxu1 %v3218_v22 }
 0x12e   :  { %3044 = vmatprep.subr.bf16.mxu0 %v3219_v23  ;;  %3066 = vmatprep.subr.bf16.mxu1 %v3220_v24 }
 0x131   :  { %3045 = vmatpush3.bf16.msra.mxu0 %v3221_v5  ;;  %3067 = vmatpush3.bf16.msra.mxu1 %v3222_v25  ;;  %v3245_v5 = vld [vmem:[#allocation4 + $0x200] sm:$0xff]  }
 0x132   :  { %3046 = vmatprep.subr.bf16.mxu0 %v3223_v26  ;;  %3068 = vmatprep.subr.bf16.mxu1 %v3224_v27  ;;  %v3246_v26 = vld [vmem:[#allocation4 + $0x280] sm:$0xff]   ;;  %v3247_v27 = vld [vmem:[#allocation4 + $0x248] sm:$0xff]  }
 0x135   :  { %3047 = vmatpush3.bf16.msra.mxu0 %v3225_v28  ;;  %3069 = vmatpush3.bf16.msra.mxu1 %v3226_v29  ;;  %v3248_v28 = vld [vmem:[#allocation4 + $0x2c8] sm:$0xff]  }
 0x136   :  { %3048 = vmatprep.subr.bf16.mxu0 %v3227_v30  ;;  %3070 = vmatprep.subr.bf16.mxu1 %v3228_v31  ;;  %v3249_v29 = vld [vmem:[#allocation4 + $0x208] sm:$0xff]   ;;  %v3251_v31 = vld [vmem:[#allocation4 + $0x250] sm:$0xff]  }
 0x137   :  { %v3250_v30 = vld [vmem:[#allocation4 + $0x288] sm:$0xff]  }
 0x139   :  { %3049 = vmatpush3.bf16.msra.mxu0 %v3229_v32  ;;  %3071 = vmatpush3.bf16.msra.mxu1 %v3230_v33  ;;  %v3252_v32 = vld [vmem:[#allocation4 + $0x2d0] sm:$0xff]  }
 0x13a   :  { %3050 = vmatprep.subr.bf16.mxu0 %v3231_v34  ;;  %3072 = vmatprep.subr.bf16.mxu1 %v3232_v36  ;;  %v3253_v33 = vld [vmem:[#allocation4 + $0x210] sm:$0xff]   ;;  %v3255_v36 = vld [vmem:[#allocation4 + $0x258] sm:$0xff]  }
 0x13b   :  { %v3254_v34 = vld [vmem:[#allocation4 + $0x290] sm:$0xff]  }
 0x13d   :  { %v1035_v53 = vpop.f32.mrb[4].mxu0  ;;  %3051 = vmatpush3.bf16.msra.mxu0 %v3233_v40  ;;  %v1078_v56 = vpop.f32.mrb[4].mxu1  ;;  %3073 = vmatpush3.bf16.msra.mxu1 %v3234_v47  ;;  %v3256_v40 = vld [vmem:[#allocation4 + $0x2d8] sm:$0xff]  }
 0x13e   :  { %v1036_v55 = vadd.f32 %v1035_v53, %v208_v41  ;;  %v1037_v57 = vpop.f32.mrb[5].mxu0  ;;  %3052 = vmatprep.subr.bf16.mxu0 %v3235_v48  ;;  %v1079_v60 = vadd.f32 %v1078_v56, %v216_v49  ;;  %v1080_v62 = vpop.f32.mrb[5].mxu1  ;;  %3074 = vmatprep.subr.bf16.mxu1 %v3236_v51  ;;  %v3258_v47 = vld [vmem:[#allocation4 + $0x298] sm:$0xff]   ;;  %v3259_v48 = vld [vmem:[#allocation4 + $0x260] sm:$0xff]   ;;  %v3264_v53 = vld [vmem:[#allocation4 + $0x2e8] sm:$0xff]  }
 0x13f   :  { %v1038_v61 = vadd.f32 %v1037_v57, %v212_v50  ;;  %v1039_v63 = vpop.f32.mrb[6].mxu0  ;;  %v1081_v3 = vadd.f32 %v1080_v62, %v220_v52  ;;  %v1082_v44 = vpop.f32.mrb[6].mxu1  ;;  %v3262_v51 = vld [vmem:[#allocation4 + $0x2a0] sm:$0xff]   ;;  %v3266_v57 = vld [vmem:[#allocation4 + $0x2a8] sm:$0xff]  }
 0x140   :  { %v1263_v2 = vmax.f32 %v1036_v55, 0.0  ;;  %v1040_v4 = vadd.f32 %v1039_v63, %v208_v41  ;;  %v1041_v6 = vpop.f32.mrb[7].mxu0  ;;  %v1265_v7 = vmax.f32 %v1079_v60, 0.0  ;;  %v1083_v8 = vadd.f32 %v1082_v44, %v216_v49  ;;  %v1084_v10 = vpop.f32.mrb[7].mxu1  ;;  %v3257_v41 = vld [vmem:[#allocation4 + $0x218] sm:$0xff]   ;;  %v3260_v49 = vld [vmem:[#allocation4 + $0x2e0] sm:$0xff]  }
 0x141   :  { %v1042_v9 = vadd.f32 %v1041_v6, %v212_v50  ;;  %3053 = vmatpush3.bf16.msra.mxu0 %v3237_v54  ;;  %v1266_v12 = vmax.f32 %v1081_v3, 0.0  ;;  %v1085_v14 = vadd.f32 %v1084_v10, %v220_v52  ;;  %3075 = vmatpush3.bf16.msra.mxu1 %v3238_v58  ;;  %v1264_v17 = vmax.f32 %v1038_v61, 0.0  ;;  %v3261_v50 = vld [vmem:[#allocation4 + $0x220] sm:$0xff]   ;;  %v3263_v52 = vld [vmem:[#allocation4 + $0x268] sm:$0xff]   ;;  %v3267_v58 = vld [vmem:[#allocation4 + $0x270] sm:$0xff]  }
 0x142   :  { %v1279_v13 = vmax.f32 %v1040_v4, 0.0  ;;  %3054 = vmatprep.subr.bf16.mxu0 %v3239_v59  ;;  %v1281_v18 = vmax.f32 %v1083_v8, 0.0  ;;  %3076 = vmatprep.subr.bf16.mxu1 %v3240_v1  ;;  %v3494_v54 = vld [vmem:[%s3537_s2 + $0x8] sm:$0xff]  ;;  %v3268_v61 = vld [vmem:[#allocation4 + $0x2f0] sm:$0xff]   ;;  %v3271_v44 = vld [vmem:[#allocation4 + $0x278] sm:$0xff]  }
 0x143   :  { %v1280_v19 = vmax.f32 %v1042_v9, 0.0  ;;  %v1282_v22 = vmax.f32 %v1085_v14, 0.0  ;;  %v3265_v55 = vld [vmem:[#allocation4 + $0x228] sm:$0xff]   ;;  %v224_v56 = vrot.slane %v3494_v54, %v191_v43  ;;  %v232_v59 = vrot.slane %v3494_v54, %v199_v0  ;;  %v3269_v1 = vld [vmem:[#allocation4 + $0x230] sm:$0xff]  }
 0x144   :  { %v1295_v21 = vpack.c.bf16 %v1279_v13, %v1263_v2  ;;  %v1297_v23 = vpack.c.bf16 %v1281_v18, %v1265_v7  ;;  %v228_v60 = vrot.slane %v3494_v54, %v195_v45  ;;  %v236_v62 = vrot.slane %v3494_v54, %v203_v46  ;;  %v3270_v4 = vld [vmem:[#allocation4 + $0x2b0] sm:$0xff]   ;;  %v3272_v45 = vld [vmem:[#allocation4 + $0x2f8] sm:$0xff]  }
 0x145   :  { %v1296_v24 = vpack.c.bf16 %v1280_v19, %v1264_v17  ;;  %3055 = vmatpush3.bf16.msra.mxu0 %v3241_v11  ;;  %v1298_v25 = vpack.c.bf16 %v1282_v22, %v1266_v12  ;;  %3077 = vmatpush3.bf16.msra.mxu1 %v3242_v15  ;;  %v3273_v17 = vld [vmem:[#allocation4 + $0x238] sm:$0xff]   ;;  %v3275_v22 = vld [vmem:[#allocation4 + $0x340] sm:$0xff]  }
 0x146   :  { %3084 = vmatprep.subr.bf16.mxu0 %v3243_v16  ;;  %3106 = vmatprep.subr.bf16.mxu1 %v3244_v20 }
 0x147   :  { %2452 = vmatprep.mubr.bf16.mxu0 %v1296_v24  ;;  %2493 = vmatprep.mubr.bf16.mxu1 %v1298_v25  ;;  %v3276_v25 = vld [vmem:[#allocation4 + $0x3c0] sm:$0xff]  }
 0x148   :  { %2453 = vmatmul.mubr.bf16.vlgmr.msra.gmra.mrb[20].mxu0 %v1295_v21  ;;  %2494 = vmatmul.mubr.bf16.vlgmr.msra.gmra.mrb[20].mxu1 %v1297_v23  ;;  %v3274_v21 = vld [vmem:[#allocation4 + $0x2b8] sm:$0xff]  }
 0x149   :  { %3085 = vmatpush3.bf16.msra.mxu0 %v3245_v5  ;;  %3107 = vmatpush3.bf16.msra.mxu1 %v3246_v26 }
 0x14a   :  { %3086 = vmatprep.subr.bf16.mxu0 %v3247_v27  ;;  %3108 = vmatprep.subr.bf16.mxu1 %v3248_v28 }
 0x14d   :  { %3087 = vmatpush3.bf16.msra.mxu0 %v3249_v29  ;;  %3109 = vmatpush3.bf16.msra.mxu1 %v3250_v30  ;;  %v3277_v30 = vld [vmem:[#allocation4 + $0x300] sm:$0xff]  }
 0x14e   :  { %3088 = vmatprep.subr.bf16.mxu0 %v3251_v31  ;;  %3110 = vmatprep.subr.bf16.mxu1 %v3252_v32  ;;  %v3278_v32 = vld [vmem:[#allocation4 + $0x380] sm:$0xff]  }
 0x151   :  { %3089 = vmatpush3.bf16.msra.mxu0 %v3253_v33  ;;  %3111 = vmatpush3.bf16.msra.mxu1 %v3254_v34  ;;  %v3279_v33 = vld [vmem:[#allocation4 + $0x348] sm:$0xff]  }
 0x152   :  { %3090 = vmatprep.subr.bf16.mxu0 %v3255_v36  ;;  %3112 = vmatprep.subr.bf16.mxu1 %v3256_v40  ;;  %v3280_v34 = vld [vmem:[#allocation4 + $0x3c8] sm:$0xff]  }
 0x153   :  { %v3281_v36 = vld [vmem:[#allocation4 + $0x308] sm:$0xff]  }
 0x154   :  { %v3282_v40 = vld [vmem:[#allocation4 + $0x388] sm:$0xff]  }
 0x155   :  { %3091 = vmatpush3.bf16.msra.mxu0 %v3257_v41  ;;  %3113 = vmatpush3.bf16.msra.mxu1 %v3258_v47  ;;  %v3283_v41 = vld [vmem:[#allocation4 + $0x350] sm:$0xff]  }
 0x156   :  { %3092 = vmatprep.subr.bf16.mxu0 %v3259_v48  ;;  %3114 = vmatprep.subr.bf16.mxu1 %v3260_v49  ;;  %v3284_v47 = vld [vmem:[#allocation4 + $0x3d0] sm:$0xff]  }
 0x157   :  { %v3285_v48 = vld [vmem:[#allocation4 + $0x310] sm:$0xff]  }
 0x158   :  { %v3286_v49 = vld [vmem:[#allocation4 + $0x390] sm:$0xff]  }
 0x159   :  { %3093 = vmatpush3.bf16.msra.mxu0 %v3261_v50  ;;  %3115 = vmatpush3.bf16.msra.mxu1 %v3262_v51  ;;  %v3287_v50 = vld [vmem:[#allocation4 + $0x358] sm:$0xff]  }
 0x15a   :  { %3094 = vmatprep.subr.bf16.mxu0 %v3263_v52  ;;  %3116 = vmatprep.subr.bf16.mxu1 %v3264_v53  ;;  %v3288_v51 = vld [vmem:[#allocation4 + $0x3d8] sm:$0xff]  }
 0x15b   :  { %v3289_v52 = vld [vmem:[#allocation4 + $0x318] sm:$0xff]  }
 0x15c   :  { %v3290_v53 = vld [vmem:[#allocation4 + $0x398] sm:$0xff]  }
 0x15d   :  { %v1121_v63 = vpop.f32.mrb[8].mxu0  ;;  %3095 = vmatpush3.bf16.msra.mxu0 %v3265_v55  ;;  %v1164_v2 = vpop.f32.mrb[8].mxu1  ;;  %3117 = vmatpush3.bf16.msra.mxu1 %v3266_v57  ;;  %v3291_v55 = vld [vmem:[#allocation4 + $0x360] sm:$0xff]  }
 0x15e   :  { %v1122_v43 = vadd.f32 %v1121_v63, %v224_v56  ;;  %v1123_v3 = vpop.f32.mrb[9].mxu0  ;;  %3096 = vmatprep.subr.bf16.mxu0 %v3267_v58  ;;  %v1165_v0 = vadd.f32 %v1164_v2, %v232_v59  ;;  %v1166_v7 = vpop.f32.mrb[9].mxu1  ;;  %3118 = vmatprep.subr.bf16.mxu1 %v3268_v61  ;;  %v3293_v57 = vld [vmem:[#allocation4 + $0x320] sm:$0xff]   ;;  %v3297_v61 = vld [vmem:[#allocation4 + $0x328] sm:$0xff]   ;;  %v244_v2 = vrot.slane %v3494_v54, %v211_v38  ;;  %v3304_v38 = vld [vmem:[#allocation4 + $0x3f8] sm:$0xff]  }
 0x15f   :  { %v1124_v6 = vadd.f32 %v1123_v3, %v228_v60  ;;  %v1125_v8 = vpop.f32.mrb[10].mxu0  ;;  %v1167_v10 = vadd.f32 %v1166_v7, %v236_v62  ;;  %v1168_v46 = vpop.f32.mrb[10].mxu1  ;;  %v3294_v58 = vld [vmem:[#allocation4 + $0x3a0] sm:$0xff]   ;;  %v3298_v63 = vld [vmem:[#allocation4 + $0x3a8] sm:$0xff]   ;;  %v3300_v3 = vld [vmem:[#allocation4 + $0x3f0] sm:$0xff]  }
 0x160   :  { %v1267_v9 = vmax.f32 %v1122_v43, 0.0  ;;  %v1126_v11 = vadd.f32 %v1125_v8, %v224_v56  ;;  %v1127_v12 = vpop.f32.mrb[11].mxu0  ;;  %v1269_v13 = vmax.f32 %v1165_v0, 0.0  ;;  %v1169_v14 = vadd.f32 %v1168_v46, %v232_v59  ;;  %v1170_v16 = vpop.f32.mrb[11].mxu1  ;;  %v3292_v56 = vld [vmem:[#allocation4 + $0x3e0] sm:$0xff]   ;;  %v3295_v59 = vld [vmem:[#allocation4 + $0x368] sm:$0xff]  }
 0x161   :  { %v1128_v15 = vadd.f32 %v1127_v12, %v228_v60  ;;  %3097 = vmatpush3.bf16.msra.mxu0 %v3269_v1  ;;  %v1270_v18 = vmax.f32 %v1167_v10, 0.0  ;;  %v1171_v20 = vadd.f32 %v1170_v16, %v236_v62  ;;  %3119 = vmatpush3.bf16.msra.mxu1 %v3270_v4  ;;  %v1268_v23 = vmax.f32 %v1124_v6, 0.0  ;;  %v3296_v60 = vld [vmem:[#allocation4 + $0x3e8] sm:$0xff]   ;;  %v3299_v1 = vld [vmem:[#allocation4 + $0x370] sm:$0xff]   ;;  %v3305_v16 = vld [vmem:[#allocation4 + $0x338] sm:$0xff]  }
 0x162   :  { %v1283_v19 = vmax.f32 %v1126_v11, 0.0  ;;  %3098 = vmatprep.subr.bf16.mxu0 %v3271_v44  ;;  %v1285_v24 = vmax.f32 %v1169_v14, 0.0  ;;  %3120 = vmatprep.subr.bf16.mxu1 %v3272_v45  ;;  %v240_v62 = vrot.slane %v3494_v54, %v207_v35  ;;  %v248_v43 = vrot.slane %v3494_v54, %v215_v37  ;;  %v3301_v0 = vld [vmem:[#allocation4 + $0x330] sm:$0xff]   ;;  %v3303_v45 = vld [vmem:[#allocation4 + $0x378] sm:$0xff]  }
 0x163   :  { %v1284_v5 = vmax.f32 %v1128_v15, 0.0  ;;  %v1286_v27 = vmax.f32 %v1171_v20, 0.0  ;;  %v252_v4 = vrot.slane %v3494_v54, %v219_v39  ;;  %v3302_v8 = vld [vmem:[#allocation4 + $0x3b0] sm:$0xff]  }
 0x164   :  { %v1299_v26 = vpack.c.bf16 %v1283_v19, %v1267_v9  ;;  %v1301_v28 = vpack.c.bf16 %v1285_v24, %v1269_v13 }
 0x165   :  { %v1300_v29 = vpack.c.bf16 %v1284_v5, %v1268_v23  ;;  %3099 = vmatpush3.bf16.msra.mxu0 %v3273_v17  ;;  %v1302_v31 = vpack.c.bf16 %v1286_v27, %v1270_v18  ;;  %3121 = vmatpush3.bf16.msra.mxu1 %v3274_v21  ;;  %v3306_v21 = vld [vmem:[#allocation4 + $0x3b8] sm:$0xff]  }
 0x166   :  { %3128 = vmatprep.subr.bf16.mxu0 %v3275_v22  ;;  %3150 = vmatprep.subr.bf16.mxu1 %v3276_v25 }
 0x167   :  { %2534 = vmatprep.mubr.bf16.mxu0 %v1300_v29  ;;  %2575 = vmatprep.mubr.bf16.mxu1 %v1302_v31  ;;  %v2856_v31 = vld [vmem:[%s3539_s4] ss:$0 sm:$0xff] }
 0x168   :  { %2535 = vmatmul.mubr.bf16.vlgmr.msra.gmra.mrb[24].mxu0 %v1299_v26  ;;  %2576 = vmatmul.mubr.bf16.vlgmr.msra.gmra.mrb[24].mxu1 %v1301_v28 }
 0x169   :  { %3129 = vmatpush3.bf16.msra.mxu0 %v3277_v30  ;;  %3151 = vmatpush3.bf16.msra.mxu1 %v3278_v32 }
 0x16a   :  { %3130 = vmatprep.subr.bf16.mxu0 %v3279_v33  ;;  %3152 = vmatprep.subr.bf16.mxu1 %v3280_v34 }
 0x16d   :  { %3131 = vmatpush3.bf16.msra.mxu0 %v3281_v36  ;;  %3153 = vmatpush3.bf16.msra.mxu1 %v3282_v40 }
 0x16e   :  { %3132 = vmatprep.subr.bf16.mxu0 %v3283_v41  ;;  %3154 = vmatprep.subr.bf16.mxu1 %v3284_v47 }
 0x171   :  { %3133 = vmatpush3.bf16.msra.mxu0 %v3285_v48  ;;  %3155 = vmatpush3.bf16.msra.mxu1 %v3286_v49 }
 0x172   :  { %3134 = vmatprep.subr.bf16.mxu0 %v3287_v50  ;;  %3156 = vmatprep.subr.bf16.mxu1 %v3288_v51 }
 0x175   :  { %3135 = vmatpush3.bf16.msra.mxu0 %v3289_v52  ;;  %3157 = vmatpush3.bf16.msra.mxu1 %v3290_v53 }
 0x176   :  { %3136 = vmatprep.subr.bf16.mxu0 %v3291_v55  ;;  %3158 = vmatprep.subr.bf16.mxu1 %v3292_v56 }
 0x179   :  { %3137 = vmatpush3.bf16.msra.mxu0 %v3293_v57  ;;  %3159 = vmatpush3.bf16.msra.mxu1 %v3294_v58 }
 0x17a   :  { %3138 = vmatprep.subr.bf16.mxu0 %v3295_v59  ;;  %3160 = vmatprep.subr.bf16.mxu1 %v3296_v60 }
 0x17d   :  { %v1207_v44 = vpop.f32.mrb[12].mxu0  ;;  %3139 = vmatpush3.bf16.msra.mxu0 %v3297_v61  ;;  %v1250_v6 = vpop.f32.mrb[12].mxu1  ;;  %3161 = vmatpush3.bf16.msra.mxu1 %v3298_v63 }
 0x17e   :  { %v1208_v35 = vadd.f32 %v1207_v44, %v240_v62  ;;  %v1209_v7 = vpop.f32.mrb[13].mxu0  ;;  %3140 = vmatprep.subr.bf16.mxu0 %v3299_v1  ;;  %v1251_v37 = vadd.f32 %v1250_v6, %v248_v43  ;;  %v1252_v10 = vpop.f32.mrb[13].mxu1  ;;  %3162 = vmatprep.subr.bf16.mxu1 %v3300_v3 }
 0x17f   :  { %v1210_v9 = vadd.f32 %v1209_v7, %v244_v2  ;;  %v1211_v11 = vpop.f32.mrb[14].mxu0  ;;  %v1253_v46 = vadd.f32 %v1252_v10, %v252_v4  ;;  %v1254_v12 = vpop.f32.mrb[14].mxu1 }
 0x180   :  { %v1212_v42 = vadd.f32 %v1211_v11, %v240_v62  ;;  %v1213_v39 = vpop.f32.mrb[15].mxu0  ;;  %v1273_v54 = vmax.f32 %v1251_v37, 0.0  ;;  %v1255_v13 = vadd.f32 %v1254_v12, %v248_v43  ;;  %v1256_v15 = vpop.f32.mrb[15].mxu1  ;;  %v1271_v17 = vmax.f32 %v1208_v35, 0.0 }
 0x181   :  { %v1214_v14 = vadd.f32 %v1213_v39, %v244_v2  ;;  %3141 = vmatpush3.bf16.msra.mxu0 %v3301_v0  ;;  %v1274_v18 = vmax.f32 %v1253_v46, 0.0  ;;  %v1257_v20 = vadd.f32 %v1256_v15, %v252_v4  ;;  %3163 = vmatpush3.bf16.msra.mxu1 %v3302_v8  ;;  %v1272_v22 = vmax.f32 %v1210_v9, 0.0 }
 0x182   :  { %v1287_v19 = vmax.f32 %v1212_v42, 0.0  ;;  %3142 = vmatprep.subr.bf16.mxu0 %v3303_v45  ;;  %v1289_v23 = vmax.f32 %v1255_v13, 0.0  ;;  %3164 = vmatprep.subr.bf16.mxu1 %v3304_v38 }
 0x183   :  { %v1288_v24 = vmax.f32 %v1214_v14, 0.0  ;;  %v1290_v25 = vmax.f32 %v1257_v20, 0.0 }
 0x184   :  { %v1303_v5 = vpack.c.bf16 %v1287_v19, %v1271_v17  ;;  %v1305_v26 = vpack.c.bf16 %v1289_v23, %v1273_v54 }
 0x185   :  { %v1304_v27 = vpack.c.bf16 %v1288_v24, %v1272_v22  ;;  %3143 = vmatpush3.bf16.msra.mxu0 %v3305_v16  ;;  %v1306_v28 = vpack.c.bf16 %v1290_v25, %v1274_v18  ;;  %3165 = vmatpush3.bf16.msra.mxu1 %v3306_v21 }
 0x187   :  { %2616 = vmatprep.mubr.bf16.mxu0 %v1304_v27  ;;  %2657 = vmatprep.mubr.bf16.mxu1 %v1306_v28 }
 0x188   :  { %2617 = vmatmul.mubr.bf16.vlgmr.msra.gmra.mrb[28].mxu0 %v1303_v5  ;;  %2658 = vmatmul.mubr.bf16.vlgmr.msra.gmra.mrb[28].mxu1 %v1305_v26  ;;  %v3312_v26 = vld [vmem:[%s3535_s0] sm:$0xff]  }
 0x189   :  { %v2666_v27 = vunpack.c.l.bf16 %v3312_v26 }
 0x1fb   :  { %v3012_v29 = vpop.f32.mrb[16].mxu0  ;;  %v3034_v30 = vpop.f32.mrb[16].mxu1 }
 0x1fc   :  { %v3013_v32 = vpop.f32.mrb[17].mxu0  ;;  %v3035_v34 = vpop.f32.mrb[17].mxu1 }
 0x1fd   :  { %v3014_v33 = vadd.f32 %v3013_v32, %v3012_v29  ;;  %v3015_v36 = vpop.f32.mrb[18].mxu0  ;;  %v3036_v40 = vadd.f32 %v3035_v34, %v3034_v30  ;;  %v3037_v41 = vpop.f32.mrb[18].mxu1 }
 0x1fe   :  { %v3016_v47 = vpop.f32.mrb[19].mxu0  ;;  %v3038_v50 = vpop.f32.mrb[19].mxu1 }
 0x1ff   :  { %v2373_v48 = vadd.f32 %v3014_v33, %v2856_v31  ;;  %v3017_v49 = vadd.f32 %v3016_v47, %v3015_v36  ;;  %v3039_v51 = vadd.f32 %v3038_v50, %v3037_v41  ;;  %v2667_v33 = vunpack.c.h.bf16 %v3312_v26 }
 0x201   :  { %v2414_v52 = vadd.f32 %v3036_v40, %v2373_v48  ;;  %v2376_v53 = vadd.f32 %v3017_v49, %v2856_v31 }
 0x203   :  { %v2417_v55 = vadd.f32 %v3039_v51, %v2376_v53 }
 0x21b   :  { %v3056_v56 = vpop.f32.mrb[20].mxu0  ;;  %v3078_v57 = vpop.f32.mrb[20].mxu1 }
 0x21c   :  { %v3057_v58 = vpop.f32.mrb[21].mxu0  ;;  %v3079_v60 = vpop.f32.mrb[21].mxu1 }
 0x21d   :  { %v3058_v59 = vadd.f32 %v3057_v58, %v3056_v56  ;;  %v3059_v61 = vpop.f32.mrb[22].mxu0  ;;  %v3080_v62 = vadd.f32 %v3079_v60, %v3078_v57  ;;  %v3081_v63 = vpop.f32.mrb[22].mxu1 }
 0x21e   :  { %v3060_v1 = vpop.f32.mrb[23].mxu0  ;;  %v3082_v3 = vpop.f32.mrb[23].mxu1 }
 0x21f   :  { %v2455_v43 = vadd.f32 %v3058_v59, %v2414_v52  ;;  %v3061_v2 = vadd.f32 %v3060_v1, %v3059_v61  ;;  %v3083_v4 = vadd.f32 %v3082_v3, %v3081_v63  ;;  %v2985_v61 = vld [vmem:[%s3540_s5] ss:$0 sm:$0xff] }
 0x221   :  { %v2496_v44 = vadd.f32 %v3080_v62, %v2455_v43  ;;  %v2458_v0 = vadd.f32 %v3061_v2, %v2417_v55  ;;  %v2986_v43 = vld [vmem:[%s3541_s6] ss:$0 sm:$0xff] }
 0x223   :  { %v2499_v35 = vadd.f32 %v3083_v4, %v2458_v0 }
 0x23b   :  { %v3100_v6 = vpop.f32.mrb[24].mxu0  ;;  %v3122_v7 = vpop.f32.mrb[24].mxu1 }
 0x23c   :  { %v3101_v8 = vpop.f32.mrb[25].mxu0  ;;  %v3123_v37 = vpop.f32.mrb[25].mxu1 }
 0x23d   :  { %v3102_v45 = vadd.f32 %v3101_v8, %v3100_v6  ;;  %v3103_v9 = vpop.f32.mrb[26].mxu0  ;;  %v3124_v10 = vadd.f32 %v3123_v37, %v3122_v7  ;;  %v3125_v11 = vpop.f32.mrb[26].mxu1 }
 0x23e   :  { %v3104_v38 = vpop.f32.mrb[27].mxu0  ;;  %v3126_v12 = vpop.f32.mrb[27].mxu1 }
 0x23f   :  { %v2537_v46 = vadd.f32 %v3102_v45, %v2496_v44  ;;  %v3105_v42 = vadd.f32 %v3104_v38, %v3103_v9  ;;  %v3127_v39 = vadd.f32 %v3126_v12, %v3125_v11 }
 0x241   :  { %v2578_v54 = vadd.f32 %v3124_v10, %v2537_v46  ;;  %v2540_v13 = vadd.f32 %v3105_v42, %v2499_v35 }
 0x243   :  { %v2581_v14 = vadd.f32 %v3127_v39, %v2540_v13 }
 0x25b   :  { %v3144_v15 = vpop.f32.mrb[28].mxu0  ;;  %v3166_v16 = vpop.f32.mrb[28].mxu1 }
 0x25c   :  { %v3145_v17 = vpop.f32.mrb[29].mxu0  ;;  %v3167_v19 = vpop.f32.mrb[29].mxu1 }
 0x25d   :  { %v3146_v18 = vadd.f32 %v3145_v17, %v3144_v15  ;;  %v3147_v20 = vpop.f32.mrb[30].mxu0  ;;  %v3168_v21 = vadd.f32 %v3167_v19, %v3166_v16  ;;  %v3169_v22 = vpop.f32.mrb[30].mxu1 }
 0x25e   :  { %v3148_v23 = vpop.f32.mrb[31].mxu0  ;;  %v3170_v25 = vpop.f32.mrb[31].mxu1 }
 0x25f   :  { %v2619_v24 = vadd.f32 %v3146_v18, %v2578_v54  ;;  %v3149_v5 = vadd.f32 %v3148_v23, %v3147_v20  ;;  %v3171_v28 = vadd.f32 %v3170_v25, %v3169_v22 }
 0x261   :  { %v2660_v29 = vadd.f32 %v3168_v21, %v2619_v24  ;;  %v2622_v30 = vadd.f32 %v3149_v5, %v2581_v14 }
 0x263   :  { %v2663_v31 = vadd.f32 %v3171_v28, %v2622_v30  ;;  %v2670_v32 = vadd.f32 %v2666_v27, %v2660_v29 }
 0x265   :  { %2672 = vadd.xlane.f32.xlu0 %v2670_v32  ;;  %v2671_v34 = vadd.f32 %v2667_v33, %v2663_v31 }
 0x269   :  { %2674 = vadd.xlane.f32.xlu0 %v2671_v34 }
 0x2f2   :  { %v2673_v36 = vpop.xlane.xlu0 %2672 }
 0x2f3   :  { %v2677_v40 = vmul.f32 0.0078125, %v2673_v36 }
 0x2f5   :  { %v2679_v41 = vsub.f32 %v2670_v32, %v2677_v40 }
 0x2f6   :  { %v2675_v47 = vpop.xlane.xlu0 %2674 }
 0x2f7   :  { %v2678_v48 = vmul.f32 0.0078125, %v2675_v47  ;;  %v2681_v49 = vmul.f32 %v2679_v41, %v2679_v41 }
 0x2f9   :  { %v2680_v50 = vsub.f32 %v2671_v34, %v2678_v48  ;;  %2683 = vadd.xlane.f32.xlu1 %v2681_v49 }
 0x2fb   :  { %v2682_v51 = vmul.f32 %v2680_v50, %v2680_v50 }
 0x2fd   :  { %2685 = vadd.xlane.f32.xlu1 %v2682_v51 }
 0x386   :  { %v2684_v52 = vpop.xlane.xlu1 %2683 }
 0x387   :  { %v2687_v53 = vmul.f32 0.0078125, %v2684_v52 }
 0x389   :  { %v2689_v55 = vadd.f32 1e-05, %v2687_v53 }
 0x38a   :  { %v2686_v56 = vpop.xlane.xlu1 %2685 }
 0x38b   :  { %3308 = vrsqrt.f32 %v2689_v55  ;;  %v2688_v57 = vmul.f32 0.0078125, %v2686_v56 }
 0x38d   :  { %v2690_v58 = vadd.f32 1e-05, %v2688_v57 }
 0x38f   :  { %3310 = vrsqrt.f32 %v2690_v58 }
 0x395   :  { %v3309_v59 = vpop.eup %3308 }
 0x396   :  { %v2693_v60 = vmul.f32 %v3309_v59, %v2679_v41 }
 0x398   :  { %v2701_v63 = vmul.f32 %v2985_v61, %v2693_v60 }
 0x399   :  { %v3311_v62 = vpop.eup %3310 }
 0x39a   :  { %v2694_v1 = vmul.f32 %v3311_v62, %v2680_v50  ;;  %v2709_v3 = vadd.f32 %v2986_v43, %v2701_v63 }
 0x39c   :  { %v2702_v2 = vmul.f32 %v2985_v61, %v2694_v1 }
 0x39e   :  { %v2710_v4 = vadd.f32 %v2986_v43, %v2702_v2 }
 0x3a0   :  { %v2994_v44 = vpack.c.bf16 %v2710_v4, %v2709_v3 }
 0x3a2   :  { %2995 = vst [vmem:[%s3542_s7] sm:$0xff] %v2994_v44  }
 0x3a3   :  { %2725 = vsyncpa [#allocation3], 1 }
 0x3a4   :  { %2726 = vsyncpa [#allocation5], 1 }

</bundles_post_ra>
